<compile_context>
chip_gen: v6e
topology: v6e:2x2x1
jax: 0.10.0
libtpu: 0.0.40
codegen_flags: <defaults>
</compile_context>

<pallas_src>
from functools import partial

import jax
import jax.numpy as jnp
from jax.experimental import pallas as pl
from jax.experimental.pallas import tpu as pltpu


# --------------------------------------------------------------------------
# Kernel 1: 7x7 stride-2 conv (+ folded BN + ReLU)
#
# Parity planes are passed with rows flattened:  plane[b, r*SW + col, c]
# where SW = OW + 3.  For output tile i, tap (dh, dw) and output (r, j) the
# needed element lives at flat row  (i*TR + r + dh//2)*SW + (dw//2 + j),
# i.e. a single unit-stride dynamic slice of length M = TR*SW per tap (the
# SW - OW junk columns per row are computed and sliced off in the wrapper).
# --------------------------------------------------------------------------
def _conv_bn_relu_kernel(xee, xeo, xoe, xoo, w_ref, shift_ref, o_ref, patch_ref,
                         *, TR, SW, C, KH, KW):
    i = pl.program_id(1)
    planes = ((xee, xeo), (xoe, xoo))          # [row parity][col parity]
    M = TR * SW

    # Gather the 49 taps into the (M, KH*KW*C) patch tile held in VMEM
    # (no HBM im2col; all slices are unit-stride with a dynamic row start).
    for dh in range(KH):
        for dw in range(KW):
            src = planes[dh % 2][dw % 2]
            start = (i * TR + dh // 2) * SW + dw // 2
            t = dh * KW + dw
            patch_ref[:, t * C:(t + 1) * C] = src[0, pl.ds(start, M), :]

    # One big MXU matmul in bf16, f32 accumulate; BN scale is already folded
    # into w_ref, so the epilogue is shift + ReLU only.
    acc = jnp.dot(patch_ref[...].astype(jnp.bfloat16), w_ref[...],
                  preferred_element_type=jnp.float32)
    o_ref[0] = jnp.maximum(acc + shift_ref[...], 0.0)


def conv_bn_relu(x_nhwc, weight_oihw, scale, shift, *, stride=2, pad=3,
                 row_tile=8):
    N, H, W, C = x_nhwc.shape
    OC, IC, KH, KW = weight_oihw.shape
    assert IC == C and stride == 2 and row_tile % 8 == 0
    OH = (H + 2 * pad - KH) // stride + 1
    OW = (W + 2 * pad - KW) // stride + 1

    TR = row_tile
    n_rt = -(-OH // TR)
    OH_pad = n_rt * TR
    SH, SW = OH_pad + 4, OW + 3                 # parity-plane extents (w/ halo)
    ph, pw = 2 * SH, 2 * SW

    # --- glue (plain JAX, 1x data): zero pad + even/odd parity split ---
    xp = jnp.zeros((N, ph, pw, C), jnp.float32)
    xp = xp.at[:, pad:pad + H, pad:pad + W, :].set(x_nhwc.astype(jnp.float32))
    planes = [xp[:, a::2, b::2, :].reshape(N, SH * SW, C)
              for a in (0, 1) for b in (0, 1)]   # ee, eo, oe, oo

    # (OC, IC, KH, KW) -> (KH*KW*IC, OC), BN scale folded, bf16 for the MXU.
    w = jnp.transpose(weight_oihw, (2, 3, 1, 0)) * scale.reshape(1, 1, 1, OC)
    w = w.reshape(KH * KW * IC, OC).astype(jnp.bfloat16)
    shift2 = shift.reshape(1, OC).astype(jnp.float32)

    M = TR * SW
    kernel = partial(_conv_bn_relu_kernel, TR=TR, SW=SW, C=C, KH=KH, KW=KW)
    plane_spec = pl.BlockSpec((1, SH * SW, C), lambda b, i: (b, 0, 0))

    out = pl.pallas_call(
        kernel,
        out_shape=jax.ShapeDtypeStruct((N, OH_pad * SW, OC), jnp.float32),
        grid_spec=pltpu.PrefetchScalarGridSpec(
            num_scalar_prefetch=0,
            grid=(N, n_rt),
            in_specs=[plane_spec, plane_spec, plane_spec, plane_spec,
                      pl.BlockSpec((KH * KW * IC, OC), lambda b, i: (0, 0)),
                      pl.BlockSpec((1, OC), lambda b, i: (0, 0))],
            out_specs=pl.BlockSpec((1, M, OC), lambda b, i: (b, i, 0)),
            scratch_shapes=[pltpu.VMEM((M, KH * KW * C), jnp.float32)],
        ),
        compiler_params=pltpu.CompilerParams(
            dimension_semantics=("parallel", "parallel"),
            vmem_limit_bytes=32 * 1024 * 1024),
    )(*planes, w, shift2)

    # drop the SW-OW junk columns / padded rows
    return out.reshape(N, OH_pad, SW, OC)[:, :OH, :OW, :]


# --------------------------------------------------------------------------
# Kernel 2: MaxPool2d(3, 2, 1, ceil_mode=True), vectorized.
#
# The -inf padded input is parity-split (even/odd rows x cols), so the 3x3/s2
# window is the elementwise max of 9 unit-stride shifted slices -- whole-tile
# VPU maxes, no per-pixel loops or masked stores.
# --------------------------------------------------------------------------
def _maxpool_kernel(pee, peo, poe, poo, o_ref, *, TP, PW):
    r0 = pl.program_id(1) * TP

    def win(ref, a, b):
        return ref[0, pl.ds(r0 + a, TP), pl.ds(b, PW), :]

    m = win(pee, 0, 0)
    for ref, a, b in ((pee, 0, 1), (pee, 1, 0), (pee, 1, 1),
                      (peo, 0, 0), (peo, 1, 0),
                      (poe, 0, 0), (poe, 0, 1),
                      (poo, 0, 0)):
        m = jnp.maximum(m, win(ref, a, b))
    o_ref[0] = m


def maxpool_ceil(x_nhwc, *, k=3, stride=2, pad=1, row_tile=8):
    assert k == 3 and stride == 2 and pad == 1
    N, H, W, C = x_nhwc.shape

    def out_size(sz):                            # PyTorch ceil_mode rule
        o = -(-(sz + 2 * pad - k) // stride) + 1
        if (o - 1) * stride >= sz + pad:
            o -= 1
        return o

    PH_o, PW_o = out_size(H), out_size(W)
    TP = row_tile
    n_prt = -(-PH_o // TP)
    PH_pad = n_prt * TP
    ph, pw = 2 * PH_pad + 2, 2 * PW_o + 2        # -inf padded extents (even)

    yp = jnp.full((N, ph, pw, C), -jnp.inf, dtype=x_nhwc.dtype)
    yp = yp.at[:, pad:pad + H, pad:pad + W, :].set(x_nhwc)
    planes = [yp[:, a::2, b::2, :] for a in (0, 1) for b in (0, 1)]
    SH, SW = PH_pad + 1, PW_o + 1                # parity-plane extents

    kernel = partial(_maxpool_kernel, TP=TP, PW=PW_o)
    plane_spec = pl.BlockSpec((1, SH, SW, C), lambda b, i: (b, 0, 0, 0))

    out = pl.pallas_call(
        kernel,
        out_shape=jax.ShapeDtypeStruct((N, PH_pad, PW_o, C), x_nhwc.dtype),
        grid_spec=pltpu.PrefetchScalarGridSpec(
            num_scalar_prefetch=0,
            grid=(N, n_prt),
            in_specs=[plane_spec, plane_spec, plane_spec, plane_spec],
            out_specs=pl.BlockSpec((1, TP, PW_o, C), lambda b, i: (b, i, 0, 0)),
        ),
        compiler_params=pltpu.CompilerParams(
            dimension_semantics=("parallel", "parallel"),
            vmem_limit_bytes=32 * 1024 * 1024),
    )(*planes)
    return out[:, :PH_o]


# --------------------------------------------------------------------------
# _InputBlock forward (NCHW in, NCHW out -- same as the PyTorch module)
# --------------------------------------------------------------------------
def input_block_forward(x_nchw, params, *, eps=1e-5):
    x = jnp.transpose(x_nchw, (0, 2, 3, 1))                     # NCHW -> NHWC
    scale = params["gamma"] / jnp.sqrt(params["var"] + eps)
    shift = params["beta"] - params["mean"] * scale
    y = conv_bn_relu(x, params["weight"], scale, shift, stride=2, pad=3)
    y = maxpool_ceil(y, k=3, stride=2, pad=1)
    return jnp.transpose(y, (0, 3, 1, 2))                       # NHWC -> NCHW


# --------------------------------------------------------------------------
# Pure-JAX reference (correctness sanity check)
# --------------------------------------------------------------------------
def reference_forward(x_nchw, params, *, eps=1e-5):
    y = jax.lax.conv_general_dilated(
        x_nchw, params["weight"], window_strides=(2, 2),
        padding=((3, 3), (3, 3)),
        dimension_numbers=("NCHW", "OIHW", "NCHW"),
    )
    scale = (params["gamma"] / jnp.sqrt(params["var"] + eps)).reshape(1, -1, 1, 1)
    shift = (params["beta"].reshape(1, -1, 1, 1)
             - params["mean"].reshape(1, -1, 1, 1) * scale)
    y = jnp.maximum(y * scale + shift, 0.0)

    N, C, H, W = y.shape
    k, s, p = 3, 2, 1
    oh = -(-(H + 2 * p - k) // s) + 1
    if (oh - 1) * s >= H + p:
        oh -= 1
    rpad = (oh - 1) * s + k - H - p
    return jax.lax.reduce_window(
        y, -jnp.inf, jax.lax.max,
        window_dimensions=(1, 1, k, k), window_strides=(1, 1, s, s),
        padding=((0, 0), (0, 0), (p, rpad), (p, rpad)),
    )


if __name__ == "__main__":
    N, IC, H, W = 2, 4, 16, 16
    OC = 64                                       # n_dims[0] in DeepLabV2

    key = jax.random.PRNGKey(0)
    k_x, k_w, k_g, k_b, k_m, k_v = jax.random.split(key, 6)

    x = jax.random.normal(k_x, (N, IC, H, W), dtype=jnp.float32)
    params = {
        "weight": 0.1 * jax.random.normal(k_w, (OC, IC, 7, 7), dtype=jnp.float32),
        "gamma": 1.0 + 0.1 * jax.random.normal(k_g, (OC,), dtype=jnp.float32),
        "beta": 0.1 * jax.random.normal(k_b, (OC,), dtype=jnp.float32),
        "mean": 0.1 * jax.random.normal(k_m, (OC,), dtype=jnp.float32),
        "var": 0.5 + jax.random.uniform(k_v, (OC,), dtype=jnp.float32),
    }

    out = jax.jit(input_block_forward)(x, params)
    out = jax.block_until_ready(out)
    assert out.shape == (N, OC, 5, 5), out.shape

    ref = jax.block_until_ready(reference_forward(x, params))
    # bf16 MXU operands -> slightly looser tolerance than pure f32.
    assert jnp.allclose(out, ref, atol=2e-2, rtol=2e-2), float(
        jnp.max(jnp.abs(out - ref))
    )

    print("KERNEL_OK")
</pallas_src>

<mosaic_0001>
module attributes {stable_mosaic.version = 11 : i64} {
  func.func @_conv_bn_relu_kernel(%arg0: i32, %arg1: i32, %arg2: memref<1x132x4xf32, #tpu.memory_space<vmem>>, %arg3: memref<1x132x4xf32, #tpu.memory_space<vmem>>, %arg4: memref<1x132x4xf32, #tpu.memory_space<vmem>>, %arg5: memref<1x132x4xf32, #tpu.memory_space<vmem>>, %arg6: memref<196x64xbf16, #tpu.memory_space<vmem>>, %arg7: memref<1x64xf32, #tpu.memory_space<vmem>>, %arg8: memref<1x88x64xf32, #tpu.memory_space<vmem>>, %arg9: memref<88x196xf32, #tpu.memory_space<vmem>>) attributes {dimension_semantics = [#tpu.dimension_semantics<parallel>, #tpu.dimension_semantics<parallel>], iteration_bounds = array<i64: 2, 1>, scalar_prefetch = 0 : i64, scratch_operands = 1 : i64, tpu.core_type = #tpu.core_type<tc>, window_params = [{transform_indices = @transform_0, window_bounds = array<i64: 1, 132, 4>}, {transform_indices = @transform_1, window_bounds = array<i64: 1, 132, 4>}, {transform_indices = @transform_2, window_bounds = array<i64: 1, 132, 4>}, {transform_indices = @transform_3, window_bounds = array<i64: 1, 132, 4>}, {pipeline_mode = #tpu.pipeline_mode<synchronous>, transform_indices = @transform_4, window_bounds = array<i64: 196, 64>}, {pipeline_mode = #tpu.pipeline_mode<synchronous>, transform_indices = @transform_5, window_bounds = array<i64: 1, 64>}, {transform_indices = @transform_6, window_bounds = array<i64: 1, 88, 64>}]} {
    %c8_i32 = arith.constant 8 : i32
    %0 = arith.muli %arg1, %c8_i32 : i32
    %c0_i32 = arith.constant 0 : i32
    %1 = arith.addi %0, %c0_i32 : i32
    %c11_i32 = arith.constant 11 : i32
    %2 = arith.muli %1, %c11_i32 : i32
    %c0_i32_0 = arith.constant 0 : i32
    %3 = arith.addi %2, %c0_i32_0 : i32
    %c0 = arith.constant 0 : index
    %4 = arith.index_cast %3 : i32 to index
    %c0_1 = arith.constant 0 : index
    %5 = vector.load %arg2[%c0, %4, %c0_1] : memref<1x132x4xf32, #tpu.memory_space<vmem>>, vector<1x88x4xf32>
    %6 = vector.shape_cast %5 : vector<1x88x4xf32> to vector<88x4xf32>
    %c0_2 = arith.constant 0 : index
    %c0_3 = arith.constant 0 : index
    %7 = vector.load %arg9[%c0_2, %c0_3] : memref<88x196xf32, #tpu.memory_space<vmem>>, vector<88x4xf32>
    tpu.vector_store %arg9[%c0_2, %c0_3], %6 {strides = array<i32>} : memref<88x196xf32, #tpu.memory_space<vmem>>, vector<88x4xf32>,
    %c8_i32_4 = arith.constant 8 : i32
    %8 = arith.muli %arg1, %c8_i32_4 : i32
    %c0_i32_5 = arith.constant 0 : i32
    %9 = arith.addi %8, %c0_i32_5 : i32
    %c11_i32_6 = arith.constant 11 : i32
    %10 = arith.muli %9, %c11_i32_6 : i32
    %c0_i32_7 = arith.constant 0 : i32
    %11 = arith.addi %10, %c0_i32_7 : i32
    %c0_8 = arith.constant 0 : index
    %12 = arith.index_cast %11 : i32 to index
    %c0_9 = arith.constant 0 : index
    %13 = vector.load %arg3[%c0_8, %12, %c0_9] : memref<1x132x4xf32, #tpu.memory_space<vmem>>, vector<1x88x4xf32>
    %14 = vector.shape_cast %13 : vector<1x88x4xf32> to vector<88x4xf32>
    %c0_10 = arith.constant 0 : index
    %c4 = arith.constant 4 : index
    %15 = vector.load %arg9[%c0_10, %c4] : memref<88x196xf32, #tpu.memory_space<vmem>>, vector<88x4xf32>
    tpu.vector_store %arg9[%c0_10, %c4], %14 {strides = array<i32>} : memref<88x196xf32, #tpu.memory_space<vmem>>, vector<88x4xf32>,
    %c8_i32_11 = arith.constant 8 : i32
    %16 = arith.muli %arg1, %c8_i32_11 : i32
    %c0_i32_12 = arith.constant 0 : i32
    %17 = arith.addi %16, %c0_i32_12 : i32
    %c11_i32_13 = arith.constant 11 : i32
    %18 = arith.muli %17, %c11_i32_13 : i32
    %c1_i32 = arith.constant 1 : i32
    %19 = arith.addi %18, %c1_i32 : i32
    %c0_14 = arith.constant 0 : index
    %20 = arith.index_cast %19 : i32 to index
    %c0_15 = arith.constant 0 : index
    %21 = vector.load %arg2[%c0_14, %20, %c0_15] : memref<1x132x4xf32, #tpu.memory_space<vmem>>, vector<1x88x4xf32>
    %22 = vector.shape_cast %21 : vector<1x88x4xf32> to vector<88x4xf32>
    %c0_16 = arith.constant 0 : index
    %c8 = arith.constant 8 : index
    %23 = vector.load %arg9[%c0_16, %c8] : memref<88x196xf32, #tpu.memory_space<vmem>>, vector<88x4xf32>
    tpu.vector_store %arg9[%c0_16, %c8], %22 {strides = array<i32>} : memref<88x196xf32, #tpu.memory_space<vmem>>, vector<88x4xf32>,
    %c8_i32_17 = arith.constant 8 : i32
    %24 = arith.muli %arg1, %c8_i32_17 : i32
    %c0_i32_18 = arith.constant 0 : i32
    %25 = arith.addi %24, %c0_i32_18 : i32
    %c11_i32_19 = arith.constant 11 : i32
    %26 = arith.muli %25, %c11_i32_19 : i32
    %c1_i32_20 = arith.constant 1 : i32
    %27 = arith.addi %26, %c1_i32_20 : i32
    %c0_21 = arith.constant 0 : index
    %28 = arith.index_cast %27 : i32 to index
    %c0_22 = arith.constant 0 : index
    %29 = vector.load %arg3[%c0_21, %28, %c0_22] : memref<1x132x4xf32, #tpu.memory_space<vmem>>, vector<1x88x4xf32>
    %30 = vector.shape_cast %29 : vector<1x88x4xf32> to vector<88x4xf32>
    %c0_23 = arith.constant 0 : index
    %c12 = arith.constant 12 : index
    %31 = vector.load %arg9[%c0_23, %c12] : memref<88x196xf32, #tpu.memory_space<vmem>>, vector<88x4xf32>
    tpu.vector_store %arg9[%c0_23, %c12], %30 {strides = array<i32>} : memref<88x196xf32, #tpu.memory_space<vmem>>, vector<88x4xf32>,
    %c8_i32_24 = arith.constant 8 : i32
    %32 = arith.muli %arg1, %c8_i32_24 : i32
    %c0_i32_25 = arith.constant 0 : i32
    %33 = arith.addi %32, %c0_i32_25 : i32
    %c11_i32_26 = arith.constant 11 : i32
    %34 = arith.muli %33, %c11_i32_26 : i32
    %c2_i32 = arith.constant 2 : i32
    %35 = arith.addi %34, %c2_i32 : i32
    %c0_27 = arith.constant 0 : index
    %36 = arith.index_cast %35 : i32 to index
    %c0_28 = arith.constant 0 : index
    %37 = vector.load %arg2[%c0_27, %36, %c0_28] : memref<1x132x4xf32, #tpu.memory_space<vmem>>, vector<1x88x4xf32>
    %38 = vector.shape_cast %37 : vector<1x88x4xf32> to vector<88x4xf32>
    %c0_29 = arith.constant 0 : index
    %c16 = arith.constant 16 : index
    %39 = vector.load %arg9[%c0_29, %c16] : memref<88x196xf32, #tpu.memory_space<vmem>>, vector<88x4xf32>
    tpu.vector_store %arg9[%c0_29, %c16], %38 {strides = array<i32>} : memref<88x196xf32, #tpu.memory_space<vmem>>, vector<88x4xf32>,
    %c8_i32_30 = arith.constant 8 : i32
    %40 = arith.muli %arg1, %c8_i32_30 : i32
    %c0_i32_31 = arith.constant 0 : i32
    %41 = arith.addi %40, %c0_i32_31 : i32
    %c11_i32_32 = arith.constant 11 : i32
    %42 = arith.muli %41, %c11_i32_32 : i32
    %c2_i32_33 = arith.constant 2 : i32
    %43 = arith.addi %42, %c2_i32_33 : i32
    %c0_34 = arith.constant 0 : index
    %44 = arith.index_cast %43 : i32 to index
    %c0_35 = arith.constant 0 : index
    %45 = vector.load %arg3[%c0_34, %44, %c0_35] : memref<1x132x4xf32, #tpu.memory_space<vmem>>, vector<1x88x4xf32>
    %46 = vector.shape_cast %45 : vector<1x88x4xf32> to vector<88x4xf32>
    %c0_36 = arith.constant 0 : index
    %c20 = arith.constant 20 : index
    %47 = vector.load %arg9[%c0_36, %c20] : memref<88x196xf32, #tpu.memory_space<vmem>>, vector<88x4xf32>
    tpu.vector_store %arg9[%c0_36, %c20], %46 {strides = array<i32>} : memref<88x196xf32, #tpu.memory_space<vmem>>, vector<88x4xf32>,
    %c8_i32_37 = arith.constant 8 : i32
    %48 = arith.muli %arg1, %c8_i32_37 : i32
    %c0_i32_38 = arith.constant 0 : i32
    %49 = arith.addi %48, %c0_i32_38 : i32
    %c11_i32_39 = arith.constant 11 : i32
    %50 = arith.muli %49, %c11_i32_39 : i32
    %c3_i32 = arith.constant 3 : i32
    %51 = arith.addi %50, %c3_i32 : i32
    %c0_40 = arith.constant 0 : index
    %52 = arith.index_cast %51 : i32 to index
    %c0_41 = arith.constant 0 : index
    %53 = vector.load %arg2[%c0_40, %52, %c0_41] : memref<1x132x4xf32, #tpu.memory_space<vmem>>, vector<1x88x4xf32>
    %54 = vector.shape_cast %53 : vector<1x88x4xf32> to vector<88x4xf32>
    %c0_42 = arith.constant 0 : index
    %c24 = arith.constant 24 : index
    %55 = vector.load %arg9[%c0_42, %c24] : memref<88x196xf32, #tpu.memory_space<vmem>>, vector<88x4xf32>
    tpu.vector_store %arg9[%c0_42, %c24], %54 {strides = array<i32>} : memref<88x196xf32, #tpu.memory_space<vmem>>, vector<88x4xf32>,
    %c8_i32_43 = arith.constant 8 : i32
    %56 = arith.muli %arg1, %c8_i32_43 : i32
    %c0_i32_44 = arith.constant 0 : i32
    %57 = arith.addi %56, %c0_i32_44 : i32
    %c11_i32_45 = arith.constant 11 : i32
    %58 = arith.muli %57, %c11_i32_45 : i32
    %c0_i32_46 = arith.constant 0 : i32
    %59 = arith.addi %58, %c0_i32_46 : i32
    %c0_47 = arith.constant 0 : index
    %60 = arith.index_cast %59 : i32 to index
    %c0_48 = arith.constant 0 : index
    %61 = vector.load %arg4[%c0_47, %60, %c0_48] : memref<1x132x4xf32, #tpu.memory_space<vmem>>, vector<1x88x4xf32>
    %62 = vector.shape_cast %61 : vector<1x88x4xf32> to vector<88x4xf32>
    %c0_49 = arith.constant 0 : index
    %c28 = arith.constant 28 : index
    %63 = vector.load %arg9[%c0_49, %c28] : memref<88x196xf32, #tpu.memory_space<vmem>>, vector<88x4xf32>
    tpu.vector_store %arg9[%c0_49, %c28], %62 {strides = array<i32>} : memref<88x196xf32, #tpu.memory_space<vmem>>, vector<88x4xf32>,
    %c8_i32_50 = arith.constant 8 : i32
    %64 = arith.muli %arg1, %c8_i32_50 : i32
    %c0_i32_51 = arith.constant 0 : i32
    %65 = arith.addi %64, %c0_i32_51 : i32
    %c11_i32_52 = arith.constant 11 : i32
    %66 = arith.muli %65, %c11_i32_52 : i32
    %c0_i32_53 = arith.constant 0 : i32
    %67 = arith.addi %66, %c0_i32_53 : i32
    %c0_54 = arith.constant 0 : index
    %68 = arith.index_cast %67 : i32 to index
    %c0_55 = arith.constant 0 : index
    %69 = vector.load %arg5[%c0_54, %68, %c0_55] : memref<1x132x4xf32, #tpu.memory_space<vmem>>, vector<1x88x4xf32>
    %70 = vector.shape_cast %69 : vector<1x88x4xf32> to vector<88x4xf32>
    %c0_56 = arith.constant 0 : index
    %c32 = arith.constant 32 : index
    %71 = vector.load %arg9[%c0_56, %c32] : memref<88x196xf32, #tpu.memory_space<vmem>>, vector<88x4xf32>
    tpu.vector_store %arg9[%c0_56, %c32], %70 {strides = array<i32>} : memref<88x196xf32, #tpu.memory_space<vmem>>, vector<88x4xf32>,
    %c8_i32_57 = arith.constant 8 : i32
    %72 = arith.muli %arg1, %c8_i32_57 : i32
    %c0_i32_58 = arith.constant 0 : i32
    %73 = arith.addi %72, %c0_i32_58 : i32
    %c11_i32_59 = arith.constant 11 : i32
    %74 = arith.muli %73, %c11_i32_59 : i32
    %c1_i32_60 = arith.constant 1 : i32
    %75 = arith.addi %74, %c1_i32_60 : i32
    %c0_61 = arith.constant 0 : index
    %76 = arith.index_cast %75 : i32 to index
    %c0_62 = arith.constant 0 : index
    %77 = vector.load %arg4[%c0_61, %76, %c0_62] : memref<1x132x4xf32, #tpu.memory_space<vmem>>, vector<1x88x4xf32>
    %78 = vector.shape_cast %77 : vector<1x88x4xf32> to vector<88x4xf32>
    %c0_63 = arith.constant 0 : index
    %c36 = arith.constant 36 : index
    %79 = vector.load %arg9[%c0_63, %c36] : memref<88x196xf32, #tpu.memory_space<vmem>>, vector<88x4xf32>
    tpu.vector_store %arg9[%c0_63, %c36], %78 {strides = array<i32>} : memref<88x196xf32, #tpu.memory_space<vmem>>, vector<88x4xf32>,
    %c8_i32_64 = arith.constant 8 : i32
    %80 = arith.muli %arg1, %c8_i32_64 : i32
    %c0_i32_65 = arith.constant 0 : i32
    %81 = arith.addi %80, %c0_i32_65 : i32
    %c11_i32_66 = arith.constant 11 : i32
    %82 = arith.muli %81, %c11_i32_66 : i32
    %c1_i32_67 = arith.constant 1 : i32
    %83 = arith.addi %82, %c1_i32_67 : i32
    %c0_68 = arith.constant 0 : index
    %84 = arith.index_cast %83 : i32 to index
    %c0_69 = arith.constant 0 : index
    %85 = vector.load %arg5[%c0_68, %84, %c0_69] : memref<1x132x4xf32, #tpu.memory_space<vmem>>, vector<1x88x4xf32>
    %86 = vector.shape_cast %85 : vector<1x88x4xf32> to vector<88x4xf32>
    %c0_70 = arith.constant 0 : index
    %c40 = arith.constant 40 : index
    %87 = vector.load %arg9[%c0_70, %c40] : memref<88x196xf32, #tpu.memory_space<vmem>>, vector<88x4xf32>
    tpu.vector_store %arg9[%c0_70, %c40], %86 {strides = array<i32>} : memref<88x196xf32, #tpu.memory_space<vmem>>, vector<88x4xf32>,
    %c8_i32_71 = arith.constant 8 : i32
    %88 = arith.muli %arg1, %c8_i32_71 : i32
    %c0_i32_72 = arith.constant 0 : i32
    %89 = arith.addi %88, %c0_i32_72 : i32
    %c11_i32_73 = arith.constant 11 : i32
    %90 = arith.muli %89, %c11_i32_73 : i32
    %c2_i32_74 = arith.constant 2 : i32
    %91 = arith.addi %90, %c2_i32_74 : i32
    %c0_75 = arith.constant 0 : index
    %92 = arith.index_cast %91 : i32 to index
    %c0_76 = arith.constant 0 : index
    %93 = vector.load %arg4[%c0_75, %92, %c0_76] : memref<1x132x4xf32, #tpu.memory_space<vmem>>, vector<1x88x4xf32>
    %94 = vector.shape_cast %93 : vector<1x88x4xf32> to vector<88x4xf32>
    %c0_77 = arith.constant 0 : index
    %c44 = arith.constant 44 : index
    %95 = vector.load %arg9[%c0_77, %c44] : memref<88x196xf32, #tpu.memory_space<vmem>>, vector<88x4xf32>
    tpu.vector_store %arg9[%c0_77, %c44], %94 {strides = array<i32>} : memref<88x196xf32, #tpu.memory_space<vmem>>, vector<88x4xf32>,
    %c8_i32_78 = arith.constant 8 : i32
    %96 = arith.muli %arg1, %c8_i32_78 : i32
    %c0_i32_79 = arith.constant 0 : i32
    %97 = arith.addi %96, %c0_i32_79 : i32
    %c11_i32_80 = arith.constant 11 : i32
    %98 = arith.muli %97, %c11_i32_80 : i32
    %c2_i32_81 = arith.constant 2 : i32
    %99 = arith.addi %98, %c2_i32_81 : i32
    %c0_82 = arith.constant 0 : index
    %100 = arith.index_cast %99 : i32 to index
    %c0_83 = arith.constant 0 : index
    %101 = vector.load %arg5[%c0_82, %100, %c0_83] : memref<1x132x4xf32, #tpu.memory_space<vmem>>, vector<1x88x4xf32>
    %102 = vector.shape_cast %101 : vector<1x88x4xf32> to vector<88x4xf32>
    %c0_84 = arith.constant 0 : index
    %c48 = arith.constant 48 : index
    %103 = vector.load %arg9[%c0_84, %c48] : memref<88x196xf32, #tpu.memory_space<vmem>>, vector<88x4xf32>
    tpu.vector_store %arg9[%c0_84, %c48], %102 {strides = array<i32>} : memref<88x196xf32, #tpu.memory_space<vmem>>, vector<88x4xf32>,
    %c8_i32_85 = arith.constant 8 : i32
    %104 = arith.muli %arg1, %c8_i32_85 : i32
    %c0_i32_86 = arith.constant 0 : i32
    %105 = arith.addi %104, %c0_i32_86 : i32
    %c11_i32_87 = arith.constant 11 : i32
    %106 = arith.muli %105, %c11_i32_87 : i32
    %c3_i32_88 = arith.constant 3 : i32
    %107 = arith.addi %106, %c3_i32_88 : i32
    %c0_89 = arith.constant 0 : index
    %108 = arith.index_cast %107 : i32 to index
    %c0_90 = arith.constant 0 : index
    %109 = vector.load %arg4[%c0_89, %108, %c0_90] : memref<1x132x4xf32, #tpu.memory_space<vmem>>, vector<1x88x4xf32>
    %110 = vector.shape_cast %109 : vector<1x88x4xf32> to vector<88x4xf32>
    %c0_91 = arith.constant 0 : index
    %c52 = arith.constant 52 : index
    %111 = vector.load %arg9[%c0_91, %c52] : memref<88x196xf32, #tpu.memory_space<vmem>>, vector<88x4xf32>
    tpu.vector_store %arg9[%c0_91, %c52], %110 {strides = array<i32>} : memref<88x196xf32, #tpu.memory_space<vmem>>, vector<88x4xf32>,
    %c8_i32_92 = arith.constant 8 : i32
    %112 = arith.muli %arg1, %c8_i32_92 : i32
    %c1_i32_93 = arith.constant 1 : i32
    %113 = arith.addi %112, %c1_i32_93 : i32
    %c11_i32_94 = arith.constant 11 : i32
    %114 = arith.muli %113, %c11_i32_94 : i32
    %c0_i32_95 = arith.constant 0 : i32
    %115 = arith.addi %114, %c0_i32_95 : i32
    %c0_96 = arith.constant 0 : index
    %116 = arith.index_cast %115 : i32 to index
    %c0_97 = arith.constant 0 : index
    %117 = vector.load %arg2[%c0_96, %116, %c0_97] : memref<1x132x4xf32, #tpu.memory_space<vmem>>, vector<1x88x4xf32>
    %118 = vector.shape_cast %117 : vector<1x88x4xf32> to vector<88x4xf32>
    %c0_98 = arith.constant 0 : index
    %c56 = arith.constant 56 : index
    %119 = vector.load %arg9[%c0_98, %c56] : memref<88x196xf32, #tpu.memory_space<vmem>>, vector<88x4xf32>
    tpu.vector_store %arg9[%c0_98, %c56], %118 {strides = array<i32>} : memref<88x196xf32, #tpu.memory_space<vmem>>, vector<88x4xf32>,
    %c8_i32_99 = arith.constant 8 : i32
    %120 = arith.muli %arg1, %c8_i32_99 : i32
    %c1_i32_100 = arith.constant 1 : i32
    %121 = arith.addi %120, %c1_i32_100 : i32
    %c11_i32_101 = arith.constant 11 : i32
    %122 = arith.muli %121, %c11_i32_101 : i32
    %c0_i32_102 = arith.constant 0 : i32
    %123 = arith.addi %122, %c0_i32_102 : i32
    %c0_103 = arith.constant 0 : index
    %124 = arith.index_cast %123 : i32 to index
    %c0_104 = arith.constant 0 : index
    %125 = vector.load %arg3[%c0_103, %124, %c0_104] : memref<1x132x4xf32, #tpu.memory_space<vmem>>, vector<1x88x4xf32>
    %126 = vector.shape_cast %125 : vector<1x88x4xf32> to vector<88x4xf32>
    %c0_105 = arith.constant 0 : index
    %c60 = arith.constant 60 : index
    %127 = vector.load %arg9[%c0_105, %c60] : memref<88x196xf32, #tpu.memory_space<vmem>>, vector<88x4xf32>
    tpu.vector_store %arg9[%c0_105, %c60], %126 {strides = array<i32>} : memref<88x196xf32, #tpu.memory_space<vmem>>, vector<88x4xf32>,
    %c8_i32_106 = arith.constant 8 : i32
    %128 = arith.muli %arg1, %c8_i32_106 : i32
    %c1_i32_107 = arith.constant 1 : i32
    %129 = arith.addi %128, %c1_i32_107 : i32
    %c11_i32_108 = arith.constant 11 : i32
    %130 = arith.muli %129, %c11_i32_108 : i32
    %c1_i32_109 = arith.constant 1 : i32
    %131 = arith.addi %130, %c1_i32_109 : i32
    %c0_110 = arith.constant 0 : index
    %132 = arith.index_cast %131 : i32 to index
    %c0_111 = arith.constant 0 : index
    %133 = vector.load %arg2[%c0_110, %132, %c0_111] : memref<1x132x4xf32, #tpu.memory_space<vmem>>, vector<1x88x4xf32>
    %134 = vector.shape_cast %133 : vector<1x88x4xf32> to vector<88x4xf32>
    %c0_112 = arith.constant 0 : index
    %c64 = arith.constant 64 : index
    %135 = vector.load %arg9[%c0_112, %c64] : memref<88x196xf32, #tpu.memory_space<vmem>>, vector<88x4xf32>
    tpu.vector_store %arg9[%c0_112, %c64], %134 {strides = array<i32>} : memref<88x196xf32, #tpu.memory_space<vmem>>, vector<88x4xf32>,
    %c8_i32_113 = arith.constant 8 : i32
    %136 = arith.muli %arg1, %c8_i32_113 : i32
    %c1_i32_114 = arith.constant 1 : i32
    %137 = arith.addi %136, %c1_i32_114 : i32
    %c11_i32_115 = arith.constant 11 : i32
    %138 = arith.muli %137, %c11_i32_115 : i32
    %c1_i32_116 = arith.constant 1 : i32
    %139 = arith.addi %138, %c1_i32_116 : i32
    %c0_117 = arith.constant 0 : index
    %140 = arith.index_cast %139 : i32 to index
    %c0_118 = arith.constant 0 : index
    %141 = vector.load %arg3[%c0_117, %140, %c0_118] : memref<1x132x4xf32, #tpu.memory_space<vmem>>, vector<1x88x4xf32>
    %142 = vector.shape_cast %141 : vector<1x88x4xf32> to vector<88x4xf32>
    %c0_119 = arith.constant 0 : index
    %c68 = arith.constant 68 : index
    %143 = vector.load %arg9[%c0_119, %c68] : memref<88x196xf32, #tpu.memory_space<vmem>>, vector<88x4xf32>
    tpu.vector_store %arg9[%c0_119, %c68], %142 {strides = array<i32>} : memref<88x196xf32, #tpu.memory_space<vmem>>, vector<88x4xf32>,
    %c8_i32_120 = arith.constant 8 : i32
    %144 = arith.muli %arg1, %c8_i32_120 : i32
    %c1_i32_121 = arith.constant 1 : i32
    %145 = arith.addi %144, %c1_i32_121 : i32
    %c11_i32_122 = arith.constant 11 : i32
    %146 = arith.muli %145, %c11_i32_122 : i32
    %c2_i32_123 = arith.constant 2 : i32
    %147 = arith.addi %146, %c2_i32_123 : i32
    %c0_124 = arith.constant 0 : index
    %148 = arith.index_cast %147 : i32 to index
    %c0_125 = arith.constant 0 : index
    %149 = vector.load %arg2[%c0_124, %148, %c0_125] : memref<1x132x4xf32, #tpu.memory_space<vmem>>, vector<1x88x4xf32>
    %150 = vector.shape_cast %149 : vector<1x88x4xf32> to vector<88x4xf32>
    %c0_126 = arith.constant 0 : index
    %c72 = arith.constant 72 : index
    %151 = vector.load %arg9[%c0_126, %c72] : memref<88x196xf32, #tpu.memory_space<vmem>>, vector<88x4xf32>
    tpu.vector_store %arg9[%c0_126, %c72], %150 {strides = array<i32>} : memref<88x196xf32, #tpu.memory_space<vmem>>, vector<88x4xf32>,
    %c8_i32_127 = arith.constant 8 : i32
    %152 = arith.muli %arg1, %c8_i32_127 : i32
    %c1_i32_128 = arith.constant 1 : i32
    %153 = arith.addi %152, %c1_i32_128 : i32
    %c11_i32_129 = arith.constant 11 : i32
    %154 = arith.muli %153, %c11_i32_129 : i32
    %c2_i32_130 = arith.constant 2 : i32
    %155 = arith.addi %154, %c2_i32_130 : i32
    %c0_131 = arith.constant 0 : index
    %156 = arith.index_cast %155 : i32 to index
    %c0_132 = arith.constant 0 : index
    %157 = vector.load %arg3[%c0_131, %156, %c0_132] : memref<1x132x4xf32, #tpu.memory_space<vmem>>, vector<1x88x4xf32>
    %158 = vector.shape_cast %157 : vector<1x88x4xf32> to vector<88x4xf32>
    %c0_133 = arith.constant 0 : index
    %c76 = arith.constant 76 : index
    %159 = vector.load %arg9[%c0_133, %c76] : memref<88x196xf32, #tpu.memory_space<vmem>>, vector<88x4xf32>
    tpu.vector_store %arg9[%c0_133, %c76], %158 {strides = array<i32>} : memref<88x196xf32, #tpu.memory_space<vmem>>, vector<88x4xf32>,
    %c8_i32_134 = arith.constant 8 : i32
    %160 = arith.muli %arg1, %c8_i32_134 : i32
    %c1_i32_135 = arith.constant 1 : i32
    %161 = arith.addi %160, %c1_i32_135 : i32
    %c11_i32_136 = arith.constant 11 : i32
    %162 = arith.muli %161, %c11_i32_136 : i32
    %c3_i32_137 = arith.constant 3 : i32
    %163 = arith.addi %162, %c3_i32_137 : i32
    %c0_138 = arith.constant 0 : index
    %164 = arith.index_cast %163 : i32 to index
    %c0_139 = arith.constant 0 : index
    %165 = vector.load %arg2[%c0_138, %164, %c0_139] : memref<1x132x4xf32, #tpu.memory_space<vmem>>, vector<1x88x4xf32>
    %166 = vector.shape_cast %165 : vector<1x88x4xf32> to vector<88x4xf32>
    %c0_140 = arith.constant 0 : index
    %c80 = arith.constant 80 : index
    %167 = vector.load %arg9[%c0_140, %c80] : memref<88x196xf32, #tpu.memory_space<vmem>>, vector<88x4xf32>
    tpu.vector_store %arg9[%c0_140, %c80], %166 {strides = array<i32>} : memref<88x196xf32, #tpu.memory_space<vmem>>, vector<88x4xf32>,
    %c8_i32_141 = arith.constant 8 : i32
    %168 = arith.muli %arg1, %c8_i32_141 : i32
    %c1_i32_142 = arith.constant 1 : i32
    %169 = arith.addi %168, %c1_i32_142 : i32
    %c11_i32_143 = arith.constant 11 : i32
    %170 = arith.muli %169, %c11_i32_143 : i32
    %c0_i32_144 = arith.constant 0 : i32
    %171 = arith.addi %170, %c0_i32_144 : i32
    %c0_145 = arith.constant 0 : index
    %172 = arith.index_cast %171 : i32 to index
    %c0_146 = arith.constant 0 : index
    %173 = vector.load %arg4[%c0_145, %172, %c0_146] : memref<1x132x4xf32, #tpu.memory_space<vmem>>, vector<1x88x4xf32>
    %174 = vector.shape_cast %173 : vector<1x88x4xf32> to vector<88x4xf32>
    %c0_147 = arith.constant 0 : index
    %c84 = arith.constant 84 : index
    %175 = vector.load %arg9[%c0_147, %c84] : memref<88x196xf32, #tpu.memory_space<vmem>>, vector<88x4xf32>
    tpu.vector_store %arg9[%c0_147, %c84], %174 {strides = array<i32>} : memref<88x196xf32, #tpu.memory_space<vmem>>, vector<88x4xf32>,
    %c8_i32_148 = arith.constant 8 : i32
    %176 = arith.muli %arg1, %c8_i32_148 : i32
    %c1_i32_149 = arith.constant 1 : i32
    %177 = arith.addi %176, %c1_i32_149 : i32
    %c11_i32_150 = arith.constant 11 : i32
    %178 = arith.muli %177, %c11_i32_150 : i32
    %c0_i32_151 = arith.constant 0 : i32
    %179 = arith.addi %178, %c0_i32_151 : i32
    %c0_152 = arith.constant 0 : index
    %180 = arith.index_cast %179 : i32 to index
    %c0_153 = arith.constant 0 : index
    %181 = vector.load %arg5[%c0_152, %180, %c0_153] : memref<1x132x4xf32, #tpu.memory_space<vmem>>, vector<1x88x4xf32>
    %182 = vector.shape_cast %181 : vector<1x88x4xf32> to vector<88x4xf32>
    %c0_154 = arith.constant 0 : index
    %c88 = arith.constant 88 : index
    %183 = vector.load %arg9[%c0_154, %c88] : memref<88x196xf32, #tpu.memory_space<vmem>>, vector<88x4xf32>
    tpu.vector_store %arg9[%c0_154, %c88], %182 {strides = array<i32>} : memref<88x196xf32, #tpu.memory_space<vmem>>, vector<88x4xf32>,
    %c8_i32_155 = arith.constant 8 : i32
    %184 = arith.muli %arg1, %c8_i32_155 : i32
    %c1_i32_156 = arith.constant 1 : i32
    %185 = arith.addi %184, %c1_i32_156 : i32
    %c11_i32_157 = arith.constant 11 : i32
    %186 = arith.muli %185, %c11_i32_157 : i32
    %c1_i32_158 = arith.constant 1 : i32
    %187 = arith.addi %186, %c1_i32_158 : i32
    %c0_159 = arith.constant 0 : index
    %188 = arith.index_cast %187 : i32 to index
    %c0_160 = arith.constant 0 : index
    %189 = vector.load %arg4[%c0_159, %188, %c0_160] : memref<1x132x4xf32, #tpu.memory_space<vmem>>, vector<1x88x4xf32>
    %190 = vector.shape_cast %189 : vector<1x88x4xf32> to vector<88x4xf32>
    %c0_161 = arith.constant 0 : index
    %c92 = arith.constant 92 : index
    %191 = vector.load %arg9[%c0_161, %c92] : memref<88x196xf32, #tpu.memory_space<vmem>>, vector<88x4xf32>
    tpu.vector_store %arg9[%c0_161, %c92], %190 {strides = array<i32>} : memref<88x196xf32, #tpu.memory_space<vmem>>, vector<88x4xf32>,
    %c8_i32_162 = arith.constant 8 : i32
    %192 = arith.muli %arg1, %c8_i32_162 : i32
    %c1_i32_163 = arith.constant 1 : i32
    %193 = arith.addi %192, %c1_i32_163 : i32
    %c11_i32_164 = arith.constant 11 : i32
    %194 = arith.muli %193, %c11_i32_164 : i32
    %c1_i32_165 = arith.constant 1 : i32
    %195 = arith.addi %194, %c1_i32_165 : i32
    %c0_166 = arith.constant 0 : index
    %196 = arith.index_cast %195 : i32 to index
    %c0_167 = arith.constant 0 : index
    %197 = vector.load %arg5[%c0_166, %196, %c0_167] : memref<1x132x4xf32, #tpu.memory_space<vmem>>, vector<1x88x4xf32>
    %198 = vector.shape_cast %197 : vector<1x88x4xf32> to vector<88x4xf32>
    %c0_168 = arith.constant 0 : index
    %c96 = arith.constant 96 : index
    %199 = vector.load %arg9[%c0_168, %c96] : memref<88x196xf32, #tpu.memory_space<vmem>>, vector<88x4xf32>
    tpu.vector_store %arg9[%c0_168, %c96], %198 {strides = array<i32>} : memref<88x196xf32, #tpu.memory_space<vmem>>, vector<88x4xf32>,
    %c8_i32_169 = arith.constant 8 : i32
    %200 = arith.muli %arg1, %c8_i32_169 : i32
    %c1_i32_170 = arith.constant 1 : i32
    %201 = arith.addi %200, %c1_i32_170 : i32
    %c11_i32_171 = arith.constant 11 : i32
    %202 = arith.muli %201, %c11_i32_171 : i32
    %c2_i32_172 = arith.constant 2 : i32
    %203 = arith.addi %202, %c2_i32_172 : i32
    %c0_173 = arith.constant 0 : index
    %204 = arith.index_cast %203 : i32 to index
    %c0_174 = arith.constant 0 : index
    %205 = vector.load %arg4[%c0_173, %204, %c0_174] : memref<1x132x4xf32, #tpu.memory_space<vmem>>, vector<1x88x4xf32>
    %206 = vector.shape_cast %205 : vector<1x88x4xf32> to vector<88x4xf32>
    %c0_175 = arith.constant 0 : index
    %c100 = arith.constant 100 : index
    %207 = vector.load %arg9[%c0_175, %c100] : memref<88x196xf32, #tpu.memory_space<vmem>>, vector<88x4xf32>
    tpu.vector_store %arg9[%c0_175, %c100], %206 {strides = array<i32>} : memref<88x196xf32, #tpu.memory_space<vmem>>, vector<88x4xf32>,
    %c8_i32_176 = arith.constant 8 : i32
    %208 = arith.muli %arg1, %c8_i32_176 : i32
    %c1_i32_177 = arith.constant 1 : i32
    %209 = arith.addi %208, %c1_i32_177 : i32
    %c11_i32_178 = arith.constant 11 : i32
    %210 = arith.muli %209, %c11_i32_178 : i32
    %c2_i32_179 = arith.constant 2 : i32
    %211 = arith.addi %210, %c2_i32_179 : i32
    %c0_180 = arith.constant 0 : index
    %212 = arith.index_cast %211 : i32 to index
    %c0_181 = arith.constant 0 : index
    %213 = vector.load %arg5[%c0_180, %212, %c0_181] : memref<1x132x4xf32, #tpu.memory_space<vmem>>, vector<1x88x4xf32>
    %214 = vector.shape_cast %213 : vector<1x88x4xf32> to vector<88x4xf32>
    %c0_182 = arith.constant 0 : index
    %c104 = arith.constant 104 : index
    %215 = vector.load %arg9[%c0_182, %c104] : memref<88x196xf32, #tpu.memory_space<vmem>>, vector<88x4xf32>
    tpu.vector_store %arg9[%c0_182, %c104], %214 {strides = array<i32>} : memref<88x196xf32, #tpu.memory_space<vmem>>, vector<88x4xf32>,
    %c8_i32_183 = arith.constant 8 : i32
    %216 = arith.muli %arg1, %c8_i32_183 : i32
    %c1_i32_184 = arith.constant 1 : i32
    %217 = arith.addi %216, %c1_i32_184 : i32
    %c11_i32_185 = arith.constant 11 : i32
    %218 = arith.muli %217, %c11_i32_185 : i32
    %c3_i32_186 = arith.constant 3 : i32
    %219 = arith.addi %218, %c3_i32_186 : i32
    %c0_187 = arith.constant 0 : index
    %220 = arith.index_cast %219 : i32 to index
    %c0_188 = arith.constant 0 : index
    %221 = vector.load %arg4[%c0_187, %220, %c0_188] : memref<1x132x4xf32, #tpu.memory_space<vmem>>, vector<1x88x4xf32>
    %222 = vector.shape_cast %221 : vector<1x88x4xf32> to vector<88x4xf32>
    %c0_189 = arith.constant 0 : index
    %c108 = arith.constant 108 : index
    %223 = vector.load %arg9[%c0_189, %c108] : memref<88x196xf32, #tpu.memory_space<vmem>>, vector<88x4xf32>
    tpu.vector_store %arg9[%c0_189, %c108], %222 {strides = array<i32>} : memref<88x196xf32, #tpu.memory_space<vmem>>, vector<88x4xf32>,
    %c8_i32_190 = arith.constant 8 : i32
    %224 = arith.muli %arg1, %c8_i32_190 : i32
    %c2_i32_191 = arith.constant 2 : i32
    %225 = arith.addi %224, %c2_i32_191 : i32
    %c11_i32_192 = arith.constant 11 : i32
    %226 = arith.muli %225, %c11_i32_192 : i32
    %c0_i32_193 = arith.constant 0 : i32
    %227 = arith.addi %226, %c0_i32_193 : i32
    %c0_194 = arith.constant 0 : index
    %228 = arith.index_cast %227 : i32 to index
    %c0_195 = arith.constant 0 : index
    %229 = vector.load %arg2[%c0_194, %228, %c0_195] : memref<1x132x4xf32, #tpu.memory_space<vmem>>, vector<1x88x4xf32>
    %230 = vector.shape_cast %229 : vector<1x88x4xf32> to vector<88x4xf32>
    %c0_196 = arith.constant 0 : index
    %c112 = arith.constant 112 : index
    %231 = vector.load %arg9[%c0_196, %c112] : memref<88x196xf32, #tpu.memory_space<vmem>>, vector<88x4xf32>
    tpu.vector_store %arg9[%c0_196, %c112], %230 {strides = array<i32>} : memref<88x196xf32, #tpu.memory_space<vmem>>, vector<88x4xf32>,
    %c8_i32_197 = arith.constant 8 : i32
    %232 = arith.muli %arg1, %c8_i32_197 : i32
    %c2_i32_198 = arith.constant 2 : i32
    %233 = arith.addi %232, %c2_i32_198 : i32
    %c11_i32_199 = arith.constant 11 : i32
    %234 = arith.muli %233, %c11_i32_199 : i32
    %c0_i32_200 = arith.constant 0 : i32
    %235 = arith.addi %234, %c0_i32_200 : i32
    %c0_201 = arith.constant 0 : index
    %236 = arith.index_cast %235 : i32 to index
    %c0_202 = arith.constant 0 : index
    %237 = vector.load %arg3[%c0_201, %236, %c0_202] : memref<1x132x4xf32, #tpu.memory_space<vmem>>, vector<1x88x4xf32>
    %238 = vector.shape_cast %237 : vector<1x88x4xf32> to vector<88x4xf32>
    %c0_203 = arith.constant 0 : index
    %c116 = arith.constant 116 : index
    %239 = vector.load %arg9[%c0_203, %c116] : memref<88x196xf32, #tpu.memory_space<vmem>>, vector<88x4xf32>
    tpu.vector_store %arg9[%c0_203, %c116], %238 {strides = array<i32>} : memref<88x196xf32, #tpu.memory_space<vmem>>, vector<88x4xf32>,
    %c8_i32_204 = arith.constant 8 : i32
    %240 = arith.muli %arg1, %c8_i32_204 : i32
    %c2_i32_205 = arith.constant 2 : i32
    %241 = arith.addi %240, %c2_i32_205 : i32
    %c11_i32_206 = arith.constant 11 : i32
    %242 = arith.muli %241, %c11_i32_206 : i32
    %c1_i32_207 = arith.constant 1 : i32
    %243 = arith.addi %242, %c1_i32_207 : i32
    %c0_208 = arith.constant 0 : index
    %244 = arith.index_cast %243 : i32 to index
    %c0_209 = arith.constant 0 : index
    %245 = vector.load %arg2[%c0_208, %244, %c0_209] : memref<1x132x4xf32, #tpu.memory_space<vmem>>, vector<1x88x4xf32>
    %246 = vector.shape_cast %245 : vector<1x88x4xf32> to vector<88x4xf32>
    %c0_210 = arith.constant 0 : index
    %c120 = arith.constant 120 : index
    %247 = vector.load %arg9[%c0_210, %c120] : memref<88x196xf32, #tpu.memory_space<vmem>>, vector<88x4xf32>
    tpu.vector_store %arg9[%c0_210, %c120], %246 {strides = array<i32>} : memref<88x196xf32, #tpu.memory_space<vmem>>, vector<88x4xf32>,
    %c8_i32_211 = arith.constant 8 : i32
    %248 = arith.muli %arg1, %c8_i32_211 : i32
    %c2_i32_212 = arith.constant 2 : i32
    %249 = arith.addi %248, %c2_i32_212 : i32
    %c11_i32_213 = arith.constant 11 : i32
    %250 = arith.muli %249, %c11_i32_213 : i32
    %c1_i32_214 = arith.constant 1 : i32
    %251 = arith.addi %250, %c1_i32_214 : i32
    %c0_215 = arith.constant 0 : index
    %252 = arith.index_cast %251 : i32 to index
    %c0_216 = arith.constant 0 : index
    %253 = vector.load %arg3[%c0_215, %252, %c0_216] : memref<1x132x4xf32, #tpu.memory_space<vmem>>, vector<1x88x4xf32>
    %254 = vector.shape_cast %253 : vector<1x88x4xf32> to vector<88x4xf32>
    %c0_217 = arith.constant 0 : index
    %c124 = arith.constant 124 : index
    %255 = vector.load %arg9[%c0_217, %c124] : memref<88x196xf32, #tpu.memory_space<vmem>>, vector<88x4xf32>
    tpu.vector_store %arg9[%c0_217, %c124], %254 {strides = array<i32>} : memref<88x196xf32, #tpu.memory_space<vmem>>, vector<88x4xf32>,
    %c8_i32_218 = arith.constant 8 : i32
    %256 = arith.muli %arg1, %c8_i32_218 : i32
    %c2_i32_219 = arith.constant 2 : i32
    %257 = arith.addi %256, %c2_i32_219 : i32
    %c11_i32_220 = arith.constant 11 : i32
    %258 = arith.muli %257, %c11_i32_220 : i32
    %c2_i32_221 = arith.constant 2 : i32
    %259 = arith.addi %258, %c2_i32_221 : i32
    %c0_222 = arith.constant 0 : index
    %260 = arith.index_cast %259 : i32 to index
    %c0_223 = arith.constant 0 : index
    %261 = vector.load %arg2[%c0_222, %260, %c0_223] : memref<1x132x4xf32, #tpu.memory_space<vmem>>, vector<1x88x4xf32>
    %262 = vector.shape_cast %261 : vector<1x88x4xf32> to vector<88x4xf32>
    %c0_224 = arith.constant 0 : index
    %c128 = arith.constant 128 : index
    %263 = vector.load %arg9[%c0_224, %c128] : memref<88x196xf32, #tpu.memory_space<vmem>>, vector<88x4xf32>
    tpu.vector_store %arg9[%c0_224, %c128], %262 {strides = array<i32>} : memref<88x196xf32, #tpu.memory_space<vmem>>, vector<88x4xf32>,
    %c8_i32_225 = arith.constant 8 : i32
    %264 = arith.muli %arg1, %c8_i32_225 : i32
    %c2_i32_226 = arith.constant 2 : i32
    %265 = arith.addi %264, %c2_i32_226 : i32
    %c11_i32_227 = arith.constant 11 : i32
    %266 = arith.muli %265, %c11_i32_227 : i32
    %c2_i32_228 = arith.constant 2 : i32
    %267 = arith.addi %266, %c2_i32_228 : i32
    %c0_229 = arith.constant 0 : index
    %268 = arith.index_cast %267 : i32 to index
    %c0_230 = arith.constant 0 : index
    %269 = vector.load %arg3[%c0_229, %268, %c0_230] : memref<1x132x4xf32, #tpu.memory_space<vmem>>, vector<1x88x4xf32>
    %270 = vector.shape_cast %269 : vector<1x88x4xf32> to vector<88x4xf32>
    %c0_231 = arith.constant 0 : index
    %c132 = arith.constant 132 : index
    %271 = vector.load %arg9[%c0_231, %c132] : memref<88x196xf32, #tpu.memory_space<vmem>>, vector<88x4xf32>
    tpu.vector_store %arg9[%c0_231, %c132], %270 {strides = array<i32>} : memref<88x196xf32, #tpu.memory_space<vmem>>, vector<88x4xf32>,
    %c8_i32_232 = arith.constant 8 : i32
    %272 = arith.muli %arg1, %c8_i32_232 : i32
    %c2_i32_233 = arith.constant 2 : i32
    %273 = arith.addi %272, %c2_i32_233 : i32
    %c11_i32_234 = arith.constant 11 : i32
    %274 = arith.muli %273, %c11_i32_234 : i32
    %c3_i32_235 = arith.constant 3 : i32
    %275 = arith.addi %274, %c3_i32_235 : i32
    %c0_236 = arith.constant 0 : index
    %276 = arith.index_cast %275 : i32 to index
    %c0_237 = arith.constant 0 : index
    %277 = vector.load %arg2[%c0_236, %276, %c0_237] : memref<1x132x4xf32, #tpu.memory_space<vmem>>, vector<1x88x4xf32>
    %278 = vector.shape_cast %277 : vector<1x88x4xf32> to vector<88x4xf32>
    %c0_238 = arith.constant 0 : index
    %c136 = arith.constant 136 : index
    %279 = vector.load %arg9[%c0_238, %c136] : memref<88x196xf32, #tpu.memory_space<vmem>>, vector<88x4xf32>
    tpu.vector_store %arg9[%c0_238, %c136], %278 {strides = array<i32>} : memref<88x196xf32, #tpu.memory_space<vmem>>, vector<88x4xf32>,
    %c8_i32_239 = arith.constant 8 : i32
    %280 = arith.muli %arg1, %c8_i32_239 : i32
    %c2_i32_240 = arith.constant 2 : i32
    %281 = arith.addi %280, %c2_i32_240 : i32
    %c11_i32_241 = arith.constant 11 : i32
    %282 = arith.muli %281, %c11_i32_241 : i32
    %c0_i32_242 = arith.constant 0 : i32
    %283 = arith.addi %282, %c0_i32_242 : i32
    %c0_243 = arith.constant 0 : index
    %284 = arith.index_cast %283 : i32 to index
    %c0_244 = arith.constant 0 : index
    %285 = vector.load %arg4[%c0_243, %284, %c0_244] : memref<1x132x4xf32, #tpu.memory_space<vmem>>, vector<1x88x4xf32>
    %286 = vector.shape_cast %285 : vector<1x88x4xf32> to vector<88x4xf32>
    %c0_245 = arith.constant 0 : index
    %c140 = arith.constant 140 : index
    %287 = vector.load %arg9[%c0_245, %c140] : memref<88x196xf32, #tpu.memory_space<vmem>>, vector<88x4xf32>
    tpu.vector_store %arg9[%c0_245, %c140], %286 {strides = array<i32>} : memref<88x196xf32, #tpu.memory_space<vmem>>, vector<88x4xf32>,
    %c8_i32_246 = arith.constant 8 : i32
    %288 = arith.muli %arg1, %c8_i32_246 : i32
    %c2_i32_247 = arith.constant 2 : i32
    %289 = arith.addi %288, %c2_i32_247 : i32
    %c11_i32_248 = arith.constant 11 : i32
    %290 = arith.muli %289, %c11_i32_248 : i32
    %c0_i32_249 = arith.constant 0 : i32
    %291 = arith.addi %290, %c0_i32_249 : i32
    %c0_250 = arith.constant 0 : index
    %292 = arith.index_cast %291 : i32 to index
    %c0_251 = arith.constant 0 : index
    %293 = vector.load %arg5[%c0_250, %292, %c0_251] : memref<1x132x4xf32, #tpu.memory_space<vmem>>, vector<1x88x4xf32>
    %294 = vector.shape_cast %293 : vector<1x88x4xf32> to vector<88x4xf32>
    %c0_252 = arith.constant 0 : index
    %c144 = arith.constant 144 : index
    %295 = vector.load %arg9[%c0_252, %c144] : memref<88x196xf32, #tpu.memory_space<vmem>>, vector<88x4xf32>
    tpu.vector_store %arg9[%c0_252, %c144], %294 {strides = array<i32>} : memref<88x196xf32, #tpu.memory_space<vmem>>, vector<88x4xf32>,
    %c8_i32_253 = arith.constant 8 : i32
    %296 = arith.muli %arg1, %c8_i32_253 : i32
    %c2_i32_254 = arith.constant 2 : i32
    %297 = arith.addi %296, %c2_i32_254 : i32
    %c11_i32_255 = arith.constant 11 : i32
    %298 = arith.muli %297, %c11_i32_255 : i32
    %c1_i32_256 = arith.constant 1 : i32
    %299 = arith.addi %298, %c1_i32_256 : i32
    %c0_257 = arith.constant 0 : index
    %300 = arith.index_cast %299 : i32 to index
    %c0_258 = arith.constant 0 : index
    %301 = vector.load %arg4[%c0_257, %300, %c0_258] : memref<1x132x4xf32, #tpu.memory_space<vmem>>, vector<1x88x4xf32>
    %302 = vector.shape_cast %301 : vector<1x88x4xf32> to vector<88x4xf32>
    %c0_259 = arith.constant 0 : index
    %c148 = arith.constant 148 : index
    %303 = vector.load %arg9[%c0_259, %c148] : memref<88x196xf32, #tpu.memory_space<vmem>>, vector<88x4xf32>
    tpu.vector_store %arg9[%c0_259, %c148], %302 {strides = array<i32>} : memref<88x196xf32, #tpu.memory_space<vmem>>, vector<88x4xf32>,
    %c8_i32_260 = arith.constant 8 : i32
    %304 = arith.muli %arg1, %c8_i32_260 : i32
    %c2_i32_261 = arith.constant 2 : i32
    %305 = arith.addi %304, %c2_i32_261 : i32
    %c11_i32_262 = arith.constant 11 : i32
    %306 = arith.muli %305, %c11_i32_262 : i32
    %c1_i32_263 = arith.constant 1 : i32
    %307 = arith.addi %306, %c1_i32_263 : i32
    %c0_264 = arith.constant 0 : index
    %308 = arith.index_cast %307 : i32 to index
    %c0_265 = arith.constant 0 : index
    %309 = vector.load %arg5[%c0_264, %308, %c0_265] : memref<1x132x4xf32, #tpu.memory_space<vmem>>, vector<1x88x4xf32>
    %310 = vector.shape_cast %309 : vector<1x88x4xf32> to vector<88x4xf32>
    %c0_266 = arith.constant 0 : index
    %c152 = arith.constant 152 : index
    %311 = vector.load %arg9[%c0_266, %c152] : memref<88x196xf32, #tpu.memory_space<vmem>>, vector<88x4xf32>
    tpu.vector_store %arg9[%c0_266, %c152], %310 {strides = array<i32>} : memref<88x196xf32, #tpu.memory_space<vmem>>, vector<88x4xf32>,
    %c8_i32_267 = arith.constant 8 : i32
    %312 = arith.muli %arg1, %c8_i32_267 : i32
    %c2_i32_268 = arith.constant 2 : i32
    %313 = arith.addi %312, %c2_i32_268 : i32
    %c11_i32_269 = arith.constant 11 : i32
    %314 = arith.muli %313, %c11_i32_269 : i32
    %c2_i32_270 = arith.constant 2 : i32
    %315 = arith.addi %314, %c2_i32_270 : i32
    %c0_271 = arith.constant 0 : index
    %316 = arith.index_cast %315 : i32 to index
    %c0_272 = arith.constant 0 : index
    %317 = vector.load %arg4[%c0_271, %316, %c0_272] : memref<1x132x4xf32, #tpu.memory_space<vmem>>, vector<1x88x4xf32>
    %318 = vector.shape_cast %317 : vector<1x88x4xf32> to vector<88x4xf32>
    %c0_273 = arith.constant 0 : index
    %c156 = arith.constant 156 : index
    %319 = vector.load %arg9[%c0_273, %c156] : memref<88x196xf32, #tpu.memory_space<vmem>>, vector<88x4xf32>
    tpu.vector_store %arg9[%c0_273, %c156], %318 {strides = array<i32>} : memref<88x196xf32, #tpu.memory_space<vmem>>, vector<88x4xf32>,
    %c8_i32_274 = arith.constant 8 : i32
    %320 = arith.muli %arg1, %c8_i32_274 : i32
    %c2_i32_275 = arith.constant 2 : i32
    %321 = arith.addi %320, %c2_i32_275 : i32
    %c11_i32_276 = arith.constant 11 : i32
    %322 = arith.muli %321, %c11_i32_276 : i32
    %c2_i32_277 = arith.constant 2 : i32
    %323 = arith.addi %322, %c2_i32_277 : i32
    %c0_278 = arith.constant 0 : index
    %324 = arith.index_cast %323 : i32 to index
    %c0_279 = arith.constant 0 : index
    %325 = vector.load %arg5[%c0_278, %324, %c0_279] : memref<1x132x4xf32, #tpu.memory_space<vmem>>, vector<1x88x4xf32>
    %326 = vector.shape_cast %325 : vector<1x88x4xf32> to vector<88x4xf32>
    %c0_280 = arith.constant 0 : index
    %c160 = arith.constant 160 : index
    %327 = vector.load %arg9[%c0_280, %c160] : memref<88x196xf32, #tpu.memory_space<vmem>>, vector<88x4xf32>
    tpu.vector_store %arg9[%c0_280, %c160], %326 {strides = array<i32>} : memref<88x196xf32, #tpu.memory_space<vmem>>, vector<88x4xf32>,
    %c8_i32_281 = arith.constant 8 : i32
    %328 = arith.muli %arg1, %c8_i32_281 : i32
    %c2_i32_282 = arith.constant 2 : i32
    %329 = arith.addi %328, %c2_i32_282 : i32
    %c11_i32_283 = arith.constant 11 : i32
    %330 = arith.muli %329, %c11_i32_283 : i32
    %c3_i32_284 = arith.constant 3 : i32
    %331 = arith.addi %330, %c3_i32_284 : i32
    %c0_285 = arith.constant 0 : index
    %332 = arith.index_cast %331 : i32 to index
    %c0_286 = arith.constant 0 : index
    %333 = vector.load %arg4[%c0_285, %332, %c0_286] : memref<1x132x4xf32, #tpu.memory_space<vmem>>, vector<1x88x4xf32>
    %334 = vector.shape_cast %333 : vector<1x88x4xf32> to vector<88x4xf32>
    %c0_287 = arith.constant 0 : index
    %c164 = arith.constant 164 : index
    %335 = vector.load %arg9[%c0_287, %c164] : memref<88x196xf32, #tpu.memory_space<vmem>>, vector<88x4xf32>
    tpu.vector_store %arg9[%c0_287, %c164], %334 {strides = array<i32>} : memref<88x196xf32, #tpu.memory_space<vmem>>, vector<88x4xf32>,
    %c8_i32_288 = arith.constant 8 : i32
    %336 = arith.muli %arg1, %c8_i32_288 : i32
    %c3_i32_289 = arith.constant 3 : i32
    %337 = arith.addi %336, %c3_i32_289 : i32
    %c11_i32_290 = arith.constant 11 : i32
    %338 = arith.muli %337, %c11_i32_290 : i32
    %c0_i32_291 = arith.constant 0 : i32
    %339 = arith.addi %338, %c0_i32_291 : i32
    %c0_292 = arith.constant 0 : index
    %340 = arith.index_cast %339 : i32 to index
    %c0_293 = arith.constant 0 : index
    %341 = vector.load %arg2[%c0_292, %340, %c0_293] : memref<1x132x4xf32, #tpu.memory_space<vmem>>, vector<1x88x4xf32>
    %342 = vector.shape_cast %341 : vector<1x88x4xf32> to vector<88x4xf32>
    %c0_294 = arith.constant 0 : index
    %c168 = arith.constant 168 : index
    %343 = vector.load %arg9[%c0_294, %c168] : memref<88x196xf32, #tpu.memory_space<vmem>>, vector<88x4xf32>
    tpu.vector_store %arg9[%c0_294, %c168], %342 {strides = array<i32>} : memref<88x196xf32, #tpu.memory_space<vmem>>, vector<88x4xf32>,
    %c8_i32_295 = arith.constant 8 : i32
    %344 = arith.muli %arg1, %c8_i32_295 : i32
    %c3_i32_296 = arith.constant 3 : i32
    %345 = arith.addi %344, %c3_i32_296 : i32
    %c11_i32_297 = arith.constant 11 : i32
    %346 = arith.muli %345, %c11_i32_297 : i32
    %c0_i32_298 = arith.constant 0 : i32
    %347 = arith.addi %346, %c0_i32_298 : i32
    %c0_299 = arith.constant 0 : index
    %348 = arith.index_cast %347 : i32 to index
    %c0_300 = arith.constant 0 : index
    %349 = vector.load %arg3[%c0_299, %348, %c0_300] : memref<1x132x4xf32, #tpu.memory_space<vmem>>, vector<1x88x4xf32>
    %350 = vector.shape_cast %349 : vector<1x88x4xf32> to vector<88x4xf32>
    %c0_301 = arith.constant 0 : index
    %c172 = arith.constant 172 : index
    %351 = vector.load %arg9[%c0_301, %c172] : memref<88x196xf32, #tpu.memory_space<vmem>>, vector<88x4xf32>
    tpu.vector_store %arg9[%c0_301, %c172], %350 {strides = array<i32>} : memref<88x196xf32, #tpu.memory_space<vmem>>, vector<88x4xf32>,
    %c8_i32_302 = arith.constant 8 : i32
    %352 = arith.muli %arg1, %c8_i32_302 : i32
    %c3_i32_303 = arith.constant 3 : i32
    %353 = arith.addi %352, %c3_i32_303 : i32
    %c11_i32_304 = arith.constant 11 : i32
    %354 = arith.muli %353, %c11_i32_304 : i32
    %c1_i32_305 = arith.constant 1 : i32
    %355 = arith.addi %354, %c1_i32_305 : i32
    %c0_306 = arith.constant 0 : index
    %356 = arith.index_cast %355 : i32 to index
    %c0_307 = arith.constant 0 : index
    %357 = vector.load %arg2[%c0_306, %356, %c0_307] : memref<1x132x4xf32, #tpu.memory_space<vmem>>, vector<1x88x4xf32>
    %358 = vector.shape_cast %357 : vector<1x88x4xf32> to vector<88x4xf32>
    %c0_308 = arith.constant 0 : index
    %c176 = arith.constant 176 : index
    %359 = vector.load %arg9[%c0_308, %c176] : memref<88x196xf32, #tpu.memory_space<vmem>>, vector<88x4xf32>
    tpu.vector_store %arg9[%c0_308, %c176], %358 {strides = array<i32>} : memref<88x196xf32, #tpu.memory_space<vmem>>, vector<88x4xf32>,
    %c8_i32_309 = arith.constant 8 : i32
    %360 = arith.muli %arg1, %c8_i32_309 : i32
    %c3_i32_310 = arith.constant 3 : i32
    %361 = arith.addi %360, %c3_i32_310 : i32
    %c11_i32_311 = arith.constant 11 : i32
    %362 = arith.muli %361, %c11_i32_311 : i32
    %c1_i32_312 = arith.constant 1 : i32
    %363 = arith.addi %362, %c1_i32_312 : i32
    %c0_313 = arith.constant 0 : index
    %364 = arith.index_cast %363 : i32 to index
    %c0_314 = arith.constant 0 : index
    %365 = vector.load %arg3[%c0_313, %364, %c0_314] : memref<1x132x4xf32, #tpu.memory_space<vmem>>, vector<1x88x4xf32>
    %366 = vector.shape_cast %365 : vector<1x88x4xf32> to vector<88x4xf32>
    %c0_315 = arith.constant 0 : index
    %c180 = arith.constant 180 : index
    %367 = vector.load %arg9[%c0_315, %c180] : memref<88x196xf32, #tpu.memory_space<vmem>>, vector<88x4xf32>
    tpu.vector_store %arg9[%c0_315, %c180], %366 {strides = array<i32>} : memref<88x196xf32, #tpu.memory_space<vmem>>, vector<88x4xf32>,
    %c8_i32_316 = arith.constant 8 : i32
    %368 = arith.muli %arg1, %c8_i32_316 : i32
    %c3_i32_317 = arith.constant 3 : i32
    %369 = arith.addi %368, %c3_i32_317 : i32
    %c11_i32_318 = arith.constant 11 : i32
    %370 = arith.muli %369, %c11_i32_318 : i32
    %c2_i32_319 = arith.constant 2 : i32
    %371 = arith.addi %370, %c2_i32_319 : i32
    %c0_320 = arith.constant 0 : index
    %372 = arith.index_cast %371 : i32 to index
    %c0_321 = arith.constant 0 : index
    %373 = vector.load %arg2[%c0_320, %372, %c0_321] : memref<1x132x4xf32, #tpu.memory_space<vmem>>, vector<1x88x4xf32>
    %374 = vector.shape_cast %373 : vector<1x88x4xf32> to vector<88x4xf32>
    %c0_322 = arith.constant 0 : index
    %c184 = arith.constant 184 : index
    %375 = vector.load %arg9[%c0_322, %c184] : memref<88x196xf32, #tpu.memory_space<vmem>>, vector<88x4xf32>
    tpu.vector_store %arg9[%c0_322, %c184], %374 {strides = array<i32>} : memref<88x196xf32, #tpu.memory_space<vmem>>, vector<88x4xf32>,
    %c8_i32_323 = arith.constant 8 : i32
    %376 = arith.muli %arg1, %c8_i32_323 : i32
    %c3_i32_324 = arith.constant 3 : i32
    %377 = arith.addi %376, %c3_i32_324 : i32
    %c11_i32_325 = arith.constant 11 : i32
    %378 = arith.muli %377, %c11_i32_325 : i32
    %c2_i32_326 = arith.constant 2 : i32
    %379 = arith.addi %378, %c2_i32_326 : i32
    %c0_327 = arith.constant 0 : index
    %380 = arith.index_cast %379 : i32 to index
    %c0_328 = arith.constant 0 : index
    %381 = vector.load %arg3[%c0_327, %380, %c0_328] : memref<1x132x4xf32, #tpu.memory_space<vmem>>, vector<1x88x4xf32>
    %382 = vector.shape_cast %381 : vector<1x88x4xf32> to vector<88x4xf32>
    %c0_329 = arith.constant 0 : index
    %c188 = arith.constant 188 : index
    %383 = vector.load %arg9[%c0_329, %c188] : memref<88x196xf32, #tpu.memory_space<vmem>>, vector<88x4xf32>
    tpu.vector_store %arg9[%c0_329, %c188], %382 {strides = array<i32>} : memref<88x196xf32, #tpu.memory_space<vmem>>, vector<88x4xf32>,
    %c8_i32_330 = arith.constant 8 : i32
    %384 = arith.muli %arg1, %c8_i32_330 : i32
    %c3_i32_331 = arith.constant 3 : i32
    %385 = arith.addi %384, %c3_i32_331 : i32
    %c11_i32_332 = arith.constant 11 : i32
    %386 = arith.muli %385, %c11_i32_332 : i32
    %c3_i32_333 = arith.constant 3 : i32
    %387 = arith.addi %386, %c3_i32_333 : i32
    %c0_334 = arith.constant 0 : index
    %388 = arith.index_cast %387 : i32 to index
    %c0_335 = arith.constant 0 : index
    %389 = vector.load %arg2[%c0_334, %388, %c0_335] : memref<1x132x4xf32, #tpu.memory_space<vmem>>, vector<1x88x4xf32>
    %390 = vector.shape_cast %389 : vector<1x88x4xf32> to vector<88x4xf32>
    %c0_336 = arith.constant 0 : index
    %c192 = arith.constant 192 : index
    %391 = vector.load %arg9[%c0_336, %c192] : memref<88x196xf32, #tpu.memory_space<vmem>>, vector<88x4xf32>
    tpu.vector_store %arg9[%c0_336, %c192], %390 {strides = array<i32>} : memref<88x196xf32, #tpu.memory_space<vmem>>, vector<88x4xf32>,
    %c0_337 = arith.constant 0 : index
    %c0_338 = arith.constant 0 : index
    %392 = vector.load %arg9[%c0_337, %c0_338] : memref<88x196xf32, #tpu.memory_space<vmem>>, vector<88x196xf32>
    %393 = arith.truncf %392 : vector<88x196xf32> to vector<88x196xbf16>
    %c0_339 = arith.constant 0 : index
    %c0_340 = arith.constant 0 : index
    %394 = vector.load %arg6[%c0_339, %c0_340] : memref<196x64xbf16, #tpu.memory_space<vmem>>, vector<196x64xbf16>
    %cst = arith.constant dense<0.000000e+00> : vector<88x64xf32>
    %395 = tpu.matmul %393, %394, %cst {dimension_numbers = #tpu.dot_dimension_numbers<[1], [0], [0], [1], [0, 0, 1, 1], [], []>} : vector<88x196xbf16>, vector<196x64xbf16>, vector<88x64xf32> -> vector<88x64xf32>
    %c0_341 = arith.constant 0 : index
    %c0_342 = arith.constant 0 : index
    %396 = vector.load %arg7[%c0_341, %c0_342] : memref<1x64xf32, #tpu.memory_space<vmem>>, vector<1x64xf32>
    %397 = vector.broadcast %396 : vector<1x64xf32> to vector<88x64xf32>
    %398 = arith.addf %395, %397 : vector<88x64xf32>
    %cst_343 = arith.constant 0.000000e+00 : f32
    %399 = vector.broadcast %cst_343 : f32 to vector<88x64xf32>
    %400 = arith.maximumf %398, %399 : vector<88x64xf32>
    %c0_344 = arith.constant 0 : index
    %c0_345 = arith.constant 0 : index
    %c0_346 = arith.constant 0 : index
    %401 = vector.load %arg8[%c0_344, %c0_345, %c0_346] : memref<1x88x64xf32, #tpu.memory_space<vmem>>, vector<1x88x64xf32>
    %402 = vector.shape_cast %401 : vector<1x88x64xf32> to vector<88x64xf32>
    %403 = vector.shape_cast %400 : vector<88x64xf32> to vector<1x88x64xf32>
    tpu.vector_store %arg8[%c0_344, %c0_345, %c0_346], %403 {strides = array<i32>} : memref<1x88x64xf32, #tpu.memory_space<vmem>>, vector<1x88x64xf32>,
    return
  }
  func.func @transform_0(%arg0: i32, %arg1: i32) -> (i32, i32, i32) {
    %c0_i32 = arith.constant 0 : i32
    %c0_i32_0 = arith.constant 0 : i32
    %c0_i32_1 = arith.constant 0 : i32
    return %arg0, %c0_i32, %c0_i32_0 : i32, i32, i32
  }
  func.func @transform_1(%arg0: i32, %arg1: i32) -> (i32, i32, i32) {
    %c0_i32 = arith.constant 0 : i32
    %c0_i32_0 = arith.constant 0 : i32
    %c0_i32_1 = arith.constant 0 : i32
    return %arg0, %c0_i32, %c0_i32_0 : i32, i32, i32
  }
  func.func @transform_2(%arg0: i32, %arg1: i32) -> (i32, i32, i32) {
    %c0_i32 = arith.constant 0 : i32
    %c0_i32_0 = arith.constant 0 : i32
    %c0_i32_1 = arith.constant 0 : i32
    return %arg0, %c0_i32, %c0_i32_0 : i32, i32, i32
  }
  func.func @transform_3(%arg0: i32, %arg1: i32) -> (i32, i32, i32) {
    %c0_i32 = arith.constant 0 : i32
    %c0_i32_0 = arith.constant 0 : i32
    %c0_i32_1 = arith.constant 0 : i32
    return %arg0, %c0_i32, %c0_i32_0 : i32, i32, i32
  }
  func.func @transform_4(%arg0: i32, %arg1: i32) -> (i32, i32) {
    %c0_i32 = arith.constant 0 : i32
    %c0_i32_0 = arith.constant 0 : i32
    %c0_i32_1 = arith.constant 0 : i32
    return %c0_i32, %c0_i32_0 : i32, i32
  }
  func.func @transform_5(%arg0: i32, %arg1: i32) -> (i32, i32) {
    %c0_i32 = arith.constant 0 : i32
    %c0_i32_0 = arith.constant 0 : i32
    %c0_i32_1 = arith.constant 0 : i32
    return %c0_i32, %c0_i32_0 : i32, i32
  }
  func.func @transform_6(%arg0: i32, %arg1: i32) -> (i32, i32, i32) {
    %c0_i32 = arith.constant 0 : i32
    %c0_i32_0 = arith.constant 0 : i32
    return %arg0, %arg1, %c0_i32 : i32, i32, i32
  }
}

module attributes {stable_mosaic.version = 11 : i64} {
  func.func @_maxpool_kernel(%arg0: i32, %arg1: i32, %arg2: memref<1x9x6x64xf32, #tpu.memory_space<vmem>>, %arg3: memref<1x9x6x64xf32, #tpu.memory_space<vmem>>, %arg4: memref<1x9x6x64xf32, #tpu.memory_space<vmem>>, %arg5: memref<1x9x6x64xf32, #tpu.memory_space<vmem>>, %arg6: memref<1x8x5x64xf32, #tpu.memory_space<vmem>>) attributes {dimension_semantics = [#tpu.dimension_semantics<parallel>, #tpu.dimension_semantics<parallel>], iteration_bounds = array<i64: 2, 1>, scalar_prefetch = 0 : i64, scratch_operands = 0 : i64, tpu.core_type = #tpu.core_type<tc>, window_params = [{transform_indices = @transform_0, window_bounds = array<i64: 1, 9, 6, 64>}, {transform_indices = @transform_1, window_bounds = array<i64: 1, 9, 6, 64>}, {transform_indices = @transform_2, window_bounds = array<i64: 1, 9, 6, 64>}, {transform_indices = @transform_3, window_bounds = array<i64: 1, 9, 6, 64>}, {transform_indices = @transform_4, window_bounds = array<i64: 1, 8, 5, 64>}]} {
    %c8_i32 = arith.constant 8 : i32
    %0 = arith.muli %arg1, %c8_i32 : i32
    %c0_i32 = arith.constant 0 : i32
    %1 = arith.addi %0, %c0_i32 : i32
    %c0 = arith.constant 0 : index
    %2 = arith.index_cast %1 : i32 to index
    %c0_0 = arith.constant 0 : index
    %c0_1 = arith.constant 0 : index
    %3 = vector.load %arg2[%c0, %2, %c0_0, %c0_1] : memref<1x9x6x64xf32, #tpu.memory_space<vmem>>, vector<1x8x5x64xf32>
    %4 = vector.shape_cast %3 : vector<1x8x5x64xf32> to vector<8x5x64xf32>
    %c0_i32_2 = arith.constant 0 : i32
    %5 = arith.addi %0, %c0_i32_2 : i32
    %c0_3 = arith.constant 0 : index
    %6 = arith.index_cast %5 : i32 to index
    %c1 = arith.constant 1 : index
    %c0_4 = arith.constant 0 : index
    %7 = vector.load %arg2[%c0_3, %6, %c1, %c0_4] : memref<1x9x6x64xf32, #tpu.memory_space<vmem>>, vector<1x8x5x64xf32>
    %8 = vector.shape_cast %7 : vector<1x8x5x64xf32> to vector<8x5x64xf32>
    %9 = arith.maximumf %4, %8 : vector<8x5x64xf32>
    %c1_i32 = arith.constant 1 : i32
    %10 = arith.addi %0, %c1_i32 : i32
    %c0_5 = arith.constant 0 : index
    %11 = arith.index_cast %10 : i32 to index
    %c0_6 = arith.constant 0 : index
    %c0_7 = arith.constant 0 : index
    %12 = vector.load %arg2[%c0_5, %11, %c0_6, %c0_7] : memref<1x9x6x64xf32, #tpu.memory_space<vmem>>, vector<1x8x5x64xf32>
    %13 = vector.shape_cast %12 : vector<1x8x5x64xf32> to vector<8x5x64xf32>
    %14 = arith.maximumf %9, %13 : vector<8x5x64xf32>
    %c1_i32_8 = arith.constant 1 : i32
    %15 = arith.addi %0, %c1_i32_8 : i32
    %c0_9 = arith.constant 0 : index
    %16 = arith.index_cast %15 : i32 to index
    %c1_10 = arith.constant 1 : index
    %c0_11 = arith.constant 0 : index
    %17 = vector.load %arg2[%c0_9, %16, %c1_10, %c0_11] : memref<1x9x6x64xf32, #tpu.memory_space<vmem>>, vector<1x8x5x64xf32>
    %18 = vector.shape_cast %17 : vector<1x8x5x64xf32> to vector<8x5x64xf32>
    %19 = arith.maximumf %14, %18 : vector<8x5x64xf32>
    %c0_i32_12 = arith.constant 0 : i32
    %20 = arith.addi %0, %c0_i32_12 : i32
    %c0_13 = arith.constant 0 : index
    %21 = arith.index_cast %20 : i32 to index
    %c0_14 = arith.constant 0 : index
    %c0_15 = arith.constant 0 : index
    %22 = vector.load %arg3[%c0_13, %21, %c0_14, %c0_15] : memref<1x9x6x64xf32, #tpu.memory_space<vmem>>, vector<1x8x5x64xf32>
    %23 = vector.shape_cast %22 : vector<1x8x5x64xf32> to vector<8x5x64xf32>
    %24 = arith.maximumf %19, %23 : vector<8x5x64xf32>
    %c1_i32_16 = arith.constant 1 : i32
    %25 = arith.addi %0, %c1_i32_16 : i32
    %c0_17 = arith.constant 0 : index
    %26 = arith.index_cast %25 : i32 to index
    %c0_18 = arith.constant 0 : index
    %c0_19 = arith.constant 0 : index
    %27 = vector.load %arg3[%c0_17, %26, %c0_18, %c0_19] : memref<1x9x6x64xf32, #tpu.memory_space<vmem>>, vector<1x8x5x64xf32>
    %28 = vector.shape_cast %27 : vector<1x8x5x64xf32> to vector<8x5x64xf32>
    %29 = arith.maximumf %24, %28 : vector<8x5x64xf32>
    %c0_i32_20 = arith.constant 0 : i32
    %30 = arith.addi %0, %c0_i32_20 : i32
    %c0_21 = arith.constant 0 : index
    %31 = arith.index_cast %30 : i32 to index
    %c0_22 = arith.constant 0 : index
    %c0_23 = arith.constant 0 : index
    %32 = vector.load %arg4[%c0_21, %31, %c0_22, %c0_23] : memref<1x9x6x64xf32, #tpu.memory_space<vmem>>, vector<1x8x5x64xf32>
    %33 = vector.shape_cast %32 : vector<1x8x5x64xf32> to vector<8x5x64xf32>
    %34 = arith.maximumf %29, %33 : vector<8x5x64xf32>
    %c0_i32_24 = arith.constant 0 : i32
    %35 = arith.addi %0, %c0_i32_24 : i32
    %c0_25 = arith.constant 0 : index
    %36 = arith.index_cast %35 : i32 to index
    %c1_26 = arith.constant 1 : index
    %c0_27 = arith.constant 0 : index
    %37 = vector.load %arg4[%c0_25, %36, %c1_26, %c0_27] : memref<1x9x6x64xf32, #tpu.memory_space<vmem>>, vector<1x8x5x64xf32>
    %38 = vector.shape_cast %37 : vector<1x8x5x64xf32> to vector<8x5x64xf32>
    %39 = arith.maximumf %34, %38 : vector<8x5x64xf32>
    %c0_i32_28 = arith.constant 0 : i32
    %40 = arith.addi %0, %c0_i32_28 : i32
    %c0_29 = arith.constant 0 : index
    %41 = arith.index_cast %40 : i32 to index
    %c0_30 = arith.constant 0 : index
    %c0_31 = arith.constant 0 : index
    %42 = vector.load %arg5[%c0_29, %41, %c0_30, %c0_31] : memref<1x9x6x64xf32, #tpu.memory_space<vmem>>, vector<1x8x5x64xf32>
    %43 = vector.shape_cast %42 : vector<1x8x5x64xf32> to vector<8x5x64xf32>
    %44 = arith.maximumf %39, %43 : vector<8x5x64xf32>
    %c0_32 = arith.constant 0 : index
    %c0_33 = arith.constant 0 : index
    %c0_34 = arith.constant 0 : index
    %c0_35 = arith.constant 0 : index
    %45 = vector.load %arg6[%c0_32, %c0_33, %c0_34, %c0_35] : memref<1x8x5x64xf32, #tpu.memory_space<vmem>>, vector<1x8x5x64xf32>
    %46 = vector.shape_cast %45 : vector<1x8x5x64xf32> to vector<8x5x64xf32>
    %47 = vector.shape_cast %44 : vector<8x5x64xf32> to vector<1x8x5x64xf32>
    tpu.vector_store %arg6[%c0_32, %c0_33, %c0_34, %c0_35], %47 {strides = array<i32>} : memref<1x8x5x64xf32, #tpu.memory_space<vmem>>, vector<1x8x5x64xf32>,
    return
  }
  func.func @transform_0(%arg0: i32, %arg1: i32) -> (i32, i32, i32, i32) {
    %c0_i32 = arith.constant 0 : i32
    %c0_i32_0 = arith.constant 0 : i32
    %c0_i32_1 = arith.constant 0 : i32
    %c0_i32_2 = arith.constant 0 : i32
    return %arg0, %c0_i32, %c0_i32_0, %c0_i32_1 : i32, i32, i32, i32
  }
  func.func @transform_1(%arg0: i32, %arg1: i32) -> (i32, i32, i32, i32) {
    %c0_i32 = arith.constant 0 : i32
    %c0_i32_0 = arith.constant 0 : i32
    %c0_i32_1 = arith.constant 0 : i32
    %c0_i32_2 = arith.constant 0 : i32
    return %arg0, %c0_i32, %c0_i32_0, %c0_i32_1 : i32, i32, i32, i32
  }
  func.func @transform_2(%arg0: i32, %arg1: i32) -> (i32, i32, i32, i32) {
    %c0_i32 = arith.constant 0 : i32
    %c0_i32_0 = arith.constant 0 : i32
    %c0_i32_1 = arith.constant 0 : i32
    %c0_i32_2 = arith.constant 0 : i32
    return %arg0, %c0_i32, %c0_i32_0, %c0_i32_1 : i32, i32, i32, i32
  }
  func.func @transform_3(%arg0: i32, %arg1: i32) -> (i32, i32, i32, i32) {
    %c0_i32 = arith.constant 0 : i32
    %c0_i32_0 = arith.constant 0 : i32
    %c0_i32_1 = arith.constant 0 : i32
    %c0_i32_2 = arith.constant 0 : i32
    return %arg0, %c0_i32, %c0_i32_0, %c0_i32_1 : i32, i32, i32, i32
  }
  func.func @transform_4(%arg0: i32, %arg1: i32) -> (i32, i32, i32, i32) {
    %c0_i32 = arith.constant 0 : i32
    %c0_i32_0 = arith.constant 0 : i32
    %c0_i32_1 = arith.constant 0 : i32
    return %arg0, %arg1, %c0_i32, %c0_i32_0 : i32, i32, i32, i32
  }
}

</mosaic_0001>

<bundles_post_ra>
// kernel: input_block_forward.3
= control target key start
LH: loop header
LB: loop body
LE: loop exit
PB: predicated region body
PF: predicated region fallthrough
CT: control target
= control target key end

     0   :  { %s681_s15 = smov 0   ;;  %s683_s16 = smov 0   ;;  %s827_s0 = inlined_call_operand.vmem [shape: f32[2,9,6,64], index: 0, kind: input, shape index: {}]   ;;  %s828_s1 = inlined_call_operand.vmem [shape: f32[2,9,6,64], index: 1, kind: input, shape index: {}]   ;;  %s829_s2 = inlined_call_operand.vmem [shape: f32[2,9,6,64], index: 2, kind: input, shape index: {}]   ;;  %s830_s3 = inlined_call_operand.vmem [shape: f32[2,9,6,64], index: 3, kind: input, shape index: {}]   ;;  %s831_s4 = inlined_call_operand.vmem [shape: f32[2,8,5,64], index: 4, kind: output, shape index: {}]  }
   0x1   :  { %s685_s17 = smov 0  }
   0x2 LB: > { %s26_s18 = sadd.s32 1, %s650_s16  ;;  %p573_p0 = scmp.ge.s32.totalorder %s654_s17, 1  ;;  %s654_s17 = sphi %s685_s17, %s14_s17   ;;  %s650_s16 = sphi %s683_s16, %s833_s16   ;;  %s646_s15 = sphi %s681_s15, %s832_s15  }
   0x3   : > { %p28_p1 = scmp.ge.s32.totalorder %s26_s18, 2  ;;  %p206_p2 = scmp.lt.s32.totalorder %s654_s17, 3 }
   0x5   : > { %s835_s18 = smov (%p28_p1, %s26_s18), 0  ;;  %p207_p3 = pnand %p573_p0, %p206_p2 }
   0x6   : > { %p251_p4 = scmp.lt.s32.totalorder (!%p207_p3), %s646_s15, 1 }
   0x7   : > { %210 = sbr.rel (%p207_p3) target bundleno = 53 (0x35), region = 36 }
   0xc   : > { %s837_s15 = smov (!%p251_p4, %s646_s15), 1  ;;  %vm427_vm0 = vcmask 520192  }
   0xd   : > { %s607_s19 = smul.u32 72, %s837_s15  ;;  %s606_s6 = sshll.u32 %s837_s15, 6 }
   0xe   : > { %s760_s9 = scalar_lea.vmem %s831_s4, %s606_s6 }
   0xf   : > { %s705_s22 = scalar_lea.vmem %s827_s0, %s607_s19  ;;  %s713_s25 = scalar_lea.vmem %s828_s1, %s607_s19 }
  0x10   : > { %v284_v0 = vld [vmem:[%s705_s22] sm:$0x1f]  ;;  %v580_v2 = vld [vmem:[%s705_s22 + $0x8] sm:$0x1f]  ;;  %v581_v8 = vld [vmem:[%s705_s22 + $0x10] sm:$0x1f]  ;;  %s723_s28 = scalar_lea.vmem %s829_s2, %s607_s19  ;;  %s733_s5 = scalar_lea.vmem %s830_s3, %s607_s19 }
  0x11   : > { %v292_v1 = vld [vmem:[%s705_s22 + $0x1] sm:$0x1f]  ;;  %v588_v4 = vld [vmem:[%s705_s22 + $0x9] sm:$0x1f]  ;;  %v589_v13 = vld [vmem:[%s705_s22 + $0x11] sm:$0x1f] }
  0x12   : > { %v300_v3 = vmax.f32 %v284_v0, %v292_v1  ;;  %v285_v6 = vld [vmem:[%s705_s22 + $0x8] sm:$0x1f]  ;;  %v344_v9 = vld [vmem:[%s713_s25] sm:$0x1f]  ;;  %v286_v15 = vld [vmem:[%s705_s22 + $0x10] sm:$0x1f] }
  0x13   : > { %v293_v7 = vld [vmem:[%s705_s22 + $0x9] sm:$0x1f]  ;;  %v294_v16 = vld [vmem:[%s705_s22 + $0x11] sm:$0x1f]  ;;  %v582_v17 = vld [vmem:[%s705_s22 + $0x18] sm:$0x1f] }
  0x14   : > { %v319_v5 = vmax.f32 %v300_v3, %v580_v2  ;;  %v301_v10 = vmax.f32 %v285_v6, %v293_v7  ;;  %v596_v12 = vld [vmem:[%s713_s25 + $0x8] sm:$0x1f]  ;;  %v302_v20 = vmax.f32 %v286_v15, %v294_v16  ;;  %v378_v21 = vld [vmem:[%s723_s28] sm:$0x1f]  ;;  %v597_v23 = vld [vmem:[%s713_s25 + $0x10] sm:$0x1f] }
  0x15   : > { %v345_v19 = vld [vmem:[%s713_s25 + $0x8] sm:$0x1f]  ;;  %v590_v24 = vld [vmem:[%s705_s22 + $0x19] sm:$0x1f]  ;;  %v583_v29 = vld [vmem:[%s705_s22 + $0x20] sm:$0x1f] }
  0x16   : > { %v335_v11 = vmax.f32 %v319_v5, %v588_v4  ;;  %v320_v14 = vmax.f32 %v301_v10, %v581_v8  ;;  %v321_v26 = vmax.f32 %v302_v20, %v582_v17  ;;  %v287_v27 = vld [vmem:[%s705_s22 + $0x18] sm:$0x1f]  ;;  %v394_v30 = vld [vmem:[%s723_s28 + $0x1] sm:$0x1f]  ;;  %v346_v33 = vld [vmem:[%s713_s25 + $0x10] sm:$0x1f] }
  0x17   : > { %v295_v28 = vld [vmem:[%s705_s22 + $0x19] sm:$0x1f]  ;;  %v411_v31 = vld [vmem:[%s733_s5] sm:$0x1f]  ;;  %v379_v36 = vld [vmem:[%s723_s28 + $0x8] sm:$0x1f] }
  0x18   : > { %v352_v18 = vmax.f32 %v335_v11, %v344_v9  ;;  %v336_v22 = vmax.f32 %v320_v14, %v589_v13  ;;  %v303_v34 = vmax.f32 %v287_v27, %v295_v28  ;;  %v337_v37 = vmax.f32 %v321_v26, %v590_v24  ;;  %v598_v38 = vld [vmem:[%s713_s25 + $0x18] sm:$0x1f]  ;;  %v591_v39 = vld [vmem:[%s705_s22 + $0x21] sm:$0x1f]  ;;  %v584_v44 = vld [vmem:[%s705_s22 + $0x28] sm:$0x1f] }
  0x19   : > { %v288_v42 = vld [vmem:[%s705_s22 + $0x20] sm:$0x1f]  ;;  %v395_v46 = vld [vmem:[%s723_s28 + $0x9] sm:$0x1f]  ;;  %v347_v49 = vld [vmem:[%s713_s25 + $0x18] sm:$0x1f] }
  0x1a   : > { %v369_v25 = vmax.f32 %v352_v18, %v596_v12  ;;  %v353_v32 = vmax.f32 %v336_v22, %v345_v19  ;;  %v322_v41 = vmax.f32 %v303_v34, %v583_v29  ;;  %v296_v43 = vld [vmem:[%s705_s22 + $0x21] sm:$0x1f]  ;;  %v412_v47 = vld [vmem:[%s733_s5 + $0x8] sm:$0x1f]  ;;  %v354_v48 = vmax.f32 %v337_v37, %v346_v33  ;;  %v380_v52 = vld [vmem:[%s723_s28 + $0x10] sm:$0x1f] }
  0x1b   : > { %v304_v50 = vmax.f32 %v288_v42, %v296_v43  ;;  %v599_v54 = vld [vmem:[%s713_s25 + $0x20] sm:$0x1f]  ;;  %v592_v55 = vld [vmem:[%s705_s22 + $0x29] sm:$0x1f]  ;;  %v585_v61 = vld [vmem:[%s705_s22 + $0x30] sm:$0x1f] }
  0x1c   : > { %v386_v35 = vmax.f32 %v369_v25, %v378_v21  ;;  %v370_v40 = vmax.f32 %v353_v32, %v597_v23  ;;  %v338_v53 = vmax.f32 %v322_v41, %v591_v39  ;;  %v371_v57 = vmax.f32 %v354_v48, %v598_v38  ;;  %v289_v59 = vld [vmem:[%s705_s22 + $0x28] sm:$0x1f]  ;;  %v396_v63 = vld [vmem:[%s723_s28 + $0x11] sm:$0x1f]  ;;  %v348_v2 = vld [vmem:[%s713_s25 + $0x20] sm:$0x1f] }
  0x1d   : > { %v323_v58 = vmax.f32 %v304_v50, %v584_v44  ;;  %v297_v60 = vld [vmem:[%s705_s22 + $0x29] sm:$0x1f]  ;;  %v413_v0 = vld [vmem:[%s733_s5 + $0x10] sm:$0x1f]  ;;  %v381_v5 = vld [vmem:[%s723_s28 + $0x18] sm:$0x1f] }
  0x1e   : > { %v402_v45 = vmax.f32 %v386_v35, %v394_v30  ;;  %v387_v51 = vmax.f32 %v370_v40, %v379_v36  ;;  %v355_v1 = vmax.f32 %v338_v53, %v347_v49  ;;  %v305_v3 = vmax.f32 %v289_v59, %v297_v60  ;;  %v600_v7 = vld [vmem:[%s713_s25 + $0x28] sm:$0x1f]  ;;  %v593_v8 = vld [vmem:[%s705_s22 + $0x31] sm:$0x1f]  ;;  %v586_v14 = vld [vmem:[%s705_s22 + $0x38] sm:$0x1f] }
  0x1f   : > { %v388_v4 = vmax.f32 %v371_v57, %v380_v52  ;;  %v339_v6 = vmax.f32 %v323_v58, %v592_v55  ;;  %v290_v12 = vld [vmem:[%s705_s22 + $0x30] sm:$0x1f]  ;;  %v397_v16 = vld [vmem:[%s723_s28 + $0x19] sm:$0x1f]  ;;  %v349_v19 = vld [vmem:[%s713_s25 + $0x28] sm:$0x1f] }
  0x20   : > { %v419_v56 = vmax.f32 %v402_v45, %v411_v31  ;;  %v403_v62 = vmax.f32 %v387_v51, %v395_v46  ;;  %v372_v10 = vmax.f32 %v355_v1, %v599_v54  ;;  %v324_v11 = vmax.f32 %v305_v3, %v585_v61  ;;  %v298_v13 = vld [vmem:[%s705_s22 + $0x31] sm:$0x1f]  ;;  %v414_v17 = vld [vmem:[%s733_s5 + $0x18] sm:$0x1f]  ;;  %v382_v22 = vld [vmem:[%s723_s28 + $0x20] sm:$0x1f] }
  0x21   : > { %v404_v15 = vmax.f32 %v388_v4, %v396_v63  ;;  %v356_v18 = vmax.f32 %v339_v6, %v348_v2  ;;  %v306_v20 = vmax.f32 %v290_v12, %v298_v13  ;;  %v601_v24 = vld [vmem:[%s713_s25 + $0x30] sm:$0x1f]  ;;  %v594_v25 = vld [vmem:[%s705_s22 + $0x39] sm:$0x1f]  ;;  %v587_v31 = vld [vmem:[%s705_s22 + $0x40] sm:$0x1f] }
  0x22   : > { %428 = vst.msk [vmem:[%s760_s9] sm:$0x1f] %vm427_vm0, %v419_v56  ;;  %v420_v9 = vmax.f32 %v403_v62, %v412_v47  ;;  %v389_v21 = vmax.f32 %v372_v10, %v381_v5  ;;  %v340_v23 = vmax.f32 %v324_v11, %v593_v8  ;;  %v291_v29 = vld [vmem:[%s705_s22 + $0x38] sm:$0x1f]  ;;  %v398_v33 = vld [vmem:[%s723_s28 + $0x21] sm:$0x1f] }
  0x23   : > { %v421_v26 = vmax.f32 %v404_v15, %v413_v0  ;;  %v373_v27 = vmax.f32 %v356_v18, %v600_v7  ;;  %v325_v28 = vmax.f32 %v306_v20, %v586_v14  ;;  %v299_v30 = vld [vmem:[%s705_s22 + $0x39] sm:$0x1f]  ;;  %v350_v35 = vld [vmem:[%s713_s25 + $0x30] sm:$0x1f]  ;;  %v383_v38 = vld [vmem:[%s723_s28 + $0x28] sm:$0x1f] }
  0x24   : > { %429 = vst.msk [vmem:[%s760_s9 + $0x8] sm:$0x1f] %vm427_vm0, %v420_v9  ;;  %v405_v32 = vmax.f32 %v389_v21, %v397_v16  ;;  %v357_v34 = vmax.f32 %v340_v23, %v349_v19  ;;  %v307_v36 = vmax.f32 %v291_v29, %v299_v30  ;;  %v595_v40 = vld [vmem:[%s705_s22 + $0x41] sm:$0x1f]  ;;  %v602_v44 = vld [vmem:[%s713_s25 + $0x38] sm:$0x1f] }
  0x25   : > { %430 = vst.msk [vmem:[%s760_s9 + $0x10] sm:$0x1f] %vm427_vm0, %v421_v26  ;;  %v390_v37 = vmax.f32 %v373_v27, %v382_v22  ;;  %v341_v39 = vmax.f32 %v325_v28, %v594_v25  ;;  %v415_v42 = vld [vmem:[%s733_s5 + $0x20] sm:$0x1f]  ;;  %v399_v47 = vld [vmem:[%s723_s28 + $0x29] sm:$0x1f] }
  0x26   : > { %v422_v41 = vmax.f32 %v405_v32, %v414_v17  ;;  %v374_v43 = vmax.f32 %v357_v34, %v601_v24  ;;  %v326_v45 = vmax.f32 %v307_v36, %v587_v31  ;;  %v351_v49 = vld [vmem:[%s713_s25 + $0x38] sm:$0x1f]  ;;  %v384_v51 = vld [vmem:[%s723_s28 + $0x30] sm:$0x1f]  ;;  %v416_v54 = vld [vmem:[%s733_s5 + $0x28] sm:$0x1f] }
  0x27   : > { %v406_v46 = vmax.f32 %v390_v37, %v398_v33  ;;  %v358_v48 = vmax.f32 %v341_v39, %v350_v35  ;;  %v603_v56 = vld [vmem:[%s713_s25 + $0x40] sm:$0x1f]  ;;  %v400_v58 = vld [vmem:[%s723_s28 + $0x31] sm:$0x1f]  ;;  %v385_v61 = vld [vmem:[%s723_s28 + $0x38] sm:$0x1f] }
  0x28   : > { %431 = vst.msk [vmem:[%s760_s9 + $0x18] sm:$0x1f] %vm427_vm0, %v422_v41  ;;  %v391_v50 = vmax.f32 %v374_v43, %v383_v38  ;;  %v342_v52 = vmax.f32 %v326_v45, %v595_v40  ;;  %v417_v63 = vld [vmem:[%s733_s5 + $0x30] sm:$0x1f]  ;;  %v401_v2 = vld [vmem:[%s723_s28 + $0x39] sm:$0x1f] }
  0x29   : > { %v423_v53 = vmax.f32 %v406_v46, %v415_v42  ;;  %v375_v55 = vmax.f32 %v358_v48, %v602_v44  ;;  %v418_v5 = vld [vmem:[%s733_s5 + $0x38] sm:$0x1f] }
  0x2a   : > { %v407_v57 = vmax.f32 %v391_v50, %v399_v47  ;;  %v359_v59 = vmax.f32 %v342_v52, %v351_v49 }
  0x2b   : > { %432 = vst.msk [vmem:[%s760_s9 + $0x20] sm:$0x1f] %vm427_vm0, %v423_v53  ;;  %v392_v60 = vmax.f32 %v375_v55, %v384_v51 }
  0x2c   : > { %v424_v62 = vmax.f32 %v407_v57, %v416_v54  ;;  %v376_v0 = vmax.f32 %v359_v59, %v603_v56 }
  0x2d   : > { %v408_v1 = vmax.f32 %v392_v60, %v400_v58 }
  0x2e   : > { %433 = vst.msk [vmem:[%s760_s9 + $0x28] sm:$0x1f] %vm427_vm0, %v424_v62  ;;  %v393_v3 = vmax.f32 %v376_v0, %v385_v61 }
  0x2f   : > { %v425_v4 = vmax.f32 %v408_v1, %v417_v63 }
  0x30   : > { %v409_v6 = vmax.f32 %v393_v3, %v401_v2 }
  0x31   : > { %434 = vst.msk [vmem:[%s760_s9 + $0x30] sm:$0x1f] %vm427_vm0, %v425_v4 }
  0x32   : > { %v426_v7 = vmax.f32 %v409_v6, %v418_v5 }
  0x34   : > { %435 = vst.msk [vmem:[%s760_s9 + $0x38] sm:$0x1f] %vm427_vm0, %v426_v7 }
  0x35 PF: > { %s14_s17 = sadd.s32 1, %s654_s17   ;;  %s832_s15 = smov %s650_s16 }
  0x36   : > { %p11_p5 = scmp.ge.s32.totalorder %s14_s17, 4   ;;  %s833_s16 = smov %s835_s18 }
  0x38   :  { %13 = sbr.rel (!%p11_p5) target bundleno = 2 (0x2), region = 81 }

// kernel: input_block_forward.2
= control target key start
LH: loop header
LB: loop body
LE: loop exit
PB: predicated region body
PF: predicated region fallthrough
CT: control target
= control target key end

     0   :  { %s4860_s21 = smov 0   ;;  %s4862_s22 = smov 0   ;;  %s6754_s0 = inlined_call_operand.vmem [shape: f32[2,132,4], index: 0, kind: input, shape index: {}]   ;;  %s6755_s1 = inlined_call_operand.vmem [shape: f32[2,132,4], index: 1, kind: input, shape index: {}]   ;;  %s6756_s2 = inlined_call_operand.vmem [shape: f32[2,132,4], index: 2, kind: input, shape index: {}]   ;;  %s6757_s3 = inlined_call_operand.vmem [shape: f32[2,132,4], index: 3, kind: input, shape index: {}]   ;;  %s6758_s4 = inlined_call_operand.vmem [shape: bf16[196,64], index: 4, kind: input, shape index: {}]   ;;  %s6759_s5 = inlined_call_operand.vmem [shape: f32[1,64], index: 5, kind: input, shape index: {}]   ;;  %s6760_s6 = inlined_call_operand.vmem [shape: f32[2,88,64], index: 6, kind: output, shape index: {}]  }
   0x1   :  { %s4864_s23 = smov 0  }
   0x2 LB: > { %s28_s24 = sadd.s32 1, %s4787_s22  ;;  %p4149_p0 = scmp.ge.s32.totalorder %s4791_s23, 1  ;;  %s4791_s23 = sphi %s4864_s23, %s16_s23   ;;  %s4787_s22 = sphi %s4862_s22, %s6803_s22   ;;  %s4783_s21 = sphi %s4860_s21, %s6802_s21  }
   0x3   : > { %p30_p1 = scmp.ge.s32.totalorder %s28_s24, 2  ;;  %p256_p2 = scmp.lt.s32.totalorder %s4791_s23, 3 }
   0x5   : > { %s6805_s24 = smov (%p30_p1, %s28_s24), 0  ;;  %p257_p3 = pnand %p4149_p0, %p256_p2 }
   0x6   : > { %p305_p4 = scmp.lt.s32.totalorder (!%p257_p3), %s4783_s21, 1  ;;  %s4793_s29 = smov (!%p257_p3), 4  }
   0x7   : > { %260 = sbr.rel (%p257_p3) target bundleno = 1374 (0x55e), region = 44  ;;  %s4794_s9 = smov (!%p257_p3), 8  }
   0x8   : > { %s4795_s10 = smov (!%p257_p3), 12   ;;  %s4796_s11 = smov (!%p257_p3), 16  }
   0x9   : > { %s4797_s12 = smov (!%p257_p3), 20   ;;  %s4798_s13 = smov (!%p257_p3), 24  }
   0xa   : > { %s4799_s17 = smov (!%p257_p3), 28   ;;  %s4801_s26 = smov (!%p257_p3), 36  }
   0xb   : > { %s4802_s27 = smov (!%p257_p3), 40   ;;  %s4803_s30 = smov (!%p257_p3), 44  }
   0xc   : > { %s6807_s21 = smov (!%p305_p4, %s4783_s21), 1  ;;  %vm349_vm0 = vcmask 31744   ;;  %vm417_vm1 = vcmask 64544   ;;  %vm486_vm2 = vcmask 97344   ;;  %vm554_vm3 = vcmask 130144   ;;  %s4804_s7 = smov 48  }
   0xd   : > { %s4881_s25 = smul.u32 136, %s6807_s21  ;;  %vm623_vm4 = vcmask 162944   ;;  %vm691_vm5 = vcmask 195744   ;;  %vm760_vm6 = vcmask 228544   ;;  %vm828_vm7 = vcmask 261344   ;;  %s4805_s14 = smov 52  }
   0xe   : > { %vm896_vm8 = vcmask 294144   ;;  %s4806_s15 = smov 56   ;;  %vm964_vm9 = vcmask 326944   ;;  %s6761_s18 = smov 60   ;;  %vm1032_vm10 = vcmask 359744   ;;  %vm1100_vm11 = vcmask 392544  }
   0xf   : > { %s4887_s28 = scalar_lea.vmem %s6755_s1, %s4881_s25  ;;  %s4911_s8 = scalar_lea.vmem %s6754_s0, %s4881_s25  ;;  %vm1168_vm12 = vcmask 425344   ;;  %vm1236_vm13 = vcmask 458144   ;;  %vm6765_vm14 = vcmask 490944   ;;  %vm6766_vm15 = vcmask 523744  }
  0x10   : > { %v364_v0 = vld [vmem:[%s4887_s28 + $0x10] sm:$0xff]  ;;  %v362_v1 = vld [vmem:[%s4887_s28] sm:$0xff]  ;;  %v365_v2 = vld [vmem:[%s4887_s28 + $0x18] sm:$0xff]  ;;  %s5085_s16 = scalar_lea.vmem %s6756_s2, %s4881_s25  ;;  %s5123_s20 = scalar_lea.vmem %s6757_s3, %s4881_s25 }
  0x11   : > { %388 = vrot.lane.b32.xlu1 %v364_v0, %s4793_s29  ;;  %384 = vrot.lane.b32.xlu0 %v362_v1, %s4793_s29  ;;  %v363_v3 = vld [vmem:[%s4887_s28 + $0x8] sm:$0xff]  ;;  %v366_v5 = vld [vmem:[%s4887_s28 + $0x20] sm:$0xff]  ;;  %s4800_s25 = smov 32   ;;  %s6763_s19 = smov 64  }
  0x12   : > { %v367_v4 = vld [vmem:[%s4887_s28 + $0x28] sm:$0xff]  ;;  %v369_v6 = vld [vmem:[%s4887_s28 + $0x38] sm:$0xff]  ;;  %v368_v7 = vld [vmem:[%s4887_s28 + $0x30] sm:$0xff] }
  0x13   : > { %v371_v8 = vld [vmem:[%s4887_s28 + $0x48] sm:$0xff]  ;;  %v370_v9 = vld [vmem:[%s4887_s28 + $0x40] sm:$0xff]  ;;  %v372_v10 = vld [vmem:[%s4887_s28 + $0x50] sm:$0xff] }
  0x14   : > { %v4155_v11 = vld [vmem:[%s4911_s8 + $0x1] sm:$0xff]  ;;  %v340_v12 = vld [vmem:[%s4911_s8 + $0x10] sm:$0xff]  ;;  %v341_v16 = vld [vmem:[%s4911_s8 + $0x18] sm:$0xff] }
  0x15   : > { %390 = vrot.lane.b32.xlu1 %v365_v2, %s4793_s29  ;;  %386 = vrot.lane.b32.xlu0 %v363_v3, %s4793_s29  ;;  %v338_v13 = vld [vmem:[%s4911_s8] sm:$0xff]  ;;  %v4156_v14 = vld [vmem:[%s4911_s8 + $0x9] sm:$0xff]  ;;  %352 = vst.msk [vmem:[#allocation2 + $0x20] sm:$0xff] %vm349_vm0, %v340_v12  ;;  %353 = vst.msk [vmem:[#allocation2 + $0x30] sm:$0xff] %vm349_vm0, %v341_v16 }
  0x16   : > { %v4157_v15 = vld [vmem:[%s4911_s8 + $0x11] sm:$0xff]  ;;  %350 = vst.msk [vmem:[#allocation2] sm:$0xff] %vm349_vm0, %v338_v13  ;;  %v339_v17 = vld [vmem:[%s4911_s8 + $0x8] sm:$0xff]  ;;  %v342_v19 = vld [vmem:[%s4911_s8 + $0x20] sm:$0xff] }
  0x17   : > { %351 = vst.msk [vmem:[#allocation2 + $0x10] sm:$0xff] %vm349_vm0, %v339_v17  ;;  %v343_v18 = vld [vmem:[%s4911_s8 + $0x28] sm:$0xff]  ;;  %354 = vst.msk [vmem:[#allocation2 + $0x40] sm:$0xff] %vm349_vm0, %v342_v19  ;;  %v345_v20 = vld [vmem:[%s4911_s8 + $0x38] sm:$0xff] }
  0x18   : > { %355 = vst.msk [vmem:[#allocation2 + $0x50] sm:$0xff] %vm349_vm0, %v343_v18  ;;  %v4158_v21 = vld [vmem:[%s4911_s8 + $0x19] sm:$0xff]  ;;  %v4159_v22 = vld [vmem:[%s4911_s8 + $0x21] sm:$0xff]  ;;  %357 = vst.msk [vmem:[#allocation2 + $0x70] sm:$0xff] %vm349_vm0, %v345_v20 }
  0x19   : > { %394 = vrot.lane.b32.xlu1 %v367_v4, %s4793_s29  ;;  %392 = vrot.lane.b32.xlu0 %v366_v5, %s4793_s29  ;;  %v344_v23 = vld [vmem:[%s4911_s8 + $0x30] sm:$0xff]  ;;  %v347_v24 = vld [vmem:[%s4911_s8 + $0x48] sm:$0xff] }
  0x1a   : > { %356 = vst.msk [vmem:[#allocation2 + $0x60] sm:$0xff] %vm349_vm0, %v344_v23  ;;  %v346_v25 = vld [vmem:[%s4911_s8 + $0x40] sm:$0xff]  ;;  %359 = vst.msk [vmem:[#allocation2 + $0x90] sm:$0xff] %vm349_vm0, %v347_v24  ;;  %v348_v26 = vld [vmem:[%s4911_s8 + $0x50] sm:$0xff] }
  0x1b   : > { %358 = vst.msk [vmem:[#allocation2 + $0x80] sm:$0xff] %vm349_vm0, %v346_v25  ;;  %360 = vst.msk [vmem:[#allocation2 + $0xa0] sm:$0xff] %vm349_vm0, %v348_v26  ;;  %v4160_v27 = vld [vmem:[%s4911_s8 + $0x29] sm:$0xff]  ;;  %v4161_v28 = vld [vmem:[%s4911_s8 + $0x31] sm:$0xff] }
  0x1c   : > { %v4162_v29 = vld [vmem:[%s4911_s8 + $0x39] sm:$0xff]  ;;  %v4163_v30 = vld [vmem:[%s4911_s8 + $0x41] sm:$0xff]  ;;  %v4164_v31 = vld [vmem:[%s4911_s8 + $0x49] sm:$0xff] }
  0x1d   : > { %398 = vrot.lane.b32.xlu1 %v369_v6, %s4793_s29  ;;  %396 = vrot.lane.b32.xlu0 %v368_v7, %s4793_s29  ;;  %v4165_v32 = vld [vmem:[%s4911_s8 + $0x51] sm:$0xff]  ;;  %v4166_v33 = vld [vmem:[%s4887_s28 + $0x1] sm:$0xff] }
  0x1e   : > { %v4167_v34 = vld [vmem:[%s4887_s28 + $0x9] sm:$0xff]  ;;  %v4168_v35 = vld [vmem:[%s4887_s28 + $0x11] sm:$0xff]  ;;  %v4169_v36 = vld [vmem:[%s4887_s28 + $0x19] sm:$0xff] }
  0x1f   : > { %v4170_v37 = vld [vmem:[%s4887_s28 + $0x21] sm:$0xff]  ;;  %v4171_v38 = vld [vmem:[%s4887_s28 + $0x29] sm:$0xff]  ;;  %v4172_v39 = vld [vmem:[%s4887_s28 + $0x31] sm:$0xff] }
  0x20   : > { %v4173_v40 = vld [vmem:[%s4887_s28 + $0x39] sm:$0xff]  ;;  %v4174_v41 = vld [vmem:[%s4887_s28 + $0x41] sm:$0xff]  ;;  %v4175_v42 = vld [vmem:[%s4887_s28 + $0x49] sm:$0xff] }
  0x21   : > { %402 = vrot.lane.b32.xlu1 %v371_v8, %s4793_s29  ;;  %400 = vrot.lane.b32.xlu0 %v370_v9, %s4793_s29  ;;  %v4176_v43 = vld [vmem:[%s4887_s28 + $0x51] sm:$0xff]  ;;  %v4177_v44 = vld [vmem:[%s4911_s8 + $0x2] sm:$0xff] }
  0x22   : > { %v4178_v45 = vld [vmem:[%s4911_s8 + $0xa] sm:$0xff]  ;;  %v4179_v46 = vld [vmem:[%s4911_s8 + $0x12] sm:$0xff]  ;;  %v4180_v47 = vld [vmem:[%s4911_s8 + $0x1a] sm:$0xff] }
  0x23   : > { %v4181_v48 = vld [vmem:[%s4911_s8 + $0x22] sm:$0xff]  ;;  %v4182_v49 = vld [vmem:[%s4911_s8 + $0x2a] sm:$0xff]  ;;  %v4183_v50 = vld [vmem:[%s4911_s8 + $0x32] sm:$0xff] }
  0x24   : > { %v4184_v51 = vld [vmem:[%s4911_s8 + $0x3a] sm:$0xff]  ;;  %v4185_v52 = vld [vmem:[%s4911_s8 + $0x42] sm:$0xff]  ;;  %v4186_v53 = vld [vmem:[%s4911_s8 + $0x4a] sm:$0xff] }
  0x25   : > { %404 = vrot.lane.b32.xlu0 %v372_v10, %s4793_s29  ;;  %453 = vrot.lane.b32.xlu1 %v4155_v11, %s4794_s9  ;;  %v4187_v54 = vld [vmem:[%s4911_s8 + $0x52] sm:$0xff]  ;;  %v4188_v55 = vld [vmem:[%s4887_s28 + $0x2] sm:$0xff] }
  0x26   : > { %v4189_v56 = vld [vmem:[%s4887_s28 + $0xa] sm:$0xff]  ;;  %v4190_v57 = vld [vmem:[%s4887_s28 + $0x12] sm:$0xff]  ;;  %v4191_v58 = vld [vmem:[%s4887_s28 + $0x1a] sm:$0xff] }
  0x27   : > { %v4192_v59 = vld [vmem:[%s4887_s28 + $0x22] sm:$0xff]  ;;  %v4193_v60 = vld [vmem:[%s4887_s28 + $0x2a] sm:$0xff]  ;;  %v4194_v61 = vld [vmem:[%s4887_s28 + $0x32] sm:$0xff] }
  0x28   : > { %v4195_v62 = vld [vmem:[%s4887_s28 + $0x3a] sm:$0xff]  ;;  %v4196_v63 = vld [vmem:[%s4887_s28 + $0x42] sm:$0xff]  ;;  %v4197_v0 = vld [vmem:[%s4887_s28 + $0x4a] sm:$0xff] }
  0x29   : > { %455 = vrot.lane.b32.xlu0 %v4156_v14, %s4794_s9  ;;  %457 = vrot.lane.b32.xlu1 %v4157_v15, %s4794_s9  ;;  %v4198_v1 = vld [vmem:[%s4887_s28 + $0x52] sm:$0xff]  ;;  %v4199_v2 = vld [vmem:[%s4911_s8 + $0x3] sm:$0xff] }
  0x2a   : > { %v5030_v3 = vld [vmem:[%s4911_s8 + $0xb] sm:$0xff]  ;;  %v5033_v4 = vld [vmem:[%s4911_s8 + $0x13] sm:$0xff]  ;;  %v5040_v5 = vld [vmem:[%s4911_s8 + $0x1b] sm:$0xff] }
  0x2b   : > { %v5043_v6 = vld [vmem:[%s4911_s8 + $0x23] sm:$0xff]  ;;  %v5052_v9 = vld [vmem:[%s4911_s8 + $0x2b] sm:$0xff]  ;;  %v5055_v10 = vld [vmem:[%s4911_s8 + $0x33] sm:$0xff] }
  0x2c   : > { %v5064_v13 = vld [vmem:[%s4911_s8 + $0x3b] sm:$0xff]  ;;  %v5067_v14 = vld [vmem:[%s4911_s8 + $0x43] sm:$0xff]  ;;  %v5076_v17 = vld [vmem:[%s4911_s8 + $0x4b] sm:$0xff] }
  0x2d   : > { %459 = vrot.lane.b32.xlu0 %v4158_v21, %s4794_s9  ;;  %461 = vrot.lane.b32.xlu1 %v4159_v22, %s4794_s9  ;;  %v5079_v18 = vld [vmem:[%s4911_s8 + $0x53] sm:$0xff]  ;;  %v773_v21 = vld [vmem:[%s5085_s16] sm:$0xff] }
  0x2e   : > { %v774_v22 = vld [vmem:[%s5085_s16 + $0x8] sm:$0xff]  ;;  %v775_v25 = vld [vmem:[%s5085_s16 + $0x10] sm:$0xff]  ;;  %v776_v26 = vld [vmem:[%s5085_s16 + $0x18] sm:$0xff] }
  0x31   : > { %463 = vrot.lane.b32.xlu0 %v4160_v27, %s4794_s9  ;;  %465 = vrot.lane.b32.xlu1 %v4161_v28, %s4794_s9 }
  0x35   : > { %467 = vrot.lane.b32.xlu0 %v4162_v29, %s4794_s9  ;;  %469 = vrot.lane.b32.xlu1 %v4163_v30, %s4794_s9  ;;  %v777_v29 = vld [vmem:[%s5085_s16 + $0x20] sm:$0xff]  ;;  %v778_v30 = vld [vmem:[%s5085_s16 + $0x28] sm:$0xff] }
  0x39   : > { %471 = vrot.lane.b32.xlu0 %v4164_v31, %s4794_s9  ;;  %473 = vrot.lane.b32.xlu1 %v4165_v32, %s4794_s9 }
  0x3d   : > { %521 = vrot.lane.b32.xlu0 %v4166_v33, %s4795_s10  ;;  %523 = vrot.lane.b32.xlu1 %v4167_v34, %s4795_s10  ;;  %v779_v33 = vld [vmem:[%s5085_s16 + $0x30] sm:$0xff]  ;;  %v780_v34 = vld [vmem:[%s5085_s16 + $0x38] sm:$0xff] }
  0x41   : > { %525 = vrot.lane.b32.xlu0 %v4168_v35, %s4795_s10  ;;  %527 = vrot.lane.b32.xlu1 %v4169_v36, %s4795_s10 }
  0x45   : > { %529 = vrot.lane.b32.xlu0 %v4170_v37, %s4795_s10  ;;  %531 = vrot.lane.b32.xlu1 %v4171_v38, %s4795_s10  ;;  %v781_v37 = vld [vmem:[%s5085_s16 + $0x40] sm:$0xff]  ;;  %v782_v38 = vld [vmem:[%s5085_s16 + $0x48] sm:$0xff] }
  0x49   : > { %533 = vrot.lane.b32.xlu0 %v4172_v39, %s4795_s10  ;;  %535 = vrot.lane.b32.xlu1 %v4173_v40, %s4795_s10 }
  0x4d   : > { %537 = vrot.lane.b32.xlu0 %v4174_v41, %s4795_s10  ;;  %539 = vrot.lane.b32.xlu1 %v4175_v42, %s4795_s10  ;;  %v783_v41 = vld [vmem:[%s5085_s16 + $0x50] sm:$0xff]  ;;  %v841_v42 = vld [vmem:[%s5123_s20] sm:$0xff] }
  0x51   : > { %541 = vrot.lane.b32.xlu0 %v4176_v43, %s4795_s10  ;;  %590 = vrot.lane.b32.xlu1 %v4177_v44, %s4796_s11 }
  0x55   : > { %592 = vrot.lane.b32.xlu0 %v4178_v45, %s4796_s11  ;;  %594 = vrot.lane.b32.xlu1 %v4179_v46, %s4796_s11  ;;  %v842_v45 = vld [vmem:[%s5123_s20 + $0x8] sm:$0xff]  ;;  %v843_v46 = vld [vmem:[%s5123_s20 + $0x10] sm:$0xff] }
  0x59   : > { %596 = vrot.lane.b32.xlu0 %v4180_v47, %s4796_s11  ;;  %598 = vrot.lane.b32.xlu1 %v4181_v48, %s4796_s11 }
  0x5d   : > { %600 = vrot.lane.b32.xlu0 %v4182_v49, %s4796_s11  ;;  %602 = vrot.lane.b32.xlu1 %v4183_v50, %s4796_s11  ;;  %v844_v49 = vld [vmem:[%s5123_s20 + $0x18] sm:$0xff]  ;;  %v845_v50 = vld [vmem:[%s5123_s20 + $0x20] sm:$0xff] }
  0x61   : > { %604 = vrot.lane.b32.xlu0 %v4184_v51, %s4796_s11  ;;  %606 = vrot.lane.b32.xlu1 %v4185_v52, %s4796_s11 }
  0x65   : > { %608 = vrot.lane.b32.xlu0 %v4186_v53, %s4796_s11  ;;  %610 = vrot.lane.b32.xlu1 %v4187_v54, %s4796_s11  ;;  %v846_v53 = vld [vmem:[%s5123_s20 + $0x28] sm:$0xff]  ;;  %v847_v54 = vld [vmem:[%s5123_s20 + $0x30] sm:$0xff] }
  0x69   : > { %658 = vrot.lane.b32.xlu0 %v4188_v55, %s4797_s12  ;;  %660 = vrot.lane.b32.xlu1 %v4189_v56, %s4797_s12 }
  0x6d   : > { %662 = vrot.lane.b32.xlu0 %v4190_v57, %s4797_s12  ;;  %664 = vrot.lane.b32.xlu1 %v4191_v58, %s4797_s12  ;;  %v848_v57 = vld [vmem:[%s5123_s20 + $0x38] sm:$0xff]  ;;  %v849_v58 = vld [vmem:[%s5123_s20 + $0x40] sm:$0xff] }
  0x71   : > { %666 = vrot.lane.b32.xlu0 %v4192_v59, %s4797_s12  ;;  %668 = vrot.lane.b32.xlu1 %v4193_v60, %s4797_s12 }
  0x75   : > { %670 = vrot.lane.b32.xlu0 %v4194_v61, %s4797_s12  ;;  %672 = vrot.lane.b32.xlu1 %v4195_v62, %s4797_s12  ;;  %v850_v61 = vld [vmem:[%s5123_s20 + $0x48] sm:$0xff]  ;;  %v851_v62 = vld [vmem:[%s5123_s20 + $0x50] sm:$0xff] }
  0x79   : > { %674 = vrot.lane.b32.xlu0 %v4196_v63, %s4797_s12  ;;  %676 = vrot.lane.b32.xlu1 %v4197_v0, %s4797_s12 }
  0x7d   : > { %678 = vrot.lane.b32.xlu0 %v4198_v1, %s4797_s12  ;;  %727 = vrot.lane.b32.xlu1 %v4199_v2, %s4798_s13  ;;  %v4210_v1 = vld [vmem:[%s5085_s16 + $0x1] sm:$0xff]  ;;  %v4211_v2 = vld [vmem:[%s5085_s16 + $0x9] sm:$0xff] }
  0x81   : > { %729 = vrot.lane.b32.xlu0 %v5030_v3, %s4798_s13  ;;  %731 = vrot.lane.b32.xlu1 %v5033_v4, %s4798_s13 }
  0x83   : > { %v389_v7 = vpop.permute.xlu1 %388  ;;  %v385_v8 = vpop.permute.xlu0 %384 }
  0x84   : > { %420 = vst.msk [vmem:[#allocation2 + $0x20] sm:$0xff] %vm417_vm1, %v389_v7  ;;  %418 = vst.msk [vmem:[#allocation2] sm:$0xff] %vm417_vm1, %v385_v8 }
  0x85   : > { %733 = vrot.lane.b32.xlu0 %v5040_v5, %s4798_s13  ;;  %735 = vrot.lane.b32.xlu1 %v5043_v6, %s4798_s13 }
  0x87   : > { %v391_v11 = vpop.permute.xlu1 %390  ;;  %v387_v12 = vpop.permute.xlu0 %386 }
  0x88   : > { %421 = vst.msk [vmem:[#allocation2 + $0x30] sm:$0xff] %vm417_vm1, %v391_v11  ;;  %419 = vst.msk [vmem:[#allocation2 + $0x10] sm:$0xff] %vm417_vm1, %v387_v12  ;;  %v4212_v11 = vld [vmem:[%s5085_s16 + $0x11] sm:$0xff]  ;;  %v4213_v12 = vld [vmem:[%s5085_s16 + $0x19] sm:$0xff] }
  0x89   : > { %737 = vrot.lane.b32.xlu0 %v5052_v9, %s4798_s13  ;;  %739 = vrot.lane.b32.xlu1 %v5055_v10, %s4798_s13 }
  0x8b   : > { %v395_v15 = vpop.permute.xlu1 %394  ;;  %v393_v16 = vpop.permute.xlu0 %392 }
  0x8c   : > { %423 = vst.msk [vmem:[#allocation2 + $0x50] sm:$0xff] %vm417_vm1, %v395_v15  ;;  %422 = vst.msk [vmem:[#allocation2 + $0x40] sm:$0xff] %vm417_vm1, %v393_v16 }
  0x8d   : > { %741 = vrot.lane.b32.xlu0 %v5064_v13, %s4798_s13  ;;  %743 = vrot.lane.b32.xlu1 %v5067_v14, %s4798_s13 }
  0x8f   : > { %v399_v19 = vpop.permute.xlu1 %398  ;;  %v397_v20 = vpop.permute.xlu0 %396 }
  0x90   : > { %425 = vst.msk [vmem:[#allocation2 + $0x70] sm:$0xff] %vm417_vm1, %v399_v19  ;;  %424 = vst.msk [vmem:[#allocation2 + $0x60] sm:$0xff] %vm417_vm1, %v397_v20  ;;  %v4214_v19 = vld [vmem:[%s5085_s16 + $0x21] sm:$0xff]  ;;  %v4215_v20 = vld [vmem:[%s5085_s16 + $0x29] sm:$0xff] }
  0x91   : > { %745 = vrot.lane.b32.xlu0 %v5076_v17, %s4798_s13  ;;  %747 = vrot.lane.b32.xlu1 %v5079_v18, %s4798_s13 }
  0x93   : > { %v403_v23 = vpop.permute.xlu1 %402  ;;  %v401_v24 = vpop.permute.xlu0 %400 }
  0x94   : > { %427 = vst.msk [vmem:[#allocation2 + $0x90] sm:$0xff] %vm417_vm1, %v403_v23  ;;  %426 = vst.msk [vmem:[#allocation2 + $0x80] sm:$0xff] %vm417_vm1, %v401_v24  ;;  %v4216_v23 = vld [vmem:[%s5085_s16 + $0x31] sm:$0xff]  ;;  %v4217_v24 = vld [vmem:[%s5085_s16 + $0x39] sm:$0xff] }
  0x95   : > { %795 = vrot.lane.b32.xlu0 %v773_v21, %s4799_s17  ;;  %797 = vrot.lane.b32.xlu1 %v774_v22, %s4799_s17 }
  0x97   : > { %v405_v27 = vpop.permute.xlu0 %404  ;;  %v454_v28 = vpop.permute.xlu1 %453 }
  0x98   : > { %428 = vst.msk [vmem:[#allocation2 + $0xa0] sm:$0xff] %vm417_vm1, %v405_v27  ;;  %v4218_v27 = vld [vmem:[%s5085_s16 + $0x41] sm:$0xff] }
  0x99   : > { %487 = vst.msk [vmem:[#allocation2] sm:$0xff] %vm486_vm2, %v454_v28  ;;  %799 = vrot.lane.b32.xlu0 %v775_v25, %s4799_s17  ;;  %801 = vrot.lane.b32.xlu1 %v776_v26, %s4799_s17  ;;  %v4219_v28 = vld [vmem:[%s5085_s16 + $0x49] sm:$0xff] }
  0x9b   : > { %v456_v31 = vpop.permute.xlu0 %455  ;;  %v458_v32 = vpop.permute.xlu1 %457 }
  0x9c   : > { %488 = vst.msk [vmem:[#allocation2 + $0x10] sm:$0xff] %vm486_vm2, %v456_v31  ;;  %489 = vst.msk [vmem:[#allocation2 + $0x20] sm:$0xff] %vm486_vm2, %v458_v32  ;;  %v4220_v31 = vld [vmem:[%s5085_s16 + $0x51] sm:$0xff]  ;;  %v4221_v32 = vld [vmem:[%s5123_s20 + $0x1] sm:$0xff] }
  0x9d   : > { %803 = vrot.lane.b32.xlu0 %v777_v29, %s4799_s17  ;;  %805 = vrot.lane.b32.xlu1 %v778_v30, %s4799_s17 }
  0x9f   : > { %v460_v35 = vpop.permute.xlu0 %459  ;;  %v462_v36 = vpop.permute.xlu1 %461 }
  0xa0   : > { %490 = vst.msk [vmem:[#allocation2 + $0x30] sm:$0xff] %vm486_vm2, %v460_v35  ;;  %491 = vst.msk [vmem:[#allocation2 + $0x40] sm:$0xff] %vm486_vm2, %v462_v36  ;;  %v4222_v35 = vld [vmem:[%s5123_s20 + $0x9] sm:$0xff]  ;;  %v4223_v36 = vld [vmem:[%s5123_s20 + $0x11] sm:$0xff] }
  0xa1   : > { %807 = vrot.lane.b32.xlu0 %v779_v33, %s4799_s17  ;;  %809 = vrot.lane.b32.xlu1 %v780_v34, %s4799_s17 }
  0xa3   : > { %v464_v39 = vpop.permute.xlu0 %463  ;;  %v466_v40 = vpop.permute.xlu1 %465 }
  0xa4   : > { %492 = vst.msk [vmem:[#allocation2 + $0x50] sm:$0xff] %vm486_vm2, %v464_v39  ;;  %493 = vst.msk [vmem:[#allocation2 + $0x60] sm:$0xff] %vm486_vm2, %v466_v40  ;;  %v4224_v39 = vld [vmem:[%s5123_s20 + $0x19] sm:$0xff]  ;;  %v4225_v40 = vld [vmem:[%s5123_s20 + $0x21] sm:$0xff] }
  0xa5   : > { %811 = vrot.lane.b32.xlu0 %v781_v37, %s4799_s17  ;;  %813 = vrot.lane.b32.xlu1 %v782_v38, %s4799_s17 }
  0xa7   : > { %v468_v43 = vpop.permute.xlu0 %467  ;;  %v470_v44 = vpop.permute.xlu1 %469 }
  0xa8   : > { %494 = vst.msk [vmem:[#allocation2 + $0x70] sm:$0xff] %vm486_vm2, %v468_v43  ;;  %495 = vst.msk [vmem:[#allocation2 + $0x80] sm:$0xff] %vm486_vm2, %v470_v44  ;;  %v4226_v43 = vld [vmem:[%s5123_s20 + $0x29] sm:$0xff]  ;;  %v4227_v44 = vld [vmem:[%s5123_s20 + $0x31] sm:$0xff] }
  0xa9   : > { %815 = vrot.lane.b32.xlu0 %v783_v41, %s4799_s17  ;;  %863 = vrot.lane.b32.xlu1 %v841_v42, %s4800_s25 }
  0xab   : > { %v472_v47 = vpop.permute.xlu0 %471  ;;  %v474_v48 = vpop.permute.xlu1 %473 }
  0xac   : > { %496 = vst.msk [vmem:[#allocation2 + $0x90] sm:$0xff] %vm486_vm2, %v472_v47  ;;  %497 = vst.msk [vmem:[#allocation2 + $0xa0] sm:$0xff] %vm486_vm2, %v474_v48  ;;  %v4228_v47 = vld [vmem:[%s5123_s20 + $0x39] sm:$0xff]  ;;  %v4229_v48 = vld [vmem:[%s5123_s20 + $0x41] sm:$0xff] }
  0xad   : > { %865 = vrot.lane.b32.xlu0 %v842_v45, %s4800_s25  ;;  %867 = vrot.lane.b32.xlu1 %v843_v46, %s4800_s25 }
  0xaf   : > { %v522_v51 = vpop.permute.xlu0 %521  ;;  %v524_v52 = vpop.permute.xlu1 %523 }
  0xb0   : > { %555 = vst.msk [vmem:[#allocation2] sm:$0xff] %vm554_vm3, %v522_v51  ;;  %556 = vst.msk [vmem:[#allocation2 + $0x10] sm:$0xff] %vm554_vm3, %v524_v52  ;;  %v4230_v51 = vld [vmem:[%s5123_s20 + $0x49] sm:$0xff]  ;;  %v4231_v52 = vld [vmem:[%s5123_s20 + $0x51] sm:$0xff] }
  0xb1   : > { %869 = vrot.lane.b32.xlu0 %v844_v49, %s4800_s25  ;;  %871 = vrot.lane.b32.xlu1 %v845_v50, %s4800_s25 }
  0xb3   : > { %v526_v55 = vpop.permute.xlu0 %525  ;;  %v528_v56 = vpop.permute.xlu1 %527 }
  0xb4   : > { %557 = vst.msk [vmem:[#allocation2 + $0x20] sm:$0xff] %vm554_vm3, %v526_v55  ;;  %558 = vst.msk [vmem:[#allocation2 + $0x30] sm:$0xff] %vm554_vm3, %v528_v56  ;;  %v4232_v55 = vld [vmem:[%s5085_s16 + $0x2] sm:$0xff]  ;;  %v4233_v56 = vld [vmem:[%s5085_s16 + $0xa] sm:$0xff] }
  0xb5   : > { %873 = vrot.lane.b32.xlu0 %v846_v53, %s4800_s25  ;;  %875 = vrot.lane.b32.xlu1 %v847_v54, %s4800_s25 }
  0xb7   : > { %v530_v59 = vpop.permute.xlu0 %529  ;;  %v532_v60 = vpop.permute.xlu1 %531 }
  0xb8   : > { %559 = vst.msk [vmem:[#allocation2 + $0x40] sm:$0xff] %vm554_vm3, %v530_v59  ;;  %560 = vst.msk [vmem:[#allocation2 + $0x50] sm:$0xff] %vm554_vm3, %v532_v60  ;;  %v4234_v59 = vld [vmem:[%s5085_s16 + $0x12] sm:$0xff]  ;;  %v4235_v60 = vld [vmem:[%s5085_s16 + $0x1a] sm:$0xff] }
  0xb9   : > { %877 = vrot.lane.b32.xlu0 %v848_v57, %s4800_s25  ;;  %879 = vrot.lane.b32.xlu1 %v849_v58, %s4800_s25 }
  0xbb   : > { %v534_v63 = vpop.permute.xlu0 %533  ;;  %v536_v0 = vpop.permute.xlu1 %535 }
  0xbc   : > { %561 = vst.msk [vmem:[#allocation2 + $0x60] sm:$0xff] %vm554_vm3, %v534_v63  ;;  %562 = vst.msk [vmem:[#allocation2 + $0x70] sm:$0xff] %vm554_vm3, %v536_v0  ;;  %v4236_v63 = vld [vmem:[%s5085_s16 + $0x22] sm:$0xff]  ;;  %v4237_v0 = vld [vmem:[%s5085_s16 + $0x2a] sm:$0xff] }
  0xbd   : > { %881 = vrot.lane.b32.xlu0 %v850_v61, %s4800_s25  ;;  %883 = vrot.lane.b32.xlu1 %v851_v62, %s4800_s25 }
  0xbf   : > { %v538_v7 = vpop.permute.xlu0 %537  ;;  %v540_v8 = vpop.permute.xlu1 %539 }
  0xc0   : > { %563 = vst.msk [vmem:[#allocation2 + $0x80] sm:$0xff] %vm554_vm3, %v538_v7  ;;  %564 = vst.msk [vmem:[#allocation2 + $0x90] sm:$0xff] %vm554_vm3, %v540_v8  ;;  %v4238_v7 = vld [vmem:[%s5085_s16 + $0x32] sm:$0xff]  ;;  %v4239_v8 = vld [vmem:[%s5085_s16 + $0x3a] sm:$0xff] }
  0xc1   : > { %931 = vrot.lane.b32.xlu0 %v4210_v1, %s4801_s26  ;;  %933 = vrot.lane.b32.xlu1 %v4211_v2, %s4801_s26 }
  0xc3   : > { %v542_v15 = vpop.permute.xlu0 %541  ;;  %v591_v16 = vpop.permute.xlu1 %590 }
  0xc4   : > { %565 = vst.msk [vmem:[#allocation2 + $0xa0] sm:$0xff] %vm554_vm3, %v542_v15  ;;  %v4240_v15 = vld [vmem:[%s5085_s16 + $0x42] sm:$0xff] }
  0xc5   : > { %624 = vst.msk [vmem:[#allocation2] sm:$0xff] %vm623_vm4, %v591_v16  ;;  %935 = vrot.lane.b32.xlu0 %v4212_v11, %s4801_s26  ;;  %937 = vrot.lane.b32.xlu1 %v4213_v12, %s4801_s26  ;;  %v4241_v16 = vld [vmem:[%s5085_s16 + $0x4a] sm:$0xff] }
  0xc7   : > { %v593_v21 = vpop.permute.xlu0 %592  ;;  %v595_v22 = vpop.permute.xlu1 %594 }
  0xc8   : > { %625 = vst.msk [vmem:[#allocation2 + $0x10] sm:$0xff] %vm623_vm4, %v593_v21  ;;  %626 = vst.msk [vmem:[#allocation2 + $0x20] sm:$0xff] %vm623_vm4, %v595_v22  ;;  %v4242_v21 = vld [vmem:[%s5085_s16 + $0x52] sm:$0xff]  ;;  %v4243_v22 = vld [vmem:[%s5123_s20 + $0x2] sm:$0xff] }
  0xc9   : > { %939 = vrot.lane.b32.xlu0 %v4214_v19, %s4801_s26  ;;  %941 = vrot.lane.b32.xlu1 %v4215_v20, %s4801_s26 }
  0xcb   : > { %v597_v25 = vpop.permute.xlu0 %596  ;;  %v599_v26 = vpop.permute.xlu1 %598 }
  0xcc   : > { %627 = vst.msk [vmem:[#allocation2 + $0x30] sm:$0xff] %vm623_vm4, %v597_v25  ;;  %628 = vst.msk [vmem:[#allocation2 + $0x40] sm:$0xff] %vm623_vm4, %v599_v26  ;;  %v4244_v25 = vld [vmem:[%s5123_s20 + $0xa] sm:$0xff]  ;;  %v4245_v26 = vld [vmem:[%s5123_s20 + $0x12] sm:$0xff] }
  0xcd   : > { %943 = vrot.lane.b32.xlu0 %v4216_v23, %s4801_s26  ;;  %945 = vrot.lane.b32.xlu1 %v4217_v24, %s4801_s26 }
  0xcf   : > { %v601_v29 = vpop.permute.xlu0 %600  ;;  %v603_v30 = vpop.permute.xlu1 %602 }
  0xd0   : > { %629 = vst.msk [vmem:[#allocation2 + $0x50] sm:$0xff] %vm623_vm4, %v601_v29  ;;  %630 = vst.msk [vmem:[#allocation2 + $0x60] sm:$0xff] %vm623_vm4, %v603_v30  ;;  %v4246_v29 = vld [vmem:[%s5123_s20 + $0x1a] sm:$0xff]  ;;  %v4247_v30 = vld [vmem:[%s5123_s20 + $0x22] sm:$0xff] }
  0xd1   : > { %947 = vrot.lane.b32.xlu0 %v4218_v27, %s4801_s26  ;;  %949 = vrot.lane.b32.xlu1 %v4219_v28, %s4801_s26 }
  0xd3   : > { %v605_v33 = vpop.permute.xlu0 %604  ;;  %v607_v34 = vpop.permute.xlu1 %606 }
  0xd4   : > { %631 = vst.msk [vmem:[#allocation2 + $0x70] sm:$0xff] %vm623_vm4, %v605_v33  ;;  %632 = vst.msk [vmem:[#allocation2 + $0x80] sm:$0xff] %vm623_vm4, %v607_v34  ;;  %v4248_v33 = vld [vmem:[%s5123_s20 + $0x2a] sm:$0xff]  ;;  %v4249_v34 = vld [vmem:[%s5123_s20 + $0x32] sm:$0xff] }
  0xd5   : > { %951 = vrot.lane.b32.xlu0 %v4220_v31, %s4801_s26  ;;  %999 = vrot.lane.b32.xlu1 %v4221_v32, %s4802_s27 }
  0xd7   : > { %v609_v37 = vpop.permute.xlu0 %608  ;;  %v611_v38 = vpop.permute.xlu1 %610 }
  0xd8   : > { %633 = vst.msk [vmem:[#allocation2 + $0x90] sm:$0xff] %vm623_vm4, %v609_v37  ;;  %634 = vst.msk [vmem:[#allocation2 + $0xa0] sm:$0xff] %vm623_vm4, %v611_v38  ;;  %v4250_v37 = vld [vmem:[%s5123_s20 + $0x3a] sm:$0xff]  ;;  %v4251_v38 = vld [vmem:[%s5123_s20 + $0x42] sm:$0xff] }
  0xd9   : > { %1001 = vrot.lane.b32.xlu0 %v4222_v35, %s4802_s27  ;;  %1003 = vrot.lane.b32.xlu1 %v4223_v36, %s4802_s27 }
  0xdb   : > { %v659_v41 = vpop.permute.xlu0 %658  ;;  %v661_v42 = vpop.permute.xlu1 %660 }
  0xdc   : > { %692 = vst.msk [vmem:[#allocation2] sm:$0xff] %vm691_vm5, %v659_v41  ;;  %693 = vst.msk [vmem:[#allocation2 + $0x10] sm:$0xff] %vm691_vm5, %v661_v42  ;;  %v4252_v41 = vld [vmem:[%s5123_s20 + $0x4a] sm:$0xff]  ;;  %v4253_v42 = vld [vmem:[%s5123_s20 + $0x52] sm:$0xff] }
  0xdd   : > { %1005 = vrot.lane.b32.xlu0 %v4224_v39, %s4802_s27  ;;  %1007 = vrot.lane.b32.xlu1 %v4225_v40, %s4802_s27 }
  0xdf   : > { %v663_v45 = vpop.permute.xlu0 %662  ;;  %v665_v46 = vpop.permute.xlu1 %664 }
  0xe0   : > { %694 = vst.msk [vmem:[#allocation2 + $0x20] sm:$0xff] %vm691_vm5, %v663_v45  ;;  %695 = vst.msk [vmem:[#allocation2 + $0x30] sm:$0xff] %vm691_vm5, %v665_v46  ;;  %v4254_v45 = vld [vmem:[%s5085_s16 + $0x3] sm:$0xff]  ;;  %v5299_v46 = vld [vmem:[%s5085_s16 + $0xb] sm:$0xff] }
  0xe1   : > { %1009 = vrot.lane.b32.xlu0 %v4226_v43, %s4802_s27  ;;  %1011 = vrot.lane.b32.xlu1 %v4227_v44, %s4802_s27 }
  0xe3   : > { %v667_v49 = vpop.permute.xlu0 %666  ;;  %v669_v50 = vpop.permute.xlu1 %668 }
  0xe4   : > { %696 = vst.msk [vmem:[#allocation2 + $0x40] sm:$0xff] %vm691_vm5, %v667_v49  ;;  %697 = vst.msk [vmem:[#allocation2 + $0x50] sm:$0xff] %vm691_vm5, %v669_v50  ;;  %v5307_v49 = vld [vmem:[%s5085_s16 + $0x13] sm:$0xff]  ;;  %v5310_v50 = vld [vmem:[%s5085_s16 + $0x1b] sm:$0xff] }
  0xe5   : > { %1013 = vrot.lane.b32.xlu0 %v4228_v47, %s4802_s27  ;;  %1015 = vrot.lane.b32.xlu1 %v4229_v48, %s4802_s27 }
  0xe7   : > { %v671_v53 = vpop.permute.xlu0 %670  ;;  %v673_v54 = vpop.permute.xlu1 %672 }
  0xe8   : > { %698 = vst.msk [vmem:[#allocation2 + $0x60] sm:$0xff] %vm691_vm5, %v671_v53  ;;  %699 = vst.msk [vmem:[#allocation2 + $0x70] sm:$0xff] %vm691_vm5, %v673_v54  ;;  %v5319_v53 = vld [vmem:[%s5085_s16 + $0x23] sm:$0xff]  ;;  %v5322_v54 = vld [vmem:[%s5085_s16 + $0x2b] sm:$0xff] }
  0xe9   : > { %1017 = vrot.lane.b32.xlu0 %v4230_v51, %s4802_s27  ;;  %1019 = vrot.lane.b32.xlu1 %v4231_v52, %s4802_s27 }
  0xeb   : > { %v675_v57 = vpop.permute.xlu0 %674  ;;  %v677_v58 = vpop.permute.xlu1 %676 }
  0xec   : > { %700 = vst.msk [vmem:[#allocation2 + $0x80] sm:$0xff] %vm691_vm5, %v675_v57  ;;  %701 = vst.msk [vmem:[#allocation2 + $0x90] sm:$0xff] %vm691_vm5, %v677_v58  ;;  %v5331_v57 = vld [vmem:[%s5085_s16 + $0x33] sm:$0xff]  ;;  %v5334_v58 = vld [vmem:[%s5085_s16 + $0x3b] sm:$0xff] }
  0xed   : > { %1067 = vrot.lane.b32.xlu0 %v4232_v55, %s4803_s30  ;;  %1069 = vrot.lane.b32.xlu1 %v4233_v56, %s4803_s30 }
  0xef   : > { %v679_v61 = vpop.permute.xlu0 %678  ;;  %v728_v62 = vpop.permute.xlu1 %727 }
  0xf0   : > { %702 = vst.msk [vmem:[#allocation2 + $0xa0] sm:$0xff] %vm691_vm5, %v679_v61  ;;  %v5343_v61 = vld [vmem:[%s5085_s16 + $0x43] sm:$0xff] }
  0xf1   : > { %761 = vst.msk [vmem:[#allocation2] sm:$0xff] %vm760_vm6, %v728_v62  ;;  %1071 = vrot.lane.b32.xlu0 %v4234_v59, %s4803_s30  ;;  %1073 = vrot.lane.b32.xlu1 %v4235_v60, %s4803_s30  ;;  %v5346_v62 = vld [vmem:[%s5085_s16 + $0x4b] sm:$0xff] }
  0xf3   : > { %v730_v1 = vpop.permute.xlu0 %729  ;;  %v732_v2 = vpop.permute.xlu1 %731 }
  0xf4   : > { %762 = vst.msk [vmem:[#allocation2 + $0x10] sm:$0xff] %vm760_vm6, %v730_v1  ;;  %763 = vst.msk [vmem:[#allocation2 + $0x20] sm:$0xff] %vm760_vm6, %v732_v2  ;;  %v5355_v1 = vld [vmem:[%s5085_s16 + $0x53] sm:$0xff] }
  0xf5   : > { %1075 = vrot.lane.b32.xlu0 %v4236_v63, %s4803_s30  ;;  %1077 = vrot.lane.b32.xlu1 %v4237_v0, %s4803_s30 }
  0xf7   : > { %v734_v11 = vpop.permute.xlu0 %733  ;;  %v736_v12 = vpop.permute.xlu1 %735 }
  0xf8   : > { %764 = vst.msk [vmem:[#allocation2 + $0x30] sm:$0xff] %vm760_vm6, %v734_v11  ;;  %765 = vst.msk [vmem:[#allocation2 + $0x40] sm:$0xff] %vm760_vm6, %v736_v12 }
  0xf9   : > { %1079 = vrot.lane.b32.xlu0 %v4238_v7, %s4803_s30  ;;  %1081 = vrot.lane.b32.xlu1 %v4239_v8, %s4803_s30 }
  0xfb   : > { %v738_v19 = vpop.permute.xlu0 %737  ;;  %v740_v20 = vpop.permute.xlu1 %739 }
  0xfc   : > { %766 = vst.msk [vmem:[#allocation2 + $0x50] sm:$0xff] %vm760_vm6, %v738_v19  ;;  %767 = vst.msk [vmem:[#allocation2 + $0x60] sm:$0xff] %vm760_vm6, %v740_v20  ;;  %v4277_v19 = vld [vmem:[%s4887_s28 + $0x13] sm:$0xff] }
  0xfd   : > { %1083 = vrot.lane.b32.xlu0 %v4240_v15, %s4803_s30  ;;  %1085 = vrot.lane.b32.xlu1 %v4241_v16, %s4803_s30 }
  0xff   : > { %v742_v23 = vpop.permute.xlu0 %741  ;;  %v744_v24 = vpop.permute.xlu1 %743 }
 0x100   : > { %768 = vst.msk [vmem:[#allocation2 + $0x70] sm:$0xff] %vm760_vm6, %v742_v23  ;;  %769 = vst.msk [vmem:[#allocation2 + $0x80] sm:$0xff] %vm760_vm6, %v744_v24  ;;  %v4280_v23 = vld [vmem:[%s4887_s28 + $0x2b] sm:$0xff]  ;;  %v4281_v24 = vld [vmem:[%s4887_s28 + $0x33] sm:$0xff] }
 0x101   : > { %1087 = vrot.lane.b32.xlu0 %v4242_v21, %s4803_s30  ;;  %1135 = vrot.lane.b32.xlu1 %v4243_v22, %s4804_s7 }
 0x103   : > { %v746_v27 = vpop.permute.xlu0 %745  ;;  %v748_v28 = vpop.permute.xlu1 %747 }
 0x104   : > { %770 = vst.msk [vmem:[#allocation2 + $0x90] sm:$0xff] %vm760_vm6, %v746_v27  ;;  %771 = vst.msk [vmem:[#allocation2 + $0xa0] sm:$0xff] %vm760_vm6, %v748_v28  ;;  %v4282_v27 = vld [vmem:[%s4887_s28 + $0x3b] sm:$0xff]  ;;  %v4283_v28 = vld [vmem:[%s4887_s28 + $0x43] sm:$0xff] }
 0x105   : > { %1137 = vrot.lane.b32.xlu0 %v4244_v25, %s4804_s7  ;;  %1139 = vrot.lane.b32.xlu1 %v4245_v26, %s4804_s7 }
 0x107   : > { %v796_v31 = vpop.permute.xlu0 %795  ;;  %v798_v32 = vpop.permute.xlu1 %797 }
 0x108   : > { %829 = vst.msk [vmem:[#allocation2] sm:$0xff] %vm828_vm7, %v796_v31  ;;  %830 = vst.msk [vmem:[#allocation2 + $0x10] sm:$0xff] %vm828_vm7, %v798_v32  ;;  %v4284_v31 = vld [vmem:[%s4887_s28 + $0x4b] sm:$0xff]  ;;  %v4285_v32 = vld [vmem:[%s4887_s28 + $0x53] sm:$0xff] }
 0x109   : > { %1141 = vrot.lane.b32.xlu0 %v4246_v29, %s4804_s7  ;;  %1143 = vrot.lane.b32.xlu1 %v4247_v30, %s4804_s7 }
 0x10b   : > { %v800_v35 = vpop.permute.xlu0 %799  ;;  %v802_v36 = vpop.permute.xlu1 %801 }
 0x10c   : > { %831 = vst.msk [vmem:[#allocation2 + $0x20] sm:$0xff] %vm828_vm7, %v800_v35  ;;  %832 = vst.msk [vmem:[#allocation2 + $0x30] sm:$0xff] %vm828_vm7, %v802_v36  ;;  %v4286_v35 = vld [vmem:[%s4887_s28 + $0x5b] sm:$0xff]  ;;  %v4287_v36 = vld [vmem:[%s4911_s8 + $0xc] sm:$0xff] }
 0x10d   : > { %1145 = vrot.lane.b32.xlu0 %v4248_v33, %s4804_s7  ;;  %1147 = vrot.lane.b32.xlu1 %v4249_v34, %s4804_s7 }
 0x10f   : > { %v804_v39 = vpop.permute.xlu0 %803  ;;  %v806_v40 = vpop.permute.xlu1 %805 }
 0x110   : > { %833 = vst.msk [vmem:[#allocation2 + $0x40] sm:$0xff] %vm828_vm7, %v804_v39  ;;  %834 = vst.msk [vmem:[#allocation2 + $0x50] sm:$0xff] %vm828_vm7, %v806_v40  ;;  %v4288_v39 = vld [vmem:[%s4911_s8 + $0x14] sm:$0xff]  ;;  %v4289_v40 = vld [vmem:[%s4911_s8 + $0x1c] sm:$0xff] }
 0x111   : > { %1149 = vrot.lane.b32.xlu0 %v4250_v37, %s4804_s7  ;;  %1151 = vrot.lane.b32.xlu1 %v4251_v38, %s4804_s7 }
 0x113   : > { %v808_v43 = vpop.permute.xlu0 %807  ;;  %v810_v44 = vpop.permute.xlu1 %809 }
 0x114   : > { %835 = vst.msk [vmem:[#allocation2 + $0x60] sm:$0xff] %vm828_vm7, %v808_v43  ;;  %836 = vst.msk [vmem:[#allocation2 + $0x70] sm:$0xff] %vm828_vm7, %v810_v44  ;;  %v4290_v43 = vld [vmem:[%s4911_s8 + $0x24] sm:$0xff]  ;;  %v4291_v44 = vld [vmem:[%s4911_s8 + $0x2c] sm:$0xff] }
 0x115   : > { %1153 = vrot.lane.b32.xlu0 %v4252_v41, %s4804_s7  ;;  %1155 = vrot.lane.b32.xlu1 %v4253_v42, %s4804_s7 }
 0x117   : > { %v812_v47 = vpop.permute.xlu0 %811  ;;  %v814_v48 = vpop.permute.xlu1 %813 }
 0x118   : > { %837 = vst.msk [vmem:[#allocation2 + $0x80] sm:$0xff] %vm828_vm7, %v812_v47  ;;  %838 = vst.msk [vmem:[#allocation2 + $0x90] sm:$0xff] %vm828_vm7, %v814_v48  ;;  %v4292_v48 = vld [vmem:[%s4911_s8 + $0x34] sm:$0xff] }
 0x119   : > { %1203 = vrot.lane.b32.xlu0 %v4254_v45, %s4805_s14  ;;  %1205 = vrot.lane.b32.xlu1 %v5299_v46, %s4805_s14 }
 0x11b   : > { %v816_v51 = vpop.permute.xlu0 %815  ;;  %v864_v52 = vpop.permute.xlu1 %863 }
 0x11c   : > { %839 = vst.msk [vmem:[#allocation2 + $0xa0] sm:$0xff] %vm828_vm7, %v816_v51  ;;  %v4293_v51 = vld [vmem:[%s4911_s8 + $0x3c] sm:$0xff] }
 0x11d   : > { %897 = vst.msk [vmem:[#allocation2] sm:$0xff] %vm896_vm8, %v864_v52  ;;  %1207 = vrot.lane.b32.xlu0 %v5307_v49, %s4805_s14  ;;  %1209 = vrot.lane.b32.xlu1 %v5310_v50, %s4805_s14 }
 0x11f   : > { %v866_v55 = vpop.permute.xlu0 %865  ;;  %v868_v56 = vpop.permute.xlu1 %867 }
 0x120   : > { %898 = vst.msk [vmem:[#allocation2 + $0x10] sm:$0xff] %vm896_vm8, %v866_v55  ;;  %899 = vst.msk [vmem:[#allocation2 + $0x20] sm:$0xff] %vm896_vm8, %v868_v56  ;;  %v4294_v56 = vld [vmem:[%s4911_s8 + $0x44] sm:$0xff] }
 0x121   : > { %1211 = vrot.lane.b32.xlu0 %v5319_v53, %s4805_s14  ;;  %1213 = vrot.lane.b32.xlu1 %v5322_v54, %s4805_s14 }
 0x123   : > { %v870_v59 = vpop.permute.xlu0 %869  ;;  %v872_v60 = vpop.permute.xlu1 %871 }
 0x124   : > { %900 = vst.msk [vmem:[#allocation2 + $0x30] sm:$0xff] %vm896_vm8, %v870_v59  ;;  %901 = vst.msk [vmem:[#allocation2 + $0x40] sm:$0xff] %vm896_vm8, %v872_v60  ;;  %v4295_v59 = vld [vmem:[%s4911_s8 + $0x4c] sm:$0xff] }
 0x125   : > { %1215 = vrot.lane.b32.xlu0 %v5331_v57, %s4805_s14  ;;  %1217 = vrot.lane.b32.xlu1 %v5334_v58, %s4805_s14 }
 0x127   : > { %v874_v63 = vpop.permute.xlu0 %873  ;;  %v876_v0 = vpop.permute.xlu1 %875 }
 0x128   : > { %902 = vst.msk [vmem:[#allocation2 + $0x50] sm:$0xff] %vm896_vm8, %v874_v63  ;;  %903 = vst.msk [vmem:[#allocation2 + $0x60] sm:$0xff] %vm896_vm8, %v876_v0  ;;  %v4296_v0 = vld [vmem:[%s4911_s8 + $0x54] sm:$0xff] }
 0x129   : > { %1219 = vrot.lane.b32.xlu0 %v5343_v61, %s4805_s14  ;;  %1221 = vrot.lane.b32.xlu1 %v5346_v62, %s4805_s14 }
 0x12b   : > { %v878_v2 = vpop.permute.xlu0 %877  ;;  %v880_v7 = vpop.permute.xlu1 %879 }
 0x12c   : > { %904 = vst.msk [vmem:[#allocation2 + $0x70] sm:$0xff] %vm896_vm8, %v878_v2  ;;  %905 = vst.msk [vmem:[#allocation2 + $0x80] sm:$0xff] %vm896_vm8, %v880_v7  ;;  %v4297_v2 = vld [vmem:[%s4911_s8 + $0x5c] sm:$0xff] }
 0x12d   : > { %1223 = vrot.lane.b32.xlu0 %v5355_v1, %s4805_s14  ;;  %1274 = vrot.lane.b32.xlu1 %v5030_v3, %s4806_s15 }
 0x12f   : > { %v882_v8 = vpop.permute.xlu0 %881  ;;  %v884_v11 = vpop.permute.xlu1 %883 }
 0x130   : > { %906 = vst.msk [vmem:[#allocation2 + $0x90] sm:$0xff] %vm896_vm8, %v882_v8  ;;  %907 = vst.msk [vmem:[#allocation2 + $0xa0] sm:$0xff] %vm896_vm8, %v884_v11  ;;  %v4298_v11 = vld [vmem:[%s4887_s28 + $0xc] sm:$0xff] }
 0x131   : > { %1276 = vrot.lane.b32.xlu0 %v5033_v4, %s4806_s15  ;;  %1278 = vrot.lane.b32.xlu1 %v5040_v5, %s4806_s15 }
 0x133   : > { %v932_v12 = vpop.permute.xlu0 %931  ;;  %v934_v15 = vpop.permute.xlu1 %933 }
 0x134   : > { %965 = vst.msk [vmem:[#allocation2] sm:$0xff] %vm964_vm9, %v932_v12  ;;  %966 = vst.msk [vmem:[#allocation2 + $0x10] sm:$0xff] %vm964_vm9, %v934_v15  ;;  %v4299_v12 = vld [vmem:[%s4887_s28 + $0x14] sm:$0xff] }
 0x135   : > { %1280 = vrot.lane.b32.xlu0 %v5043_v6, %s4806_s15  ;;  %1282 = vrot.lane.b32.xlu1 %v5052_v9, %s4806_s15  ;;  %v4275_v6 = vld [vmem:[%s4911_s8 + $0x5b] sm:$0xff] }
 0x137   : > { %v936_v3 = vpop.permute.xlu0 %935  ;;  %v938_v16 = vpop.permute.xlu1 %937 }
 0x138   : > { %967 = vst.msk [vmem:[#allocation2 + $0x20] sm:$0xff] %vm964_vm9, %v936_v3  ;;  %968 = vst.msk [vmem:[#allocation2 + $0x30] sm:$0xff] %vm964_vm9, %v938_v16  ;;  %v4300_v16 = vld [vmem:[%s4887_s28 + $0x1c] sm:$0xff] }
 0x139   : > { %1284 = vrot.lane.b32.xlu0 %v5055_v10, %s4806_s15  ;;  %1286 = vrot.lane.b32.xlu1 %v5064_v13, %s4806_s15  ;;  %v4276_v13 = vld [vmem:[%s4887_s28 + $0xb] sm:$0xff] }
 0x13b   : > { %v940_v4 = vpop.permute.xlu0 %939  ;;  %v942_v5 = vpop.permute.xlu1 %941 }
 0x13c   : > { %969 = vst.msk [vmem:[#allocation2 + $0x40] sm:$0xff] %vm964_vm9, %v940_v4  ;;  %970 = vst.msk [vmem:[#allocation2 + $0x50] sm:$0xff] %vm964_vm9, %v942_v5  ;;  %v4301_v4 = vld [vmem:[%s4887_s28 + $0x24] sm:$0xff] }
 0x13d   : > { %1288 = vrot.lane.b32.xlu0 %v5067_v14, %s4806_s15  ;;  %1290 = vrot.lane.b32.xlu1 %v5076_v17, %s4806_s15  ;;  %v4278_v17 = vld [vmem:[%s4887_s28 + $0x1b] sm:$0xff] }
 0x13f   : > { %v944_v9 = vpop.permute.xlu0 %943  ;;  %v946_v10 = vpop.permute.xlu1 %945 }
 0x140   : > { %971 = vst.msk [vmem:[#allocation2 + $0x60] sm:$0xff] %vm964_vm9, %v944_v9  ;;  %972 = vst.msk [vmem:[#allocation2 + $0x70] sm:$0xff] %vm964_vm9, %v946_v10  ;;  %v4302_v9 = vld [vmem:[%s4887_s28 + $0x2c] sm:$0xff]  ;;  %v4303_v10 = vld [vmem:[%s4887_s28 + $0x34] sm:$0xff] }
 0x141   : > { %1292 = vrot.lane.b32.xlu0 %v5079_v18, %s4806_s15  ;;  %1294 = vrot.lane.b32.xlu1 %v4275_v6, %s4806_s15  ;;  %v4279_v18 = vld [vmem:[%s4887_s28 + $0x23] sm:$0xff] }
 0x143   : > { %v948_v14 = vpop.permute.xlu0 %947  ;;  %v950_v20 = vpop.permute.xlu1 %949 }
 0x144   : > { %973 = vst.msk [vmem:[#allocation2 + $0x80] sm:$0xff] %vm964_vm9, %v948_v14  ;;  %974 = vst.msk [vmem:[#allocation2 + $0x90] sm:$0xff] %vm964_vm9, %v950_v20  ;;  %v4304_v14 = vld [vmem:[%s4887_s28 + $0x3c] sm:$0xff]  ;;  %v4305_v20 = vld [vmem:[%s4887_s28 + $0x44] sm:$0xff] }
 0x145   : > { %1342 = vrot.lane.b32.xlu0 %v4276_v13, %s6761_s18  ;;  %1344 = vrot.lane.b32.xlu1 %v4277_v19, %s6761_s18 }
 0x147   : > { %v952_v21 = vpop.permute.xlu0 %951  ;;  %v1000_v22 = vpop.permute.xlu1 %999 }
 0x148   : > { %975 = vst.msk [vmem:[#allocation2 + $0xa0] sm:$0xff] %vm964_vm9, %v952_v21  ;;  %v4306_v21 = vld [vmem:[%s4887_s28 + $0x4c] sm:$0xff] }
 0x149   : > { %1033 = vst.msk [vmem:[#allocation2] sm:$0xff] %vm1032_vm10, %v1000_v22  ;;  %1346 = vrot.lane.b32.xlu0 %v4278_v17, %s6761_s18  ;;  %1348 = vrot.lane.b32.xlu1 %v4279_v18, %s6761_s18  ;;  %v4307_v22 = vld [vmem:[%s4887_s28 + $0x54] sm:$0xff] }
 0x14b   : > { %v1002_v25 = vpop.permute.xlu0 %1001  ;;  %v1004_v26 = vpop.permute.xlu1 %1003 }
 0x14c   : > { %1034 = vst.msk [vmem:[#allocation2 + $0x10] sm:$0xff] %vm1032_vm10, %v1002_v25  ;;  %1035 = vst.msk [vmem:[#allocation2 + $0x20] sm:$0xff] %vm1032_vm10, %v1004_v26  ;;  %v4308_v25 = vld [vmem:[%s4887_s28 + $0x5c] sm:$0xff]  ;;  %v4309_v26 = vld [vmem:[%s4911_s8 + $0xd] sm:$0xff] }
 0x14d   : > { %1350 = vrot.lane.b32.xlu0 %v4280_v23, %s6761_s18  ;;  %1352 = vrot.lane.b32.xlu1 %v4281_v24, %s6761_s18 }
 0x14f   : > { %v1006_v29 = vpop.permute.xlu0 %1005  ;;  %v1008_v30 = vpop.permute.xlu1 %1007 }
 0x150   : > { %1036 = vst.msk [vmem:[#allocation2 + $0x30] sm:$0xff] %vm1032_vm10, %v1006_v29  ;;  %1037 = vst.msk [vmem:[#allocation2 + $0x40] sm:$0xff] %vm1032_vm10, %v1008_v30  ;;  %v4310_v29 = vld [vmem:[%s4911_s8 + $0x15] sm:$0xff]  ;;  %v4311_v30 = vld [vmem:[%s4911_s8 + $0x1d] sm:$0xff] }
 0x151   : > { %1354 = vrot.lane.b32.xlu0 %v4282_v27, %s6761_s18  ;;  %1356 = vrot.lane.b32.xlu1 %v4283_v28, %s6761_s18 }
 0x153   : > { %v1010_v33 = vpop.permute.xlu0 %1009  ;;  %v1012_v34 = vpop.permute.xlu1 %1011 }
 0x154   : > { %1038 = vst.msk [vmem:[#allocation2 + $0x50] sm:$0xff] %vm1032_vm10, %v1010_v33  ;;  %1039 = vst.msk [vmem:[#allocation2 + $0x60] sm:$0xff] %vm1032_vm10, %v1012_v34  ;;  %v4312_v33 = vld [vmem:[%s4911_s8 + $0x25] sm:$0xff]  ;;  %v4313_v34 = vld [vmem:[%s4911_s8 + $0x2d] sm:$0xff] }
 0x155   : > { %1358 = vrot.lane.b32.xlu0 %v4284_v31, %s6761_s18  ;;  %1360 = vrot.lane.b32.xlu1 %v4285_v32, %s6761_s18 }
 0x157   : > { %v1014_v37 = vpop.permute.xlu0 %1013  ;;  %v1016_v38 = vpop.permute.xlu1 %1015 }
 0x158   : > { %1040 = vst.msk [vmem:[#allocation2 + $0x70] sm:$0xff] %vm1032_vm10, %v1014_v37  ;;  %1041 = vst.msk [vmem:[#allocation2 + $0x80] sm:$0xff] %vm1032_vm10, %v1016_v38  ;;  %v4314_v37 = vld [vmem:[%s4911_s8 + $0x35] sm:$0xff]  ;;  %v4315_v38 = vld [vmem:[%s4911_s8 + $0x3d] sm:$0xff] }
 0x159   : > { %1362 = vrot.lane.b32.xlu0 %v4286_v35, %s6761_s18  ;;  %1411 = vrot.lane.b32.xlu1 %v4287_v36, %s6763_s19  ;;  %s4809_s18 = smov 68  }
 0x15b   : > { %v1018_v41 = vpop.permute.xlu0 %1017  ;;  %v1020_v42 = vpop.permute.xlu1 %1019 }
 0x15c   : > { %1042 = vst.msk [vmem:[#allocation2 + $0x90] sm:$0xff] %vm1032_vm10, %v1018_v41  ;;  %1043 = vst.msk [vmem:[#allocation2 + $0xa0] sm:$0xff] %vm1032_vm10, %v1020_v42  ;;  %v4316_v41 = vld [vmem:[%s4911_s8 + $0x45] sm:$0xff]  ;;  %v4317_v42 = vld [vmem:[%s4911_s8 + $0x4d] sm:$0xff] }
 0x15d   : > { %1413 = vrot.lane.b32.xlu0 %v4288_v39, %s6763_s19  ;;  %1415 = vrot.lane.b32.xlu1 %v4289_v40, %s6763_s19 }
 0x15f   : > { %v1068_v45 = vpop.permute.xlu0 %1067  ;;  %v1070_v47 = vpop.permute.xlu1 %1069 }
 0x160   : > { %1101 = vst.msk [vmem:[#allocation2] sm:$0xff] %vm1100_vm11, %v1068_v45  ;;  %1102 = vst.msk [vmem:[#allocation2 + $0x10] sm:$0xff] %vm1100_vm11, %v1070_v47  ;;  %v4318_v45 = vld [vmem:[%s4911_s8 + $0x55] sm:$0xff]  ;;  %v4319_v47 = vld [vmem:[%s4911_s8 + $0x5d] sm:$0xff] }
 0x161   : > { %1417 = vrot.lane.b32.xlu0 %v4290_v43, %s6763_s19  ;;  %1419 = vrot.lane.b32.xlu1 %v4291_v44, %s6763_s19 }
 0x163   : > { %v1072_v52 = vpop.permute.xlu0 %1071  ;;  %v1074_v55 = vpop.permute.xlu1 %1073 }
 0x164   : > { %1103 = vst.msk [vmem:[#allocation2 + $0x20] sm:$0xff] %vm1100_vm11, %v1072_v52  ;;  %1104 = vst.msk [vmem:[#allocation2 + $0x30] sm:$0xff] %vm1100_vm11, %v1074_v55  ;;  %v4320_v52 = vld [vmem:[%s4887_s28 + $0xd] sm:$0xff]  ;;  %v4321_v55 = vld [vmem:[%s4887_s28 + $0x15] sm:$0xff] }
 0x165   : > { %1421 = vrot.lane.b32.xlu0 %v4292_v48, %s6763_s19  ;;  %1423 = vrot.lane.b32.xlu1 %v4293_v51, %s6763_s19 }
 0x167   : > { %v1076_v60 = vpop.permute.xlu0 %1075  ;;  %v1078_v63 = vpop.permute.xlu1 %1077 }
 0x168   : > { %1105 = vst.msk [vmem:[#allocation2 + $0x40] sm:$0xff] %vm1100_vm11, %v1076_v60  ;;  %1106 = vst.msk [vmem:[#allocation2 + $0x50] sm:$0xff] %vm1100_vm11, %v1078_v63  ;;  %v4322_v60 = vld [vmem:[%s4887_s28 + $0x1d] sm:$0xff]  ;;  %v4323_v63 = vld [vmem:[%s4887_s28 + $0x25] sm:$0xff] }
 0x169   : > { %1425 = vrot.lane.b32.xlu0 %v4294_v56, %s6763_s19  ;;  %1427 = vrot.lane.b32.xlu1 %v4295_v59, %s6763_s19 }
 0x16b   : > { %v1080_v7 = vpop.permute.xlu0 %1079  ;;  %v1082_v8 = vpop.permute.xlu1 %1081 }
 0x16c   : > { %1107 = vst.msk [vmem:[#allocation2 + $0x60] sm:$0xff] %vm1100_vm11, %v1080_v7  ;;  %1108 = vst.msk [vmem:[#allocation2 + $0x70] sm:$0xff] %vm1100_vm11, %v1082_v8  ;;  %v4324_v7 = vld [vmem:[%s4887_s28 + $0x2d] sm:$0xff]  ;;  %v4325_v8 = vld [vmem:[%s4887_s28 + $0x35] sm:$0xff] }
 0x16d   : > { %1429 = vrot.lane.b32.xlu0 %v4296_v0, %s6763_s19  ;;  %1431 = vrot.lane.b32.xlu1 %v4297_v2, %s6763_s19  ;;  %s4810_s19 = smov 72  }
 0x16f   : > { %v1084_v15 = vpop.permute.xlu0 %1083  ;;  %v1086_v3 = vpop.permute.xlu1 %1085 }
 0x170   : > { %1109 = vst.msk [vmem:[#allocation2 + $0x80] sm:$0xff] %vm1100_vm11, %v1084_v15  ;;  %1110 = vst.msk [vmem:[#allocation2 + $0x90] sm:$0xff] %vm1100_vm11, %v1086_v3  ;;  %v4326_v15 = vld [vmem:[%s4887_s28 + $0x3d] sm:$0xff]  ;;  %v4327_v3 = vld [vmem:[%s4887_s28 + $0x45] sm:$0xff] }
 0x171   : > { %1479 = vrot.lane.b32.xlu0 %v4298_v11, %s4809_s18  ;;  %1481 = vrot.lane.b32.xlu1 %v4299_v12, %s4809_s18 }
 0x173   : > { %v1088_v5 = vpop.permute.xlu0 %1087  ;;  %v1136_v6 = vpop.permute.xlu1 %1135 }
 0x174   : > { %1111 = vst.msk [vmem:[#allocation2 + $0xa0] sm:$0xff] %vm1100_vm11, %v1088_v5  ;;  %v4328_v5 = vld [vmem:[%s4887_s28 + $0x4d] sm:$0xff] }
 0x175   : > { %1169 = vst.msk [vmem:[#allocation2] sm:$0xff] %vm1168_vm12, %v1136_v6  ;;  %1483 = vrot.lane.b32.xlu0 %v4300_v16, %s4809_s18  ;;  %1485 = vrot.lane.b32.xlu1 %v4301_v4, %s4809_s18  ;;  %v4329_v6 = vld [vmem:[%s4887_s28 + $0x55] sm:$0xff] }
 0x177   : > { %v1138_v13 = vpop.permute.xlu0 %1137  ;;  %v1140_v19 = vpop.permute.xlu1 %1139 }
 0x178   : > { %1170 = vst.msk [vmem:[#allocation2 + $0x10] sm:$0xff] %vm1168_vm12, %v1138_v13  ;;  %1171 = vst.msk [vmem:[#allocation2 + $0x20] sm:$0xff] %vm1168_vm12, %v1140_v19  ;;  %v4330_v13 = vld [vmem:[%s4887_s28 + $0x5d] sm:$0xff]  ;;  %v4331_v19 = vld [vmem:[%s4911_s8 + $0xe] sm:$0xff] }
 0x179   : > { %1487 = vrot.lane.b32.xlu0 %v4302_v9, %s4809_s18  ;;  %1489 = vrot.lane.b32.xlu1 %v4303_v10, %s4809_s18 }
 0x17b   : > { %v1142_v17 = vpop.permute.xlu0 %1141  ;;  %v1144_v18 = vpop.permute.xlu1 %1143 }
 0x17c   : > { %1172 = vst.msk [vmem:[#allocation2 + $0x30] sm:$0xff] %vm1168_vm12, %v1142_v17  ;;  %1173 = vst.msk [vmem:[#allocation2 + $0x40] sm:$0xff] %vm1168_vm12, %v1144_v18  ;;  %v5562_v17 = vld [vmem:[%s4911_s8 + $0x16] sm:$0xff]  ;;  %v5565_v18 = vld [vmem:[%s4911_s8 + $0x1e] sm:$0xff] }
 0x17d   : > { %1491 = vrot.lane.b32.xlu0 %v4304_v14, %s4809_s18  ;;  %1493 = vrot.lane.b32.xlu1 %v4305_v20, %s4809_s18 }
 0x17f   : > { %v1146_v23 = vpop.permute.xlu0 %1145  ;;  %v1148_v24 = vpop.permute.xlu1 %1147 }
 0x180   : > { %1174 = vst.msk [vmem:[#allocation2 + $0x50] sm:$0xff] %vm1168_vm12, %v1146_v23  ;;  %1175 = vst.msk [vmem:[#allocation2 + $0x60] sm:$0xff] %vm1168_vm12, %v1148_v24  ;;  %v5574_v23 = vld [vmem:[%s4911_s8 + $0x26] sm:$0xff]  ;;  %v5577_v24 = vld [vmem:[%s4911_s8 + $0x2e] sm:$0xff] }
 0x181   : > { %1495 = vrot.lane.b32.xlu0 %v4306_v21, %s4809_s18  ;;  %1497 = vrot.lane.b32.xlu1 %v4307_v22, %s4809_s18 }
 0x183   : > { %v1150_v27 = vpop.permute.xlu0 %1149  ;;  %v1152_v28 = vpop.permute.xlu1 %1151 }
 0x184   : > { %1176 = vst.msk [vmem:[#allocation2 + $0x70] sm:$0xff] %vm1168_vm12, %v1150_v27  ;;  %1177 = vst.msk [vmem:[#allocation2 + $0x80] sm:$0xff] %vm1168_vm12, %v1152_v28  ;;  %v5586_v27 = vld [vmem:[%s4911_s8 + $0x36] sm:$0xff]  ;;  %v5589_v28 = vld [vmem:[%s4911_s8 + $0x3e] sm:$0xff] }
 0x185   : > { %1499 = vrot.lane.b32.xlu0 %v4308_v25, %s4809_s18  ;;  %1548 = vrot.lane.b32.xlu1 %v4309_v26, %s4810_s19  ;;  %s4811_s18 = smov 76  }
 0x187   : > { %v1154_v31 = vpop.permute.xlu0 %1153  ;;  %v1156_v32 = vpop.permute.xlu1 %1155 }
 0x188   : > { %1178 = vst.msk [vmem:[#allocation2 + $0x90] sm:$0xff] %vm1168_vm12, %v1154_v31  ;;  %1179 = vst.msk [vmem:[#allocation2 + $0xa0] sm:$0xff] %vm1168_vm12, %v1156_v32  ;;  %v5598_v31 = vld [vmem:[%s4911_s8 + $0x46] sm:$0xff]  ;;  %v5601_v32 = vld [vmem:[%s4911_s8 + $0x4e] sm:$0xff] }
 0x189   : > { %1550 = vrot.lane.b32.xlu0 %v4310_v29, %s4810_s19  ;;  %1552 = vrot.lane.b32.xlu1 %v4311_v30, %s4810_s19 }
 0x18b   : > { %v1204_v35 = vpop.permute.xlu0 %1203  ;;  %v1206_v36 = vpop.permute.xlu1 %1205 }
 0x18c   : > { %1237 = vst.msk [vmem:[#allocation2] sm:$0xff] %vm1236_vm13, %v1204_v35  ;;  %1238 = vst.msk [vmem:[#allocation2 + $0x10] sm:$0xff] %vm1236_vm13, %v1206_v36  ;;  %v5610_v35 = vld [vmem:[%s4911_s8 + $0x56] sm:$0xff]  ;;  %v5613_v36 = vld [vmem:[%s4911_s8 + $0x5e] sm:$0xff] }
 0x18d   : > { %1554 = vrot.lane.b32.xlu0 %v4312_v33, %s4810_s19  ;;  %1556 = vrot.lane.b32.xlu1 %v4313_v34, %s4810_s19 }
 0x18f   : > { %v1208_v39 = vpop.permute.xlu0 %1207  ;;  %v1210_v40 = vpop.permute.xlu1 %1209 }
 0x190   : > { %1239 = vst.msk [vmem:[#allocation2 + $0x20] sm:$0xff] %vm1236_vm13, %v1208_v39  ;;  %1240 = vst.msk [vmem:[#allocation2 + $0x30] sm:$0xff] %vm1236_vm13, %v1210_v40 }
 0x191   : > { %1558 = vrot.lane.b32.xlu0 %v4314_v37, %s4810_s19  ;;  %1560 = vrot.lane.b32.xlu1 %v4315_v38, %s4810_s19 }
 0x193   : > { %v1212_v43 = vpop.permute.xlu0 %1211  ;;  %v1214_v44 = vpop.permute.xlu1 %1213 }
 0x194   : > { %1241 = vst.msk [vmem:[#allocation2 + $0x40] sm:$0xff] %vm1236_vm13, %v1212_v43  ;;  %1242 = vst.msk [vmem:[#allocation2 + $0x50] sm:$0xff] %vm1236_vm13, %v1214_v44 }
 0x195   : > { %1562 = vrot.lane.b32.xlu0 %v4316_v41, %s4810_s19  ;;  %1564 = vrot.lane.b32.xlu1 %v4317_v42, %s4810_s19 }
 0x197   : > { %v1216_v48 = vpop.permute.xlu0 %1215  ;;  %v1218_v51 = vpop.permute.xlu1 %1217 }
 0x198   : > { %1243 = vst.msk [vmem:[#allocation2 + $0x60] sm:$0xff] %vm1236_vm13, %v1216_v48  ;;  %1244 = vst.msk [vmem:[#allocation2 + $0x70] sm:$0xff] %vm1236_vm13, %v1218_v51  ;;  %v4356_v48 = vld [vmem:[%s5123_s20 + $0x23] sm:$0xff]  ;;  %v4357_v51 = vld [vmem:[%s5123_s20 + $0x2b] sm:$0xff] }
 0x199   : > { %1566 = vrot.lane.b32.xlu0 %v4318_v45, %s4810_s19  ;;  %1568 = vrot.lane.b32.xlu1 %v4319_v47, %s4810_s19  ;;  %s4812_s19 = smov 80  }
 0x19b   : > { %v1220_v56 = vpop.permute.xlu0 %1219  ;;  %v1222_v59 = vpop.permute.xlu1 %1221 }
 0x19c   : > { %1245 = vst.msk [vmem:[#allocation2 + $0x80] sm:$0xff] %vm1236_vm13, %v1220_v56  ;;  %1246 = vst.msk [vmem:[#allocation2 + $0x90] sm:$0xff] %vm1236_vm13, %v1222_v59  ;;  %v4358_v56 = vld [vmem:[%s5123_s20 + $0x33] sm:$0xff]  ;;  %v4359_v59 = vld [vmem:[%s5123_s20 + $0x3b] sm:$0xff] }
 0x19d   : > { %1616 = vrot.lane.b32.xlu0 %v4320_v52, %s4811_s18  ;;  %1618 = vrot.lane.b32.xlu1 %v4321_v55, %s4811_s18 }
 0x19f   : > { %v1224_v0 = vpop.permute.xlu0 %1223  ;;  %v1275_v2 = vpop.permute.xlu1 %1274 }
 0x1a0   : > { %1247 = vst.msk [vmem:[#allocation2 + $0xa0] sm:$0xff] %vm1236_vm13, %v1224_v0  ;;  %v4360_v0 = vld [vmem:[%s5123_s20 + $0x43] sm:$0xff] }
 0x1a1   : > { %1308 = vst.msk [vmem:[#allocation2] sm:$0xff] %vm6765_vm14, %v1275_v2  ;;  %1620 = vrot.lane.b32.xlu0 %v4322_v60, %s4811_s18  ;;  %1622 = vrot.lane.b32.xlu1 %v4323_v63, %s4811_s18  ;;  %v4361_v2 = vld [vmem:[%s5123_s20 + $0x4b] sm:$0xff] }
 0x1a3   : > { %v1277_v11 = vpop.permute.xlu0 %1276  ;;  %v1279_v12 = vpop.permute.xlu1 %1278 }
 0x1a4   : > { %1309 = vst.msk [vmem:[#allocation2 + $0x10] sm:$0xff] %vm6765_vm14, %v1277_v11  ;;  %1310 = vst.msk [vmem:[#allocation2 + $0x20] sm:$0xff] %vm6765_vm14, %v1279_v12  ;;  %v4362_v11 = vld [vmem:[%s5123_s20 + $0x53] sm:$0xff]  ;;  %v4363_v12 = vld [vmem:[%s5123_s20 + $0x5b] sm:$0xff] }
 0x1a5   : > { %1624 = vrot.lane.b32.xlu0 %v4324_v7, %s4811_s18  ;;  %1626 = vrot.lane.b32.xlu1 %v4325_v8, %s4811_s18 }
 0x1a7   : > { %v1281_v16 = vpop.permute.xlu0 %1280  ;;  %v1283_v4 = vpop.permute.xlu1 %1282 }
 0x1a8   : > { %1311 = vst.msk [vmem:[#allocation2 + $0x30] sm:$0xff] %vm6765_vm14, %v1281_v16  ;;  %1312 = vst.msk [vmem:[#allocation2 + $0x40] sm:$0xff] %vm6765_vm14, %v1283_v4  ;;  %v4364_v16 = vld [vmem:[%s5085_s16 + $0xc] sm:$0xff]  ;;  %v4365_v4 = vld [vmem:[%s5085_s16 + $0x14] sm:$0xff] }
 0x1a9   : > { %1628 = vrot.lane.b32.xlu0 %v4326_v15, %s4811_s18  ;;  %1630 = vrot.lane.b32.xlu1 %v4327_v3, %s4811_s18 }
 0x1ab   : > { %v1285_v9 = vpop.permute.xlu0 %1284  ;;  %v1287_v10 = vpop.permute.xlu1 %1286 }
 0x1ac   : > { %1313 = vst.msk [vmem:[#allocation2 + $0x50] sm:$0xff] %vm6765_vm14, %v1285_v9  ;;  %1314 = vst.msk [vmem:[#allocation2 + $0x60] sm:$0xff] %vm6765_vm14, %v1287_v10  ;;  %v4366_v9 = vld [vmem:[%s5085_s16 + $0x1c] sm:$0xff]  ;;  %v4367_v10 = vld [vmem:[%s5085_s16 + $0x24] sm:$0xff] }
 0x1ad   : > { %1632 = vrot.lane.b32.xlu0 %v4328_v5, %s4811_s18  ;;  %1634 = vrot.lane.b32.xlu1 %v4329_v6, %s4811_s18 }
 0x1af   : > { %v1289_v14 = vpop.permute.xlu0 %1288  ;;  %v1291_v20 = vpop.permute.xlu1 %1290 }
 0x1b0   : > { %1315 = vst.msk [vmem:[#allocation2 + $0x70] sm:$0xff] %vm6765_vm14, %v1289_v14  ;;  %1316 = vst.msk [vmem:[#allocation2 + $0x80] sm:$0xff] %vm6765_vm14, %v1291_v20  ;;  %v4368_v14 = vld [vmem:[%s5085_s16 + $0x2c] sm:$0xff]  ;;  %v4369_v20 = vld [vmem:[%s5085_s16 + $0x34] sm:$0xff] }
 0x1b1   : > { %1636 = vrot.lane.b32.xlu0 %v4330_v13, %s4811_s18  ;;  %1685 = vrot.lane.b32.xlu1 %v4331_v19, %s4812_s19  ;;  %s4813_s18 = smov 84  }
 0x1b3   : > { %v1293_v21 = vpop.permute.xlu0 %1292  ;;  %v1295_v22 = vpop.permute.xlu1 %1294 }
 0x1b4   : > { %1317 = vst.msk [vmem:[#allocation2 + $0x90] sm:$0xff] %vm6765_vm14, %v1293_v21  ;;  %1318 = vst.msk [vmem:[#allocation2 + $0xa0] sm:$0xff] %vm6765_vm14, %v1295_v22  ;;  %vm6767_vm14 = vcmask 556544  }
 0x1b5   : > { %1687 = vrot.lane.b32.xlu0 %v5562_v17, %s4812_s19  ;;  %1689 = vrot.lane.b32.xlu1 %v5565_v18, %s4812_s19 }
 0x1b7   : > { %v1343_v25 = vpop.permute.xlu0 %1342  ;;  %v1345_v26 = vpop.permute.xlu1 %1344 }
 0x1b8   : > { %1376 = vst.msk [vmem:[#allocation2] sm:$0xff] %vm6766_vm15, %v1343_v25  ;;  %1377 = vst.msk [vmem:[#allocation2 + $0x10] sm:$0xff] %vm6766_vm15, %v1345_v26  ;;  %v4370_v25 = vld [vmem:[%s5085_s16 + $0x3c] sm:$0xff]  ;;  %v4371_v26 = vld [vmem:[%s5085_s16 + $0x44] sm:$0xff] }
 0x1b9   : > { %1691 = vrot.lane.b32.xlu0 %v5574_v23, %s4812_s19  ;;  %1693 = vrot.lane.b32.xlu1 %v5577_v24, %s4812_s19 }
 0x1bb   : > { %v1347_v29 = vpop.permute.xlu0 %1346  ;;  %v1349_v30 = vpop.permute.xlu1 %1348 }
 0x1bc   : > { %1378 = vst.msk [vmem:[#allocation2 + $0x20] sm:$0xff] %vm6766_vm15, %v1347_v29  ;;  %1379 = vst.msk [vmem:[#allocation2 + $0x30] sm:$0xff] %vm6766_vm15, %v1349_v30 }
 0x1bd   : > { %1695 = vrot.lane.b32.xlu0 %v5586_v27, %s4812_s19  ;;  %1697 = vrot.lane.b32.xlu1 %v5589_v28, %s4812_s19 }
 0x1bf   : > { %v1351_v33 = vpop.permute.xlu0 %1350  ;;  %v1353_v34 = vpop.permute.xlu1 %1352 }
 0x1c0   : > { %1380 = vst.msk [vmem:[#allocation2 + $0x40] sm:$0xff] %vm6766_vm15, %v1351_v33  ;;  %1381 = vst.msk [vmem:[#allocation2 + $0x50] sm:$0xff] %vm6766_vm15, %v1353_v34  ;;  %v4372_v33 = vld [vmem:[%s5085_s16 + $0x4c] sm:$0xff]  ;;  %v4373_v34 = vld [vmem:[%s5085_s16 + $0x54] sm:$0xff] }
 0x1c1   : > { %1699 = vrot.lane.b32.xlu0 %v5598_v31, %s4812_s19  ;;  %1701 = vrot.lane.b32.xlu1 %v5601_v32, %s4812_s19 }
 0x1c3   : > { %v1355_v37 = vpop.permute.xlu0 %1354  ;;  %v1357_v38 = vpop.permute.xlu1 %1356 }
 0x1c4   : > { %1382 = vst.msk [vmem:[#allocation2 + $0x60] sm:$0xff] %vm6766_vm15, %v1355_v37  ;;  %1383 = vst.msk [vmem:[#allocation2 + $0x70] sm:$0xff] %vm6766_vm15, %v1357_v38 }
 0x1c5   : > { %1703 = vrot.lane.b32.xlu0 %v5610_v35, %s4812_s19  ;;  %1705 = vrot.lane.b32.xlu1 %v5613_v36, %s4812_s19  ;;  %s4814_s19 = smov 88  }
 0x1c7   : > { %v1359_v39 = vpop.permute.xlu0 %1358  ;;  %v1361_v40 = vpop.permute.xlu1 %1360 }
 0x1c8   : > { %1384 = vst.msk [vmem:[#allocation2 + $0x80] sm:$0xff] %vm6766_vm15, %v1359_v39  ;;  %1385 = vst.msk [vmem:[#allocation2 + $0x90] sm:$0xff] %vm6766_vm15, %v1361_v40  ;;  %v4374_v39 = vld [vmem:[%s5085_s16 + $0x5c] sm:$0xff]  ;;  %v4375_v40 = vld [vmem:[%s5123_s20 + $0xc] sm:$0xff] }
 0x1c9   : > { %1753 = vrot.lane.b32.xlu0 %v5299_v46, %s4813_s18  ;;  %1755 = vrot.lane.b32.xlu1 %v5307_v49, %s4813_s18 }
 0x1cb   : > { %v1363_v41 = vpop.permute.xlu0 %1362  ;;  %v1412_v42 = vpop.permute.xlu1 %1411 }
 0x1cc   : > { %1386 = vst.msk [vmem:[#allocation2 + $0xa0] sm:$0xff] %vm6766_vm15, %v1363_v41  ;;  %vm1512_vm15 = vcmask 589344  }
 0x1cd   : > { %1445 = vst.msk [vmem:[#allocation2] sm:$0xff] %vm6767_vm14, %v1412_v42  ;;  %1757 = vrot.lane.b32.xlu0 %v5310_v50, %s4813_s18  ;;  %1759 = vrot.lane.b32.xlu1 %v5319_v53, %s4813_s18 }
 0x1cf   : > { %v1414_v43 = vpop.permute.xlu0 %1413  ;;  %v1416_v44 = vpop.permute.xlu1 %1415 }
 0x1d0   : > { %1446 = vst.msk [vmem:[#allocation2 + $0x10] sm:$0xff] %vm6767_vm14, %v1414_v43  ;;  %1447 = vst.msk [vmem:[#allocation2 + $0x20] sm:$0xff] %vm6767_vm14, %v1416_v44  ;;  %v4376_v43 = vld [vmem:[%s5123_s20 + $0x14] sm:$0xff]  ;;  %v4377_v44 = vld [vmem:[%s5123_s20 + $0x1c] sm:$0xff] }
 0x1d1   : > { %1761 = vrot.lane.b32.xlu0 %v5322_v54, %s4813_s18  ;;  %1763 = vrot.lane.b32.xlu1 %v5331_v57, %s4813_s18  ;;  %v4352_v54 = vld [vmem:[%s5085_s16 + $0x5b] sm:$0xff]  ;;  %v4353_v57 = vld [vmem:[%s5123_s20 + $0xb] sm:$0xff] }
 0x1d3   : > { %v1418_v46 = vpop.permute.xlu0 %1417  ;;  %v1420_v49 = vpop.permute.xlu1 %1419 }
 0x1d4   : > { %1448 = vst.msk [vmem:[#allocation2 + $0x30] sm:$0xff] %vm6767_vm14, %v1418_v46  ;;  %1449 = vst.msk [vmem:[#allocation2 + $0x40] sm:$0xff] %vm6767_vm14, %v1420_v49 }
 0x1d5   : > { %1765 = vrot.lane.b32.xlu0 %v5334_v58, %s4813_s18  ;;  %1767 = vrot.lane.b32.xlu1 %v5343_v61, %s4813_s18  ;;  %v4354_v61 = vld [vmem:[%s5123_s20 + $0x13] sm:$0xff] }
 0x1d7   : > { %v1422_v50 = vpop.permute.xlu0 %1421  ;;  %v1424_v53 = vpop.permute.xlu1 %1423 }
 0x1d8   : > { %1450 = vst.msk [vmem:[#allocation2 + $0x50] sm:$0xff] %vm6767_vm14, %v1422_v50  ;;  %1451 = vst.msk [vmem:[#allocation2 + $0x60] sm:$0xff] %vm6767_vm14, %v1424_v53  ;;  %v4378_v50 = vld [vmem:[%s5123_s20 + $0x24] sm:$0xff]  ;;  %v4379_v53 = vld [vmem:[%s5123_s20 + $0x2c] sm:$0xff] }
 0x1d9   : > { %1769 = vrot.lane.b32.xlu0 %v5346_v62, %s4813_s18  ;;  %1771 = vrot.lane.b32.xlu1 %v5355_v1, %s4813_s18  ;;  %v4355_v62 = vld [vmem:[%s5123_s20 + $0x1b] sm:$0xff] }
 0x1db   : > { %v1426_v58 = vpop.permute.xlu0 %1425  ;;  %v1428_v45 = vpop.permute.xlu1 %1427 }
 0x1dc   : > { %1452 = vst.msk [vmem:[#allocation2 + $0x70] sm:$0xff] %vm6767_vm14, %v1426_v58  ;;  %1453 = vst.msk [vmem:[#allocation2 + $0x80] sm:$0xff] %vm6767_vm14, %v1428_v45  ;;  %v4380_v58 = vld [vmem:[%s5123_s20 + $0x34] sm:$0xff]  ;;  %v4381_v45 = vld [vmem:[%s5123_s20 + $0x3c] sm:$0xff] }
 0x1dd   : > { %1773 = vrot.lane.b32.xlu0 %v4352_v54, %s4813_s18  ;;  %1821 = vrot.lane.b32.xlu1 %v4353_v57, %s4814_s19  ;;  %s4815_s18 = smov 92  }
 0x1df   : > { %v1430_v47 = vpop.permute.xlu0 %1429  ;;  %v1432_v1 = vpop.permute.xlu1 %1431 }
 0x1e0   : > { %1454 = vst.msk [vmem:[#allocation2 + $0x90] sm:$0xff] %vm6767_vm14, %v1430_v47  ;;  %1455 = vst.msk [vmem:[#allocation2 + $0xa0] sm:$0xff] %vm6767_vm14, %v1432_v1  ;;  %vm1581_vm14 = vcmask 622144   ;;  %v4382_v47 = vld [vmem:[%s5123_s20 + $0x44] sm:$0xff]  ;;  %v4383_v1 = vld [vmem:[%s5123_s20 + $0x4c] sm:$0xff] }
 0x1e1   : > { %1823 = vrot.lane.b32.xlu0 %v4354_v61, %s4814_s19  ;;  %1825 = vrot.lane.b32.xlu1 %v4355_v62, %s4814_s19 }
 0x1e3   : > { %v1480_v52 = vpop.permute.xlu0 %1479  ;;  %v1482_v55 = vpop.permute.xlu1 %1481 }
 0x1e4   : > { %1513 = vst.msk [vmem:[#allocation2] sm:$0xff] %vm1512_vm15, %v1480_v52  ;;  %1514 = vst.msk [vmem:[#allocation2 + $0x10] sm:$0xff] %vm1512_vm15, %v1482_v55  ;;  %v4384_v52 = vld [vmem:[%s5123_s20 + $0x54] sm:$0xff]  ;;  %v4385_v55 = vld [vmem:[%s5123_s20 + $0x5c] sm:$0xff] }
 0x1e5   : > { %1827 = vrot.lane.b32.xlu0 %v4356_v48, %s4814_s19  ;;  %1829 = vrot.lane.b32.xlu1 %v4357_v51, %s4814_s19 }
 0x1e7   : > { %v1484_v60 = vpop.permute.xlu0 %1483  ;;  %v1486_v63 = vpop.permute.xlu1 %1485 }
 0x1e8   : > { %1515 = vst.msk [vmem:[#allocation2 + $0x20] sm:$0xff] %vm1512_vm15, %v1484_v60  ;;  %1516 = vst.msk [vmem:[#allocation2 + $0x30] sm:$0xff] %vm1512_vm15, %v1486_v63  ;;  %v4386_v60 = vld [vmem:[%s5085_s16 + $0xd] sm:$0xff]  ;;  %v4387_v63 = vld [vmem:[%s5085_s16 + $0x15] sm:$0xff] }
 0x1e9   : > { %1831 = vrot.lane.b32.xlu0 %v4358_v56, %s4814_s19  ;;  %1833 = vrot.lane.b32.xlu1 %v4359_v59, %s4814_s19 }
 0x1eb   : > { %v1488_v7 = vpop.permute.xlu0 %1487  ;;  %v1490_v8 = vpop.permute.xlu1 %1489 }
 0x1ec   : > { %1517 = vst.msk [vmem:[#allocation2 + $0x40] sm:$0xff] %vm1512_vm15, %v1488_v7  ;;  %1518 = vst.msk [vmem:[#allocation2 + $0x50] sm:$0xff] %vm1512_vm15, %v1490_v8  ;;  %v4388_v7 = vld [vmem:[%s5085_s16 + $0x1d] sm:$0xff]  ;;  %v4389_v8 = vld [vmem:[%s5085_s16 + $0x25] sm:$0xff] }
 0x1ed   : > { %1835 = vrot.lane.b32.xlu0 %v4360_v0, %s4814_s19  ;;  %1837 = vrot.lane.b32.xlu1 %v4361_v2, %s4814_s19 }
 0x1ef   : > { %v1492_v15 = vpop.permute.xlu0 %1491  ;;  %v1494_v3 = vpop.permute.xlu1 %1493 }
 0x1f0   : > { %1519 = vst.msk [vmem:[#allocation2 + $0x60] sm:$0xff] %vm1512_vm15, %v1492_v15  ;;  %1520 = vst.msk [vmem:[#allocation2 + $0x70] sm:$0xff] %vm1512_vm15, %v1494_v3  ;;  %v4390_v15 = vld [vmem:[%s5085_s16 + $0x2d] sm:$0xff]  ;;  %v4391_v3 = vld [vmem:[%s5085_s16 + $0x35] sm:$0xff] }
 0x1f1   : > { %1839 = vrot.lane.b32.xlu0 %v4362_v11, %s4814_s19  ;;  %1841 = vrot.lane.b32.xlu1 %v4363_v12, %s4814_s19  ;;  %s4816_s19 = smov 96  }
 0x1f3   : > { %v1496_v5 = vpop.permute.xlu0 %1495  ;;  %v1498_v6 = vpop.permute.xlu1 %1497 }
 0x1f4   : > { %1521 = vst.msk [vmem:[#allocation2 + $0x80] sm:$0xff] %vm1512_vm15, %v1496_v5  ;;  %1522 = vst.msk [vmem:[#allocation2 + $0x90] sm:$0xff] %vm1512_vm15, %v1498_v6  ;;  %v4392_v5 = vld [vmem:[%s5085_s16 + $0x3d] sm:$0xff]  ;;  %v4393_v6 = vld [vmem:[%s5085_s16 + $0x45] sm:$0xff] }
 0x1f5   : > { %1889 = vrot.lane.b32.xlu0 %v4364_v16, %s4815_s18  ;;  %1891 = vrot.lane.b32.xlu1 %v4365_v4, %s4815_s18 }
 0x1f7   : > { %v1500_v13 = vpop.permute.xlu0 %1499  ;;  %v1549_v19 = vpop.permute.xlu1 %1548 }
 0x1f8   : > { %1523 = vst.msk [vmem:[#allocation2 + $0xa0] sm:$0xff] %vm1512_vm15, %v1500_v13  ;;  %vm1649_vm15 = vcmask 654944   ;;  %v4394_v13 = vld [vmem:[%s5085_s16 + $0x4d] sm:$0xff] }
 0x1f9   : > { %1582 = vst.msk [vmem:[#allocation2] sm:$0xff] %vm1581_vm14, %v1549_v19  ;;  %1893 = vrot.lane.b32.xlu0 %v4366_v9, %s4815_s18  ;;  %1895 = vrot.lane.b32.xlu1 %v4367_v10, %s4815_s18  ;;  %v4395_v19 = vld [vmem:[%s5085_s16 + $0x55] sm:$0xff] }
 0x1fb   : > { %v1551_v21 = vpop.permute.xlu0 %1550  ;;  %v1553_v22 = vpop.permute.xlu1 %1552 }
 0x1fc   : > { %1583 = vst.msk [vmem:[#allocation2 + $0x10] sm:$0xff] %vm1581_vm14, %v1551_v21  ;;  %1584 = vst.msk [vmem:[#allocation2 + $0x20] sm:$0xff] %vm1581_vm14, %v1553_v22  ;;  %v4396_v21 = vld [vmem:[%s5085_s16 + $0x5d] sm:$0xff]  ;;  %v4397_v22 = vld [vmem:[%s5123_s20 + $0xd] sm:$0xff] }
 0x1fd   : > { %1897 = vrot.lane.b32.xlu0 %v4368_v14, %s4815_s18  ;;  %1899 = vrot.lane.b32.xlu1 %v4369_v20, %s4815_s18 }
 0x1ff   : > { %v1555_v29 = vpop.permute.xlu0 %1554  ;;  %v1557_v30 = vpop.permute.xlu1 %1556 }
 0x200   : > { %1585 = vst.msk [vmem:[#allocation2 + $0x30] sm:$0xff] %vm1581_vm14, %v1555_v29  ;;  %1586 = vst.msk [vmem:[#allocation2 + $0x40] sm:$0xff] %vm1581_vm14, %v1557_v30  ;;  %v4398_v29 = vld [vmem:[%s5123_s20 + $0x15] sm:$0xff]  ;;  %v4399_v30 = vld [vmem:[%s5123_s20 + $0x1d] sm:$0xff] }
 0x201   : > { %1901 = vrot.lane.b32.xlu0 %v4370_v25, %s4815_s18  ;;  %1903 = vrot.lane.b32.xlu1 %v4371_v26, %s4815_s18 }
 0x203   : > { %v1559_v37 = vpop.permute.xlu0 %1558  ;;  %v1561_v38 = vpop.permute.xlu1 %1560 }
 0x204   : > { %1587 = vst.msk [vmem:[#allocation2 + $0x50] sm:$0xff] %vm1581_vm14, %v1559_v37  ;;  %1588 = vst.msk [vmem:[#allocation2 + $0x60] sm:$0xff] %vm1581_vm14, %v1561_v38  ;;  %v4400_v37 = vld [vmem:[%s5123_s20 + $0x25] sm:$0xff]  ;;  %v4401_v38 = vld [vmem:[%s5123_s20 + $0x2d] sm:$0xff] }
 0x205   : > { %1905 = vrot.lane.b32.xlu0 %v4372_v33, %s4815_s18  ;;  %1907 = vrot.lane.b32.xlu1 %v4373_v34, %s4815_s18 }
 0x207   : > { %v1563_v41 = vpop.permute.xlu0 %1562  ;;  %v1565_v42 = vpop.permute.xlu1 %1564 }
 0x208   : > { %1589 = vst.msk [vmem:[#allocation2 + $0x70] sm:$0xff] %vm1581_vm14, %v1563_v41  ;;  %1590 = vst.msk [vmem:[#allocation2 + $0x80] sm:$0xff] %vm1581_vm14, %v1565_v42  ;;  %v4402_v41 = vld [vmem:[%s5123_s20 + $0x35] sm:$0xff]  ;;  %v4403_v42 = vld [vmem:[%s5123_s20 + $0x3d] sm:$0xff] }
 0x209   : > { %1909 = vrot.lane.b32.xlu0 %v4374_v39, %s4815_s18  ;;  %1957 = vrot.lane.b32.xlu1 %v4375_v40, %s4816_s19  ;;  %s4817_s18 = smov 100  }
 0x20b   : > { %v1567_v46 = vpop.permute.xlu0 %1566  ;;  %v1569_v49 = vpop.permute.xlu1 %1568 }
 0x20c   : > { %1591 = vst.msk [vmem:[#allocation2 + $0x90] sm:$0xff] %vm1581_vm14, %v1567_v46  ;;  %1592 = vst.msk [vmem:[#allocation2 + $0xa0] sm:$0xff] %vm1581_vm14, %v1569_v49  ;;  %vm1718_vm14 = vcmask 687744   ;;  %v4404_v46 = vld [vmem:[%s5123_s20 + $0x45] sm:$0xff]  ;;  %v4405_v49 = vld [vmem:[%s5123_s20 + $0x4d] sm:$0xff] }
 0x20d   : > { %1959 = vrot.lane.b32.xlu0 %v4376_v43, %s4816_s19  ;;  %1961 = vrot.lane.b32.xlu1 %v4377_v44, %s4816_s19 }
 0x20f   : > { %v1617_v54 = vpop.permute.xlu0 %1616  ;;  %v1619_v57 = vpop.permute.xlu1 %1618 }
 0x210   : > { %1650 = vst.msk [vmem:[#allocation2] sm:$0xff] %vm1649_vm15, %v1617_v54  ;;  %1651 = vst.msk [vmem:[#allocation2 + $0x10] sm:$0xff] %vm1649_vm15, %v1619_v57  ;;  %v4406_v54 = vld [vmem:[%s5123_s20 + $0x55] sm:$0xff]  ;;  %v4407_v57 = vld [vmem:[%s5123_s20 + $0x5d] sm:$0xff] }
 0x211   : > { %1963 = vrot.lane.b32.xlu0 %v4378_v50, %s4816_s19  ;;  %1965 = vrot.lane.b32.xlu1 %v4379_v53, %s4816_s19 }
 0x213   : > { %v1621_v61 = vpop.permute.xlu0 %1620  ;;  %v1623_v62 = vpop.permute.xlu1 %1622 }
 0x214   : > { %1652 = vst.msk [vmem:[#allocation2 + $0x20] sm:$0xff] %vm1649_vm15, %v1621_v61  ;;  %1653 = vst.msk [vmem:[#allocation2 + $0x30] sm:$0xff] %vm1649_vm15, %v1623_v62  ;;  %v4408_v61 = vld [vmem:[%s5085_s16 + $0xe] sm:$0xff]  ;;  %v5821_v62 = vld [vmem:[%s5085_s16 + $0x16] sm:$0xff] }
 0x215   : > { %1967 = vrot.lane.b32.xlu0 %v4380_v58, %s4816_s19  ;;  %1969 = vrot.lane.b32.xlu1 %v4381_v45, %s4816_s19 }
 0x217   : > { %v1625_v48 = vpop.permute.xlu0 %1624  ;;  %v1627_v51 = vpop.permute.xlu1 %1626 }
 0x218   : > { %1654 = vst.msk [vmem:[#allocation2 + $0x40] sm:$0xff] %vm1649_vm15, %v1625_v48  ;;  %1655 = vst.msk [vmem:[#allocation2 + $0x50] sm:$0xff] %vm1649_vm15, %v1627_v51  ;;  %v5829_v48 = vld [vmem:[%s5085_s16 + $0x1e] sm:$0xff]  ;;  %v5832_v51 = vld [vmem:[%s5085_s16 + $0x26] sm:$0xff] }
 0x219   : > { %1971 = vrot.lane.b32.xlu0 %v4382_v47, %s4816_s19  ;;  %1973 = vrot.lane.b32.xlu1 %v4383_v1, %s4816_s19 }
 0x21b   : > { %v1629_v56 = vpop.permute.xlu0 %1628  ;;  %v1631_v59 = vpop.permute.xlu1 %1630 }
 0x21c   : > { %1656 = vst.msk [vmem:[#allocation2 + $0x60] sm:$0xff] %vm1649_vm15, %v1629_v56  ;;  %1657 = vst.msk [vmem:[#allocation2 + $0x70] sm:$0xff] %vm1649_vm15, %v1631_v59  ;;  %v5841_v56 = vld [vmem:[%s5085_s16 + $0x2e] sm:$0xff]  ;;  %v5844_v59 = vld [vmem:[%s5085_s16 + $0x36] sm:$0xff] }
 0x21d   : > { %1975 = vrot.lane.b32.xlu0 %v4384_v52, %s4816_s19  ;;  %1977 = vrot.lane.b32.xlu1 %v4385_v55, %s4816_s19  ;;  %s4818_s19 = smov 104  }
 0x21f   : > { %v1633_v0 = vpop.permute.xlu0 %1632  ;;  %v1635_v2 = vpop.permute.xlu1 %1634 }
 0x220   : > { %1658 = vst.msk [vmem:[#allocation2 + $0x80] sm:$0xff] %vm1649_vm15, %v1633_v0  ;;  %1659 = vst.msk [vmem:[#allocation2 + $0x90] sm:$0xff] %vm1649_vm15, %v1635_v2  ;;  %v4414_v0 = vld [vmem:[%s5085_s16 + $0x3e] sm:$0xff]  ;;  %v5854_v2 = vld [vmem:[%s5085_s16 + $0x46] sm:$0xff] }
 0x221   : > { %2025 = vrot.lane.b32.xlu0 %v4386_v60, %s4817_s18  ;;  %2027 = vrot.lane.b32.xlu1 %v4387_v63, %s4817_s18 }
 0x223   : > { %v1637_v11 = vpop.permute.xlu0 %1636  ;;  %v1686_v12 = vpop.permute.xlu1 %1685 }
 0x224   : > { %1660 = vst.msk [vmem:[#allocation2 + $0xa0] sm:$0xff] %vm1649_vm15, %v1637_v11  ;;  %vm1786_vm15 = vcmask 720544   ;;  %v5862_v11 = vld [vmem:[%s5085_s16 + $0x4e] sm:$0xff] }
 0x225   : > { %1719 = vst.msk [vmem:[#allocation2] sm:$0xff] %vm1718_vm14, %v1686_v12  ;;  %2029 = vrot.lane.b32.xlu0 %v4388_v7, %s4817_s18  ;;  %2031 = vrot.lane.b32.xlu1 %v4389_v8, %s4817_s18  ;;  %v5865_v12 = vld [vmem:[%s5085_s16 + $0x56] sm:$0xff] }
 0x227   : > { %v1688_v16 = vpop.permute.xlu0 %1687  ;;  %v1690_v4 = vpop.permute.xlu1 %1689 }
 0x228   : > { %1720 = vst.msk [vmem:[#allocation2 + $0x10] sm:$0xff] %vm1718_vm14, %v1688_v16  ;;  %1721 = vst.msk [vmem:[#allocation2 + $0x20] sm:$0xff] %vm1718_vm14, %v1690_v4  ;;  %v5874_v16 = vld [vmem:[%s5085_s16 + $0x5e] sm:$0xff] }
 0x229   : > { %2033 = vrot.lane.b32.xlu0 %v4390_v15, %s4817_s18  ;;  %2035 = vrot.lane.b32.xlu1 %v4391_v3, %s4817_s18 }
 0x22b   : > { %v1692_v9 = vpop.permute.xlu0 %1691  ;;  %v1694_v10 = vpop.permute.xlu1 %1693 }
 0x22c   : > { %1722 = vst.msk [vmem:[#allocation2 + $0x30] sm:$0xff] %vm1718_vm14, %v1692_v9  ;;  %1723 = vst.msk [vmem:[#allocation2 + $0x40] sm:$0xff] %vm1718_vm14, %v1694_v10 }
 0x22d   : > { %2037 = vrot.lane.b32.xlu0 %v4392_v5, %s4817_s18  ;;  %2039 = vrot.lane.b32.xlu1 %v4393_v6, %s4817_s18 }
 0x22f   : > { %v1696_v14 = vpop.permute.xlu0 %1695  ;;  %v1698_v20 = vpop.permute.xlu1 %1697 }
 0x230   : > { %1724 = vst.msk [vmem:[#allocation2 + $0x50] sm:$0xff] %vm1718_vm14, %v1696_v14  ;;  %1725 = vst.msk [vmem:[#allocation2 + $0x60] sm:$0xff] %vm1718_vm14, %v1698_v20  ;;  %v4431_v14 = vld [vmem:[%s4887_s28 + $0x1e] sm:$0xff] }
 0x231   : > { %2041 = vrot.lane.b32.xlu0 %v4394_v13, %s4817_s18  ;;  %2043 = vrot.lane.b32.xlu1 %v4395_v19, %s4817_s18 }
 0x233   : > { %v1700_v25 = vpop.permute.xlu0 %1699  ;;  %v1702_v26 = vpop.permute.xlu1 %1701 }
 0x234   : > { %1726 = vst.msk [vmem:[#allocation2 + $0x70] sm:$0xff] %vm1718_vm14, %v1700_v25  ;;  %1727 = vst.msk [vmem:[#allocation2 + $0x80] sm:$0xff] %vm1718_vm14, %v1702_v26  ;;  %v4434_v25 = vld [vmem:[%s4887_s28 + $0x36] sm:$0xff]  ;;  %v4435_v26 = vld [vmem:[%s4887_s28 + $0x3e] sm:$0xff] }
 0x235   : > { %2045 = vrot.lane.b32.xlu0 %v4396_v21, %s4817_s18  ;;  %2093 = vrot.lane.b32.xlu1 %v4397_v22, %s4818_s19  ;;  %s4819_s18 = smov 108  }
 0x237   : > { %v1704_v33 = vpop.permute.xlu0 %1703  ;;  %v1706_v34 = vpop.permute.xlu1 %1705 }
 0x238   : > { %1728 = vst.msk [vmem:[#allocation2 + $0x90] sm:$0xff] %vm1718_vm14, %v1704_v33  ;;  %1729 = vst.msk [vmem:[#allocation2 + $0xa0] sm:$0xff] %vm1718_vm14, %v1706_v34  ;;  %vm1854_vm14 = vcmask 753344   ;;  %v4436_v33 = vld [vmem:[%s4887_s28 + $0x46] sm:$0xff]  ;;  %v4437_v34 = vld [vmem:[%s4887_s28 + $0x4e] sm:$0xff] }
 0x239   : > { %2095 = vrot.lane.b32.xlu0 %v4398_v29, %s4818_s19  ;;  %2097 = vrot.lane.b32.xlu1 %v4399_v30, %s4818_s19 }
 0x23b   : > { %v1754_v39 = vpop.permute.xlu0 %1753  ;;  %v1756_v40 = vpop.permute.xlu1 %1755 }
 0x23c   : > { %1787 = vst.msk [vmem:[#allocation2] sm:$0xff] %vm1786_vm15, %v1754_v39  ;;  %1788 = vst.msk [vmem:[#allocation2 + $0x10] sm:$0xff] %vm1786_vm15, %v1756_v40  ;;  %v4438_v39 = vld [vmem:[%s4887_s28 + $0x56] sm:$0xff]  ;;  %v4439_v40 = vld [vmem:[%s4887_s28 + $0x5e] sm:$0xff] }
 0x23d   : > { %2099 = vrot.lane.b32.xlu0 %v4400_v37, %s4818_s19  ;;  %2101 = vrot.lane.b32.xlu1 %v4401_v38, %s4818_s19 }
 0x23f   : > { %v1758_v43 = vpop.permute.xlu0 %1757  ;;  %v1760_v44 = vpop.permute.xlu1 %1759 }
 0x240   : > { %1789 = vst.msk [vmem:[#allocation2 + $0x20] sm:$0xff] %vm1786_vm15, %v1758_v43  ;;  %1790 = vst.msk [vmem:[#allocation2 + $0x30] sm:$0xff] %vm1786_vm15, %v1760_v44  ;;  %v4440_v43 = vld [vmem:[%s4887_s28 + $0x66] sm:$0xff]  ;;  %v4441_v44 = vld [vmem:[%s4911_s8 + $0x17] sm:$0xff] }
 0x241   : > { %2103 = vrot.lane.b32.xlu0 %v4402_v41, %s4818_s19  ;;  %2105 = vrot.lane.b32.xlu1 %v4403_v42, %s4818_s19 }
 0x243   : > { %v1762_v50 = vpop.permute.xlu0 %1761  ;;  %v1764_v53 = vpop.permute.xlu1 %1763 }
 0x244   : > { %1791 = vst.msk [vmem:[#allocation2 + $0x40] sm:$0xff] %vm1786_vm15, %v1762_v50  ;;  %1792 = vst.msk [vmem:[#allocation2 + $0x50] sm:$0xff] %vm1786_vm15, %v1764_v53  ;;  %v4442_v50 = vld [vmem:[%s4911_s8 + $0x1f] sm:$0xff]  ;;  %v4443_v53 = vld [vmem:[%s4911_s8 + $0x27] sm:$0xff] }
 0x245   : > { %2107 = vrot.lane.b32.xlu0 %v4404_v46, %s4818_s19  ;;  %2109 = vrot.lane.b32.xlu1 %v4405_v49, %s4818_s19 }
 0x247   : > { %v1766_v58 = vpop.permute.xlu0 %1765  ;;  %v1768_v45 = vpop.permute.xlu1 %1767 }
 0x248   : > { %1793 = vst.msk [vmem:[#allocation2 + $0x60] sm:$0xff] %vm1786_vm15, %v1766_v58  ;;  %1794 = vst.msk [vmem:[#allocation2 + $0x70] sm:$0xff] %vm1786_vm15, %v1768_v45  ;;  %v4444_v58 = vld [vmem:[%s4911_s8 + $0x2f] sm:$0xff]  ;;  %v4445_v45 = vld [vmem:[%s4911_s8 + $0x37] sm:$0xff] }
 0x249   : > { %2111 = vrot.lane.b32.xlu0 %v4406_v54, %s4818_s19  ;;  %2113 = vrot.lane.b32.xlu1 %v4407_v57, %s4818_s19  ;;  %s4820_s19 = smov 112  }
 0x24b   : > { %v1770_v47 = vpop.permute.xlu0 %1769  ;;  %v1772_v1 = vpop.permute.xlu1 %1771 }
 0x24c   : > { %1795 = vst.msk [vmem:[#allocation2 + $0x80] sm:$0xff] %vm1786_vm15, %v1770_v47  ;;  %1796 = vst.msk [vmem:[#allocation2 + $0x90] sm:$0xff] %vm1786_vm15, %v1772_v1  ;;  %v4446_v1 = vld [vmem:[%s4911_s8 + $0x3f] sm:$0xff] }
 0x24d   : > { %2161 = vrot.lane.b32.xlu0 %v4408_v61, %s4819_s18  ;;  %2163 = vrot.lane.b32.xlu1 %v5821_v62, %s4819_s18 }
 0x24f   : > { %v1774_v52 = vpop.permute.xlu0 %1773  ;;  %v1822_v55 = vpop.permute.xlu1 %1821 }
 0x250   : > { %1797 = vst.msk [vmem:[#allocation2 + $0xa0] sm:$0xff] %vm1786_vm15, %v1774_v52  ;;  %vm1922_vm15 = vcmask 786144   ;;  %v4447_v52 = vld [vmem:[%s4911_s8 + $0x47] sm:$0xff] }
 0x251   : > { %1855 = vst.msk [vmem:[#allocation2] sm:$0xff] %vm1854_vm14, %v1822_v55  ;;  %2165 = vrot.lane.b32.xlu0 %v5829_v48, %s4819_s18  ;;  %2167 = vrot.lane.b32.xlu1 %v5832_v51, %s4819_s18 }
 0x253   : > { %v1824_v60 = vpop.permute.xlu0 %1823  ;;  %v1826_v63 = vpop.permute.xlu1 %1825 }
 0x254   : > { %1856 = vst.msk [vmem:[#allocation2 + $0x10] sm:$0xff] %vm1854_vm14, %v1824_v60  ;;  %1857 = vst.msk [vmem:[#allocation2 + $0x20] sm:$0xff] %vm1854_vm14, %v1826_v63  ;;  %v4448_v63 = vld [vmem:[%s4911_s8 + $0x4f] sm:$0xff] }
 0x255   : > { %2169 = vrot.lane.b32.xlu0 %v5841_v56, %s4819_s18  ;;  %2171 = vrot.lane.b32.xlu1 %v5844_v59, %s4819_s18 }
 0x257   : > { %v1828_v7 = vpop.permute.xlu0 %1827  ;;  %v1830_v8 = vpop.permute.xlu1 %1829 }
 0x258   : > { %1858 = vst.msk [vmem:[#allocation2 + $0x30] sm:$0xff] %vm1854_vm14, %v1828_v7  ;;  %1859 = vst.msk [vmem:[#allocation2 + $0x40] sm:$0xff] %vm1854_vm14, %v1830_v8 }
 0x259   : > { %2173 = vrot.lane.b32.xlu0 %v4414_v0, %s4819_s18  ;;  %2175 = vrot.lane.b32.xlu1 %v5854_v2, %s4819_s18  ;;  %v4449_v0 = vld [vmem:[%s4911_s8 + $0x57] sm:$0xff] }
 0x25b   : > { %v1832_v15 = vpop.permute.xlu0 %1831  ;;  %v1834_v3 = vpop.permute.xlu1 %1833 }
 0x25c   : > { %1860 = vst.msk [vmem:[#allocation2 + $0x50] sm:$0xff] %vm1854_vm14, %v1832_v15  ;;  %1861 = vst.msk [vmem:[#allocation2 + $0x60] sm:$0xff] %vm1854_vm14, %v1834_v3  ;;  %v4450_v15 = vld [vmem:[%s4911_s8 + $0x5f] sm:$0xff]  ;;  %v4451_v3 = vld [vmem:[%s4911_s8 + $0x67] sm:$0xff] }
 0x25d   : > { %2177 = vrot.lane.b32.xlu0 %v5862_v11, %s4819_s18  ;;  %2179 = vrot.lane.b32.xlu1 %v5865_v12, %s4819_s18 }
 0x25f   : > { %v1836_v4 = vpop.permute.xlu0 %1835  ;;  %v1838_v5 = vpop.permute.xlu1 %1837 }
 0x260   : > { %1862 = vst.msk [vmem:[#allocation2 + $0x70] sm:$0xff] %vm1854_vm14, %v1836_v4  ;;  %1863 = vst.msk [vmem:[#allocation2 + $0x80] sm:$0xff] %vm1854_vm14, %v1838_v5 }
 0x261   : > { %2181 = vrot.lane.b32.xlu0 %v5874_v16, %s4819_s18  ;;  %2231 = vrot.lane.b32.xlu1 %v5562_v17, %s4820_s19  ;;  %s4821_s18 = smov 116  }
 0x263   : > { %v1840_v6 = vpop.permute.xlu0 %1839  ;;  %v1842_v9 = vpop.permute.xlu1 %1841 }
 0x264   : > { %1864 = vst.msk [vmem:[#allocation2 + $0x90] sm:$0xff] %vm1854_vm14, %v1840_v6  ;;  %1865 = vst.msk [vmem:[#allocation2 + $0xa0] sm:$0xff] %vm1854_vm14, %v1842_v9  ;;  %vm1990_vm14 = vcmask 818944   ;;  %v4452_v6 = vld [vmem:[%s4887_s28 + $0x17] sm:$0xff]  ;;  %v4453_v9 = vld [vmem:[%s4887_s28 + $0x1f] sm:$0xff] }
 0x265   : > { %2233 = vrot.lane.b32.xlu0 %v5565_v18, %s4820_s19  ;;  %2235 = vrot.lane.b32.xlu1 %v5574_v23, %s4820_s19 }
 0x267   : > { %v1890_v10 = vpop.permute.xlu0 %1889  ;;  %v1892_v13 = vpop.permute.xlu1 %1891 }
 0x268   : > { %1923 = vst.msk [vmem:[#allocation2] sm:$0xff] %vm1922_vm15, %v1890_v10  ;;  %1924 = vst.msk [vmem:[#allocation2 + $0x10] sm:$0xff] %vm1922_vm15, %v1892_v13 }
 0x269   : > { %2237 = vrot.lane.b32.xlu0 %v5577_v24, %s4820_s19  ;;  %2239 = vrot.lane.b32.xlu1 %v5586_v27, %s4820_s19  ;;  %v4429_v24 = vld [vmem:[%s4911_s8 + $0x66] sm:$0xff] }
 0x26b   : > { %v1894_v17 = vpop.permute.xlu0 %1893  ;;  %v1896_v19 = vpop.permute.xlu1 %1895 }
 0x26c   : > { %1925 = vst.msk [vmem:[#allocation2 + $0x20] sm:$0xff] %vm1922_vm15, %v1894_v17  ;;  %1926 = vst.msk [vmem:[#allocation2 + $0x30] sm:$0xff] %vm1922_vm15, %v1896_v19  ;;  %v4454_v17 = vld [vmem:[%s4887_s28 + $0x27] sm:$0xff]  ;;  %v4455_v19 = vld [vmem:[%s4887_s28 + $0x2f] sm:$0xff] }
 0x26d   : > { %2241 = vrot.lane.b32.xlu0 %v5589_v28, %s4820_s19  ;;  %2243 = vrot.lane.b32.xlu1 %v5598_v31, %s4820_s19  ;;  %v4430_v31 = vld [vmem:[%s4887_s28 + $0x16] sm:$0xff] }
 0x26f   : > { %v1898_v18 = vpop.permute.xlu0 %1897  ;;  %v1900_v23 = vpop.permute.xlu1 %1899 }
 0x270   : > { %1927 = vst.msk [vmem:[#allocation2 + $0x40] sm:$0xff] %vm1922_vm15, %v1898_v18  ;;  %1928 = vst.msk [vmem:[#allocation2 + $0x50] sm:$0xff] %vm1922_vm15, %v1900_v23 }
 0x271   : > { %2245 = vrot.lane.b32.xlu0 %v5601_v32, %s4820_s19  ;;  %2247 = vrot.lane.b32.xlu1 %v5610_v35, %s4820_s19  ;;  %v4432_v35 = vld [vmem:[%s4887_s28 + $0x26] sm:$0xff] }
 0x273   : > { %v1902_v27 = vpop.permute.xlu0 %1901  ;;  %v1904_v28 = vpop.permute.xlu1 %1903 }
 0x274   : > { %1929 = vst.msk [vmem:[#allocation2 + $0x60] sm:$0xff] %vm1922_vm15, %v1902_v27  ;;  %1930 = vst.msk [vmem:[#allocation2 + $0x70] sm:$0xff] %vm1922_vm15, %v1904_v28  ;;  %v4457_v27 = vld [vmem:[%s4887_s28 + $0x3f] sm:$0xff] }
 0x275   : > { %2249 = vrot.lane.b32.xlu0 %v5613_v36, %s4820_s19  ;;  %2251 = vrot.lane.b32.xlu1 %v4429_v24, %s4820_s19  ;;  %v4433_v36 = vld [vmem:[%s4887_s28 + $0x2e] sm:$0xff]  ;;  %s4822_s19 = smov 120   ;;  %v4456_v24 = vld [vmem:[%s4887_s28 + $0x37] sm:$0xff] }
 0x277   : > { %v1906_v32 = vpop.permute.xlu0 %1905  ;;  %v1908_v20 = vpop.permute.xlu1 %1907 }
 0x278   : > { %1931 = vst.msk [vmem:[#allocation2 + $0x80] sm:$0xff] %vm1922_vm15, %v1906_v32  ;;  %1932 = vst.msk [vmem:[#allocation2 + $0x90] sm:$0xff] %vm1922_vm15, %v1908_v20  ;;  %v4464_v32 = vld [vmem:[%s4911_s8 + $0x20] sm:$0xff] }
 0x279   : > { %2299 = vrot.lane.b32.xlu0 %v4430_v31, %s4821_s18  ;;  %2301 = vrot.lane.b32.xlu1 %v4431_v14, %s4821_s18  ;;  %v4463_v14 = vld [vmem:[%s4911_s8 + $0x18] sm:$0xff]  ;;  %v4458_v20 = vld [vmem:[%s4887_s28 + $0x47] sm:$0xff]  ;;  %2495 = vst.msk [vmem:[#allocation2 + $0x18] sm:$0xff] %vm349_vm0, %v4464_v32 }
 0x27a   : > { %2494 = vst.msk [vmem:[#allocation2 + $0x8] sm:$0xff] %vm349_vm0, %v4463_v14  ;;  %v4491_v14 = vld [vmem:[%s4911_s8 + $0x49] sm:$0xff]  ;;  %v6098_v32 = vld [vmem:[%s4911_s8 + $0x51] sm:$0xff] }
 0x27b   : > { %v1910_v21 = vpop.permute.xlu0 %1909  ;;  %v1958_v22 = vpop.permute.xlu1 %1957 }
 0x27c   : > { %1933 = vst.msk [vmem:[#allocation2 + $0xa0] sm:$0xff] %vm1922_vm15, %v1910_v21  ;;  %vm2058_vm15 = vcmask 851744  }
 0x27d   : > { %1991 = vst.msk [vmem:[#allocation2] sm:$0xff] %vm1990_vm14, %v1958_v22  ;;  %2303 = vrot.lane.b32.xlu0 %v4432_v35, %s4821_s18  ;;  %2305 = vrot.lane.b32.xlu1 %v4433_v36, %s4821_s18  ;;  %v4459_v35 = vld [vmem:[%s4887_s28 + $0x4f] sm:$0xff] }
 0x27e   : > { %v4465_v22 = vld [vmem:[%s4911_s8 + $0x28] sm:$0xff] }
 0x27f   : > { %v1960_v29 = vpop.permute.xlu0 %1959  ;;  %v1962_v30 = vpop.permute.xlu1 %1961  ;;  %2496 = vst.msk [vmem:[#allocation2 + $0x28] sm:$0xff] %vm349_vm0, %v4465_v22 }
 0x280   : > { %1992 = vst.msk [vmem:[#allocation2 + $0x10] sm:$0xff] %vm1990_vm14, %v1960_v29  ;;  %1993 = vst.msk [vmem:[#allocation2 + $0x20] sm:$0xff] %vm1990_vm14, %v1962_v30  ;;  %v4461_v29 = vld [vmem:[%s4887_s28 + $0x5f] sm:$0xff] }
 0x281   : > { %2307 = vrot.lane.b32.xlu0 %v4434_v25, %s4821_s18  ;;  %2309 = vrot.lane.b32.xlu1 %v4435_v26, %s4821_s18  ;;  %v4466_v25 = vld [vmem:[%s4911_s8 + $0x30] sm:$0xff] }
 0x282   : > { %v4460_v26 = vld [vmem:[%s4887_s28 + $0x57] sm:$0xff]  ;;  %2497 = vst.msk [vmem:[#allocation2 + $0x38] sm:$0xff] %vm349_vm0, %v4466_v25 }
 0x283   : > { %v1964_v37 = vpop.permute.xlu0 %1963  ;;  %v1966_v38 = vpop.permute.xlu1 %1965 }
 0x284   : > { %1994 = vst.msk [vmem:[#allocation2 + $0x30] sm:$0xff] %vm1990_vm14, %v1964_v37  ;;  %1995 = vst.msk [vmem:[#allocation2 + $0x40] sm:$0xff] %vm1990_vm14, %v1966_v38  ;;  %v4468_v37 = vld [vmem:[%s4911_s8 + $0x40] sm:$0xff] }
 0x285   : > { %2311 = vrot.lane.b32.xlu0 %v4436_v33, %s4821_s18  ;;  %2313 = vrot.lane.b32.xlu1 %v4437_v34, %s4821_s18  ;;  %v4467_v34 = vld [vmem:[%s4911_s8 + $0x38] sm:$0xff]  ;;  %v4462_v38 = vld [vmem:[%s4887_s28 + $0x67] sm:$0xff]  ;;  %2499 = vst.msk [vmem:[#allocation2 + $0x58] sm:$0xff] %vm349_vm0, %v4468_v37 }
 0x286   : > { %2498 = vst.msk [vmem:[#allocation2 + $0x48] sm:$0xff] %vm349_vm0, %v4467_v34 }
 0x287   : > { %v1968_v41 = vpop.permute.xlu0 %1967  ;;  %v1970_v42 = vpop.permute.xlu1 %1969 }
 0x288   : > { %1996 = vst.msk [vmem:[#allocation2 + $0x50] sm:$0xff] %vm1990_vm14, %v1968_v41  ;;  %1997 = vst.msk [vmem:[#allocation2 + $0x60] sm:$0xff] %vm1990_vm14, %v1970_v42  ;;  %v4469_v42 = vld [vmem:[%s4911_s8 + $0x48] sm:$0xff] }
 0x289   : > { %2315 = vrot.lane.b32.xlu0 %v4438_v39, %s4821_s18  ;;  %2317 = vrot.lane.b32.xlu1 %v4439_v40, %s4821_s18  ;;  %v4474_v39 = vld [vmem:[%s4887_s28 + $0x18] sm:$0xff]  ;;  %2500 = vst.msk [vmem:[#allocation2 + $0x68] sm:$0xff] %vm349_vm0, %v4469_v42 }
 0x28b   : > { %v1972_v46 = vpop.permute.xlu0 %1971  ;;  %v1974_v49 = vpop.permute.xlu1 %1973 }
 0x28c   : > { %1998 = vst.msk [vmem:[#allocation2 + $0x70] sm:$0xff] %vm1990_vm14, %v1972_v46  ;;  %1999 = vst.msk [vmem:[#allocation2 + $0x80] sm:$0xff] %vm1990_vm14, %v1974_v49  ;;  %v4476_v46 = vld [vmem:[%s4887_s28 + $0x28] sm:$0xff] }
 0x28d   : > { %2319 = vrot.lane.b32.xlu0 %v4440_v43, %s4821_s18  ;;  %2368 = vrot.lane.b32.xlu1 %v4441_v44, %s4822_s19  ;;  %s4823_s18 = smov 124   ;;  %v4470_v43 = vld [vmem:[%s4911_s8 + $0x50] sm:$0xff]  ;;  %v4475_v44 = vld [vmem:[%s4887_s28 + $0x20] sm:$0xff] }
 0x28e   : > { %2501 = vst.msk [vmem:[#allocation2 + $0x78] sm:$0xff] %vm349_vm0, %v4470_v43 }
 0x28f   : > { %v1976_v54 = vpop.permute.xlu0 %1975  ;;  %v1978_v57 = vpop.permute.xlu1 %1977 }
 0x290   : > { %2000 = vst.msk [vmem:[#allocation2 + $0x90] sm:$0xff] %vm1990_vm14, %v1976_v54  ;;  %2001 = vst.msk [vmem:[#allocation2 + $0xa0] sm:$0xff] %vm1990_vm14, %v1978_v57  ;;  %vm2126_vm14 = vcmask 884544   ;;  %v4472_v54 = vld [vmem:[%s4911_s8 + $0x60] sm:$0xff]  ;;  %v4477_v57 = vld [vmem:[%s4887_s28 + $0x30] sm:$0xff] }
 0x291   : > { %2370 = vrot.lane.b32.xlu0 %v4442_v50, %s4822_s19  ;;  %2372 = vrot.lane.b32.xlu1 %v4443_v53, %s4822_s19  ;;  %v4471_v53 = vld [vmem:[%s4911_s8 + $0x58] sm:$0xff]  ;;  %2503 = vst.msk [vmem:[#allocation2 + $0x98] sm:$0xff] %vm349_vm0, %v4472_v54 }
 0x292   : > { %2502 = vst.msk [vmem:[#allocation2 + $0x88] sm:$0xff] %vm349_vm0, %v4471_v53  ;;  %v4513_v53 = vld [vmem:[%s5123_s20 + $0x46] sm:$0xff] }
 0x293   : > { %v2026_v61 = vpop.permute.xlu0 %2025  ;;  %v2028_v47 = vpop.permute.xlu1 %2027 }
 0x294   : > { %2059 = vst.msk [vmem:[#allocation2] sm:$0xff] %vm2058_vm15, %v2026_v61  ;;  %2060 = vst.msk [vmem:[#allocation2 + $0x10] sm:$0xff] %vm2058_vm15, %v2028_v47  ;;  %v4473_v47 = vld [vmem:[%s4911_s8 + $0x68] sm:$0xff] }
 0x295   : > { %2374 = vrot.lane.b32.xlu0 %v4444_v58, %s4822_s19  ;;  %2376 = vrot.lane.b32.xlu1 %v4445_v45, %s4822_s19  ;;  %v4478_v58 = vld [vmem:[%s4887_s28 + $0x38] sm:$0xff]  ;;  %2504 = vst.msk [vmem:[#allocation2 + $0xa8] sm:$0xff] %vm349_vm0, %v4473_v47  ;;  %vm2264_vm0 = vcmask 950144   ;;  %v4524_v47 = vld [vmem:[%s5085_s16 + $0x47] sm:$0xff] }
 0x297   : > { %v2030_v55 = vpop.permute.xlu0 %2029  ;;  %v2032_v60 = vpop.permute.xlu1 %2031 }
 0x298   : > { %2061 = vst.msk [vmem:[#allocation2 + $0x20] sm:$0xff] %vm2058_vm15, %v2030_v55  ;;  %2062 = vst.msk [vmem:[#allocation2 + $0x30] sm:$0xff] %vm2058_vm15, %v2032_v60 }
 0x299   : > { %2378 = vrot.lane.b32.xlu0 %v4446_v1, %s4822_s19  ;;  %2380 = vrot.lane.b32.xlu1 %v4447_v52, %s4822_s19  ;;  %v4479_v1 = vld [vmem:[%s4887_s28 + $0x40] sm:$0xff]  ;;  %v4480_v52 = vld [vmem:[%s4887_s28 + $0x48] sm:$0xff] }
 0x29b   : > { %v2034_v7 = vpop.permute.xlu0 %2033  ;;  %v2036_v8 = vpop.permute.xlu1 %2035 }
 0x29c   : > { %2063 = vst.msk [vmem:[#allocation2 + $0x40] sm:$0xff] %vm2058_vm15, %v2034_v7  ;;  %2064 = vst.msk [vmem:[#allocation2 + $0x50] sm:$0xff] %vm2058_vm15, %v2036_v8 }
 0x29d   : > { %2382 = vrot.lane.b32.xlu0 %v4448_v63, %s4822_s19  ;;  %2384 = vrot.lane.b32.xlu1 %v4449_v0, %s4822_s19  ;;  %v4481_v63 = vld [vmem:[%s4887_s28 + $0x50] sm:$0xff]  ;;  %v4482_v0 = vld [vmem:[%s4887_s28 + $0x58] sm:$0xff] }
 0x29f   : > { %v2038_v4 = vpop.permute.xlu0 %2037  ;;  %v2040_v5 = vpop.permute.xlu1 %2039 }
 0x2a0   : > { %2065 = vst.msk [vmem:[#allocation2 + $0x60] sm:$0xff] %vm2058_vm15, %v2038_v4  ;;  %2066 = vst.msk [vmem:[#allocation2 + $0x70] sm:$0xff] %vm2058_vm15, %v2040_v5 }
 0x2a1   : > { %2386 = vrot.lane.b32.xlu0 %v4450_v15, %s4822_s19  ;;  %2388 = vrot.lane.b32.xlu1 %v4451_v3, %s4822_s19  ;;  %v4483_v15 = vld [vmem:[%s4887_s28 + $0x60] sm:$0xff]  ;;  %v4484_v3 = vld [vmem:[%s4887_s28 + $0x68] sm:$0xff] }
 0x2a3   : > { %v2042_v10 = vpop.permute.xlu0 %2041  ;;  %v2044_v13 = vpop.permute.xlu1 %2043 }
 0x2a4   : > { %2067 = vst.msk [vmem:[#allocation2 + $0x80] sm:$0xff] %vm2058_vm15, %v2042_v10  ;;  %2068 = vst.msk [vmem:[#allocation2 + $0x90] sm:$0xff] %vm2058_vm15, %v2044_v13 }
 0x2a5   : > { %2436 = vrot.lane.b32.xlu0 %v4452_v6, %s4823_s18  ;;  %2438 = vrot.lane.b32.xlu1 %v4453_v9, %s4823_s18  ;;  %v4485_v6 = vld [vmem:[%s4911_s8 + $0x19] sm:$0xff]  ;;  %v6068_v9 = vld [vmem:[%s4911_s8 + $0x21] sm:$0xff] }
 0x2a7   : > { %v2046_v18 = vpop.permute.xlu0 %2045  ;;  %v2094_v23 = vpop.permute.xlu1 %2093 }
 0x2a8   : > { %2069 = vst.msk [vmem:[#allocation2 + $0xa0] sm:$0xff] %vm2058_vm15, %v2046_v18  ;;  %vm2194_vm15 = vcmask 917344  }
 0x2a9   : > { %2127 = vst.msk [vmem:[#allocation2] sm:$0xff] %vm2126_vm14, %v2094_v23  ;;  %2440 = vrot.lane.b32.xlu0 %v4454_v17, %s4823_s18  ;;  %2442 = vrot.lane.b32.xlu1 %v4455_v19, %s4823_s18  ;;  %v6076_v17 = vld [vmem:[%s4911_s8 + $0x29] sm:$0xff]  ;;  %v6079_v19 = vld [vmem:[%s4911_s8 + $0x31] sm:$0xff] }
 0x2ab   : > { %v2096_v28 = vpop.permute.xlu0 %2095  ;;  %v2098_v31 = vpop.permute.xlu1 %2097 }
 0x2ac   : > { %2128 = vst.msk [vmem:[#allocation2 + $0x10] sm:$0xff] %vm2126_vm14, %v2096_v28  ;;  %2129 = vst.msk [vmem:[#allocation2 + $0x20] sm:$0xff] %vm2126_vm14, %v2098_v31 }
 0x2ad   : > { %2444 = vrot.lane.b32.xlu0 %v4456_v24, %s4823_s18  ;;  %2446 = vrot.lane.b32.xlu1 %v4457_v27, %s4823_s18  ;;  %v6088_v24 = vld [vmem:[%s4911_s8 + $0x39] sm:$0xff]  ;;  %v4490_v27 = vld [vmem:[%s4911_s8 + $0x41] sm:$0xff] }
 0x2af   : > { %v2100_v36 = vpop.permute.xlu0 %2099  ;;  %v2102_v21 = vpop.permute.xlu1 %2101 }
 0x2b0   : > { %2130 = vst.msk [vmem:[#allocation2 + $0x30] sm:$0xff] %vm2126_vm14, %v2100_v36  ;;  %2131 = vst.msk [vmem:[#allocation2 + $0x40] sm:$0xff] %vm2126_vm14, %v2102_v21  ;;  %v6106_v36 = vld [vmem:[%s4911_s8 + $0x59] sm:$0xff]  ;;  %v6109_v21 = vld [vmem:[%s4911_s8 + $0x61] sm:$0xff] }
 0x2b1   : > { %2448 = vrot.lane.b32.xlu0 %v4458_v20, %s4823_s18  ;;  %2450 = vrot.lane.b32.xlu1 %v4459_v35, %s4823_s18 }
 0x2b3   : > { %v2104_v30 = vpop.permute.xlu0 %2103  ;;  %v2106_v33 = vpop.permute.xlu1 %2105 }
 0x2b4   : > { %2132 = vst.msk [vmem:[#allocation2 + $0x50] sm:$0xff] %vm2126_vm14, %v2104_v30  ;;  %2133 = vst.msk [vmem:[#allocation2 + $0x60] sm:$0xff] %vm2126_vm14, %v2106_v33 }
 0x2b5   : > { %2452 = vrot.lane.b32.xlu0 %v4460_v26, %s4823_s18  ;;  %2454 = vrot.lane.b32.xlu1 %v4461_v29, %s4823_s18  ;;  %v6118_v26 = vld [vmem:[%s4911_s8 + $0x69] sm:$0xff] }
 0x2b7   : > { %v2108_v40 = vpop.permute.xlu0 %2107  ;;  %v2110_v41 = vpop.permute.xlu1 %2109 }
 0x2b8   : > { %2134 = vst.msk [vmem:[#allocation2 + $0x70] sm:$0xff] %vm2126_vm14, %v2108_v40  ;;  %2135 = vst.msk [vmem:[#allocation2 + $0x80] sm:$0xff] %vm2126_vm14, %v2110_v41  ;;  %v4519_v41 = vld [vmem:[%s5085_s16 + $0x1f] sm:$0xff] }
 0x2b9   : > { %2456 = vrot.lane.b32.xlu0 %v4462_v38, %s4823_s18  ;;  %2528 = vrot.lane.b32.xlu1 %v4474_v39, %s4793_s29 }
 0x2bb   : > { %v2112_v49 = vpop.permute.xlu0 %2111  ;;  %v2114_v50 = vpop.permute.xlu1 %2113 }
 0x2bc   : > { %2136 = vst.msk [vmem:[#allocation2 + $0x90] sm:$0xff] %vm2126_vm14, %v2112_v49  ;;  %2137 = vst.msk [vmem:[#allocation2 + $0xa0] sm:$0xff] %vm2126_vm14, %v2114_v50  ;;  %vm2332_vm14 = vcmask 982944  }
 0x2bd   : > { %2530 = vrot.lane.b32.xlu0 %v4475_v44, %s4793_s29  ;;  %2532 = vrot.lane.b32.xlu1 %v4476_v46, %s4793_s29  ;;  %v4529_v44 = vld [vmem:[%s5123_s20 + $0x17] sm:$0xff]  ;;  %v4530_v46 = vld [vmem:[%s5123_s20 + $0x1f] sm:$0xff] }
 0x2bf   : > { %v2162_v45 = vpop.permute.xlu0 %2161  ;;  %v2164_v61 = vpop.permute.xlu1 %2163 }
 0x2c0   : > { %2195 = vst.msk [vmem:[#allocation2] sm:$0xff] %vm2194_vm15, %v2162_v45  ;;  %2196 = vst.msk [vmem:[#allocation2 + $0x10] sm:$0xff] %vm2194_vm15, %v2164_v61 }
 0x2c1   : > { %2534 = vrot.lane.b32.xlu0 %v4477_v57, %s4793_s29  ;;  %2536 = vrot.lane.b32.xlu1 %v4478_v58, %s4793_s29  ;;  %v4540_v57 = vld [vmem:[%s5085_s16 + $0x18] sm:$0xff]  ;;  %v4541_v58 = vld [vmem:[%s5085_s16 + $0x20] sm:$0xff] }
 0x2c3   : > { %v2166_v55 = vpop.permute.xlu0 %2165  ;;  %v2168_v60 = vpop.permute.xlu1 %2167 }
 0x2c4   : > { %2197 = vst.msk [vmem:[#allocation2 + $0x20] sm:$0xff] %vm2194_vm15, %v2166_v55  ;;  %2198 = vst.msk [vmem:[#allocation2 + $0x30] sm:$0xff] %vm2194_vm15, %v2168_v60  ;;  %v4551_v60 = vld [vmem:[%s5123_s20 + $0x18] sm:$0xff] }
 0x2c5   : > { %2538 = vrot.lane.b32.xlu0 %v4479_v1, %s4793_s29  ;;  %2540 = vrot.lane.b32.xlu1 %v4480_v52, %s4793_s29  ;;  %v4525_v1 = vld [vmem:[%s5085_s16 + $0x4f] sm:$0xff] }
 0x2c7   : > { %v2170_v7 = vpop.permute.xlu0 %2169  ;;  %v2172_v8 = vpop.permute.xlu1 %2171 }
 0x2c8   : > { %2199 = vst.msk [vmem:[#allocation2 + $0x40] sm:$0xff] %vm2194_vm15, %v2170_v7  ;;  %2200 = vst.msk [vmem:[#allocation2 + $0x50] sm:$0xff] %vm2194_vm15, %v2172_v8  ;;  %v4535_v8 = vld [vmem:[%s5123_s20 + $0x47] sm:$0xff] }
 0x2c9   : > { %2542 = vrot.lane.b32.xlu0 %v4481_v63, %s4793_s29  ;;  %2544 = vrot.lane.b32.xlu1 %v4482_v0, %s4793_s29  ;;  %v4552_v63 = vld [vmem:[%s5123_s20 + $0x20] sm:$0xff] }
 0x2cb   : > { %v2174_v4 = vpop.permute.xlu0 %2173  ;;  %v2176_v5 = vpop.permute.xlu1 %2175 }
 0x2cc   : > { %2201 = vst.msk [vmem:[#allocation2 + $0x60] sm:$0xff] %vm2194_vm15, %v2174_v4  ;;  %2202 = vst.msk [vmem:[#allocation2 + $0x70] sm:$0xff] %vm2194_vm15, %v2176_v5  ;;  %v4562_v5 = vld [vmem:[%s5085_s16 + $0x19] sm:$0xff] }
 0x2cd   : > { %2546 = vrot.lane.b32.xlu0 %v4483_v15, %s4793_s29  ;;  %2548 = vrot.lane.b32.xlu1 %v4484_v3, %s4793_s29  ;;  %v4536_v15 = vld [vmem:[%s5123_s20 + $0x4f] sm:$0xff]  ;;  %s6768_s29 = smov 60  }
 0x2cf   : > { %v2178_v10 = vpop.permute.xlu0 %2177  ;;  %v2180_v13 = vpop.permute.xlu1 %2179 }
 0x2d0   : > { %2203 = vst.msk [vmem:[#allocation2 + $0x80] sm:$0xff] %vm2194_vm15, %v2178_v10  ;;  %2204 = vst.msk [vmem:[#allocation2 + $0x90] sm:$0xff] %vm2194_vm15, %v2180_v13 }
 0x2d1   : > { %2596 = vrot.lane.b32.xlu0 %v4485_v6, %s4794_s9  ;;  %2598 = vrot.lane.b32.xlu1 %v6068_v9, %s4794_s9  ;;  %v4563_v6 = vld [vmem:[%s5085_s16 + $0x21] sm:$0xff] }
 0x2d3   : > { %v2182_v18 = vpop.permute.xlu0 %2181  ;;  %v2232_v23 = vpop.permute.xlu1 %2231 }
 0x2d4   : > { %2205 = vst.msk [vmem:[#allocation2 + $0xa0] sm:$0xff] %vm2194_vm15, %v2182_v18  ;;  %vm2401_vm15 = vcmask 1015744   ;;  %v4546_v18 = vld [vmem:[%s5085_s16 + $0x48] sm:$0xff] }
 0x2d5   : > { %2265 = vst.msk [vmem:[#allocation2] sm:$0xff] %vm2264_vm0, %v2232_v23  ;;  %2600 = vrot.lane.b32.xlu0 %v6076_v17, %s4794_s9  ;;  %2602 = vrot.lane.b32.xlu1 %v6079_v19, %s4794_s9  ;;  %v4547_v23 = vld [vmem:[%s5085_s16 + $0x50] sm:$0xff] }
 0x2d7   : > { %v2234_v28 = vpop.permute.xlu0 %2233  ;;  %v2236_v31 = vpop.permute.xlu1 %2235 }
 0x2d8   : > { %2266 = vst.msk [vmem:[#allocation2 + $0x10] sm:$0xff] %vm2264_vm0, %v2234_v28  ;;  %2267 = vst.msk [vmem:[#allocation2 + $0x20] sm:$0xff] %vm2264_vm0, %v2236_v31 }
 0x2d9   : > { %2604 = vrot.lane.b32.xlu0 %v6088_v24, %s4794_s9  ;;  %2606 = vrot.lane.b32.xlu1 %v4490_v27, %s4794_s9 }
 0x2db   : > { %v2238_v20 = vpop.permute.xlu0 %2237  ;;  %v2240_v35 = vpop.permute.xlu1 %2239 }
 0x2dc   : > { %2268 = vst.msk [vmem:[#allocation2 + $0x30] sm:$0xff] %vm2264_vm0, %v2238_v20  ;;  %2269 = vst.msk [vmem:[#allocation2 + $0x40] sm:$0xff] %vm2264_vm0, %v2240_v35  ;;  %v4557_v20 = vld [vmem:[%s5123_s20 + $0x48] sm:$0xff]  ;;  %v4558_v35 = vld [vmem:[%s5123_s20 + $0x50] sm:$0xff] }
 0x2dd   : > { %2608 = vrot.lane.b32.xlu0 %v4491_v14, %s4794_s9  ;;  %2610 = vrot.lane.b32.xlu1 %v6098_v32, %s4794_s9 }
 0x2df   : > { %v2242_v22 = vpop.permute.xlu0 %2241  ;;  %v2244_v25 = vpop.permute.xlu1 %2243 }
 0x2e0   : > { %2270 = vst.msk [vmem:[#allocation2 + $0x50] sm:$0xff] %vm2264_vm0, %v2242_v22  ;;  %2271 = vst.msk [vmem:[#allocation2 + $0x60] sm:$0xff] %vm2264_vm0, %v2244_v25 }
 0x2e1   : > { %2612 = vrot.lane.b32.xlu0 %v6106_v36, %s4794_s9  ;;  %2614 = vrot.lane.b32.xlu1 %v6109_v21, %s4794_s9 }
 0x2e3   : > { %v2246_v29 = vpop.permute.xlu0 %2245  ;;  %v2248_v30 = vpop.permute.xlu1 %2247 }
 0x2e4   : > { %2272 = vst.msk [vmem:[#allocation2 + $0x70] sm:$0xff] %vm2264_vm0, %v2246_v29  ;;  %2273 = vst.msk [vmem:[#allocation2 + $0x80] sm:$0xff] %vm2264_vm0, %v2248_v30  ;;  %v4584_v29 = vld [vmem:[%s4887_s28 + $0x21] sm:$0xff] }
 0x2e5   : > { %2616 = vrot.lane.b32.xlu0 %v6118_v26, %s4794_s9  ;;  %2663 = vrot.lane.b32.xlu1 %v5821_v62, %s4795_s10  ;;  %v4507_v62 = vld [vmem:[%s5123_s20 + $0x16] sm:$0xff]  ;;  %s6769_s9 = smov 64  }
 0x2e7   : > { %v2250_v33 = vpop.permute.xlu0 %2249  ;;  %v2252_v34 = vpop.permute.xlu1 %2251 }
 0x2e8   : > { %2274 = vst.msk [vmem:[#allocation2 + $0x90] sm:$0xff] %vm2264_vm0, %v2250_v33  ;;  %2275 = vst.msk [vmem:[#allocation2 + $0xa0] sm:$0xff] %vm2264_vm0, %v2252_v34  ;;  %vm2469_vm0 = vcmask 1048544   ;;  %v4509_v33 = vld [vmem:[%s5123_s20 + $0x26] sm:$0xff]  ;;  %v4510_v34 = vld [vmem:[%s5123_s20 + $0x2e] sm:$0xff] }
 0x2e9   : > { %2665 = vrot.lane.b32.xlu0 %v5829_v48, %s4795_s10  ;;  %2667 = vrot.lane.b32.xlu1 %v5832_v51, %s4795_s10  ;;  %v4508_v48 = vld [vmem:[%s5123_s20 + $0x1e] sm:$0xff] }
 0x2ea   : > { %v4518_v51 = vld [vmem:[%s5085_s16 + $0x17] sm:$0xff] }
 0x2eb   : > { %v2300_v37 = vpop.permute.xlu0 %2299  ;;  %v2302_v38 = vpop.permute.xlu1 %2301 }
 0x2ec   : > { %2333 = vst.msk [vmem:[#allocation2] sm:$0xff] %vm2332_vm14, %v2300_v37  ;;  %2334 = vst.msk [vmem:[#allocation2 + $0x10] sm:$0xff] %vm2332_vm14, %v2302_v38 }
 0x2ed   : > { %2669 = vrot.lane.b32.xlu0 %v5841_v56, %s4795_s10  ;;  %2671 = vrot.lane.b32.xlu1 %v5844_v59, %s4795_s10 }
 0x2ef   : > { %v2304_v39 = vpop.permute.xlu0 %2303  ;;  %v2306_v40 = vpop.permute.xlu1 %2305 }
 0x2f0   : > { %2335 = vst.msk [vmem:[#allocation2 + $0x20] sm:$0xff] %vm2332_vm14, %v2304_v39  ;;  %2336 = vst.msk [vmem:[#allocation2 + $0x30] sm:$0xff] %vm2332_vm14, %v2306_v40 }
 0x2f1   : > { %2730 = vrot.lane.b32.xlu0 %v4507_v62, %s4796_s11  ;;  %2732 = vrot.lane.b32.xlu1 %v4508_v48, %s4796_s11  ;;  %v4568_v62 = vld [vmem:[%s5085_s16 + $0x49] sm:$0xff]  ;;  %v4569_v48 = vld [vmem:[%s5085_s16 + $0x51] sm:$0xff] }
 0x2f3   : > { %v2308_v56 = vpop.permute.xlu0 %2307  ;;  %v2310_v42 = vpop.permute.xlu1 %2309 }
 0x2f4   : > { %2337 = vst.msk [vmem:[#allocation2 + $0x40] sm:$0xff] %vm2332_vm14, %v2308_v56  ;;  %2338 = vst.msk [vmem:[#allocation2 + $0x50] sm:$0xff] %vm2332_vm14, %v2310_v42 }
 0x2f5   : > { %2797 = vrot.lane.b32.xlu0 %v4518_v51, %s4797_s12  ;;  %2799 = vrot.lane.b32.xlu1 %v4519_v41, %s4797_s12  ;;  %v4595_v51 = vld [vmem:[%s4911_s8 + $0x22] sm:$0xff]  ;;  %v4596_v41 = vld [vmem:[%s4911_s8 + $0x2a] sm:$0xff] }
 0x2f7   : > { %v2312_v59 = vpop.permute.xlu0 %2311  ;;  %v2314_v43 = vpop.permute.xlu1 %2313 }
 0x2f8   : > { %2339 = vst.msk [vmem:[#allocation2 + $0x60] sm:$0xff] %vm2332_vm14, %v2312_v59  ;;  %2340 = vst.msk [vmem:[#allocation2 + $0x70] sm:$0xff] %vm2332_vm14, %v2314_v43  ;;  %v4520_v59 = vld [vmem:[%s5085_s16 + $0x27] sm:$0xff]  ;;  %v4521_v43 = vld [vmem:[%s5085_s16 + $0x2f] sm:$0xff] }
 0x2f9   : > { %2675 = vrot.lane.b32.xlu0 %v5854_v2, %s4795_s10  ;;  %2677 = vrot.lane.b32.xlu1 %v5862_v11, %s4795_s10  ;;  %v4514_v2 = vld [vmem:[%s5123_s20 + $0x4e] sm:$0xff] }
 0x2fb   : > { %v2316_v49 = vpop.permute.xlu0 %2315  ;;  %v2318_v50 = vpop.permute.xlu1 %2317 }
 0x2fc   : > { %2341 = vst.msk [vmem:[#allocation2 + $0x80] sm:$0xff] %vm2332_vm14, %v2316_v49  ;;  %2342 = vst.msk [vmem:[#allocation2 + $0x90] sm:$0xff] %vm2332_vm14, %v2318_v50  ;;  %v4824_v49 = vmov 0   ;;  %v4756_v50 = vld [vmem:[%s6758_s4 + $0x38] sm:$0xff]  }
 0x2fd   : > { %2864 = vrot.lane.b32.xlu0 %v4529_v44, %s4798_s13  ;;  %2866 = vrot.lane.b32.xlu1 %v4530_v46, %s4798_s13 }
 0x2fe   : > { %3747 = vmatprep.subr.bf16.mxu0 %v4824_v49  ;;  %4672 = vmatprep.subr.bf16.mxu1 %v4824_v49 }
 0x2ff   : > { %v2320_v11 = vpop.permute.xlu0 %2319  ;;  %v2369_v54 = vpop.permute.xlu1 %2368  ;;  %3748 = vmatpush1.bf16.msra.mxu0 %v4756_v50  ;;  %4685 = vmatpush1.bf16.msra.mxu1 %v4756_v50  ;;  %v4768_v50 = vld [vmem:[%s6758_s4 + $0x40] sm:$0xff]  }
 0x300   : > { %2343 = vst.msk [vmem:[#allocation2 + $0xa0] sm:$0xff] %vm2332_vm14, %v2320_v11  ;;  %v4606_v11 = vld [vmem:[%s4887_s28 + $0x22] sm:$0xff]  ;;  %3749 = vmatprep.subr.bf16.mxu0 %v4824_v49  ;;  %4673 = vmatprep.subr.bf16.mxu1 %v4824_v49 }
 0x301   : > { %2402 = vst.msk [vmem:[#allocation2] sm:$0xff] %vm2401_vm15, %v2369_v54  ;;  %2742 = vrot.lane.b32.xlu0 %v4513_v53, %s4796_s11  ;;  %2744 = vrot.lane.b32.xlu1 %v4514_v2, %s4796_s11  ;;  %v4607_v54 = vld [vmem:[%s4887_s28 + $0x2a] sm:$0xff] }
 0x303   : > { %v2371_v45 = vpop.permute.xlu0 %2370  ;;  %v2373_v61 = vpop.permute.xlu1 %2372 }
 0x304   : > { %2403 = vst.msk [vmem:[#allocation2 + $0x10] sm:$0xff] %vm2401_vm15, %v2371_v45  ;;  %2404 = vst.msk [vmem:[#allocation2 + $0x20] sm:$0xff] %vm2401_vm15, %v2373_v61 }
 0x305   : > { %2931 = vrot.lane.b32.xlu0 %v4540_v57, %s4799_s17  ;;  %2933 = vrot.lane.b32.xlu1 %v4541_v58, %s4799_s17  ;;  %v4757_v57 = vld [vmem:[%s6758_s4 + $0x30] sm:$0xff]  }
 0x306   : > { %3750 = vmatpush1.bf16.msra.mxu0 %v4757_v57  ;;  %4686 = vmatpush1.bf16.msra.mxu1 %v4757_v57 }
 0x307   : > { %v2375_v52 = vpop.permute.xlu0 %2374  ;;  %v2377_v55 = vpop.permute.xlu1 %2376  ;;  %3751 = vmatprep.subr.bf16.mxu0 %v4824_v49  ;;  %4674 = vmatprep.subr.bf16.mxu1 %v4824_v49 }
 0x308   : > { %2405 = vst.msk [vmem:[#allocation2 + $0x30] sm:$0xff] %vm2401_vm15, %v2375_v52  ;;  %2406 = vst.msk [vmem:[#allocation2 + $0x40] sm:$0xff] %vm2401_vm15, %v2377_v55  ;;  %v4759_v52 = vld [vmem:[%s6758_s4 + $0x20] sm:$0xff]  }
 0x309   : > { %2809 = vrot.lane.b32.xlu0 %v4524_v47, %s4797_s12  ;;  %2811 = vrot.lane.b32.xlu1 %v4525_v1, %s4797_s12  ;;  %v4531_v47 = vld [vmem:[%s5123_s20 + $0x27] sm:$0xff]  ;;  %v4532_v1 = vld [vmem:[%s5123_s20 + $0x2f] sm:$0xff] }
 0x30b   : > { %v2379_v0 = vpop.permute.xlu0 %2378  ;;  %v2381_v7 = vpop.permute.xlu1 %2380 }
 0x30c   : > { %2407 = vst.msk [vmem:[#allocation2 + $0x50] sm:$0xff] %vm2401_vm15, %v2379_v0  ;;  %2408 = vst.msk [vmem:[#allocation2 + $0x60] sm:$0xff] %vm2401_vm15, %v2381_v7 }
 0x30d   : > { %2998 = vrot.lane.b32.xlu0 %v4551_v60, %s4800_s25  ;;  %3000 = vrot.lane.b32.xlu1 %v4552_v63, %s4800_s25  ;;  %v4760_v63 = vld [vmem:[%s6758_s4 + $0x18] sm:$0xff]  }
 0x30f   : > { %v2383_v3 = vpop.permute.xlu0 %2382  ;;  %v2385_v4 = vpop.permute.xlu1 %2384 }
 0x310   : > { %2409 = vst.msk [vmem:[#allocation2 + $0x70] sm:$0xff] %vm2401_vm15, %v2383_v3  ;;  %2410 = vst.msk [vmem:[#allocation2 + $0x80] sm:$0xff] %vm2401_vm15, %v2385_v4  ;;  %v4761_v3 = vld [vmem:[%s6758_s4 + $0x10] sm:$0xff]  }
 0x311   : > { %2876 = vrot.lane.b32.xlu0 %v4535_v8, %s4798_s13  ;;  %2878 = vrot.lane.b32.xlu1 %v4536_v15, %s4798_s13  ;;  %v4617_v8 = vld [vmem:[%s4911_s8 + $0x23] sm:$0xff]  ;;  %v4618_v15 = vld [vmem:[%s4911_s8 + $0x2b] sm:$0xff] }
 0x313   : > { %v2387_v10 = vpop.permute.xlu0 %2386  ;;  %v2389_v13 = vpop.permute.xlu1 %2388 }
 0x314   : > { %2411 = vst.msk [vmem:[#allocation2 + $0x90] sm:$0xff] %vm2401_vm15, %v2387_v10  ;;  %2412 = vst.msk [vmem:[#allocation2 + $0xa0] sm:$0xff] %vm2401_vm15, %v2389_v13  ;;  %v4516_v10 = vld [vmem:[%s5123_s20 + $0x5e] sm:$0xff]  ;;  %v4762_v13 = vld [vmem:[%s6758_s4 + $0x8] sm:$0xff]   ;;  %vm6772_vm15 = vcmask 523744  }
 0x315   : > { %3065 = vrot.lane.b32.xlu0 %v4562_v5, %s4801_s26  ;;  %3067 = vrot.lane.b32.xlu1 %v4563_v6, %s4801_s26  ;;  %v4515_v6 = vld [vmem:[%s5123_s20 + $0x56] sm:$0xff] }
 0x317   : > { %v2437_v27 = vpop.permute.xlu0 %2436  ;;  %v2439_v28 = vpop.permute.xlu1 %2438 }
 0x318   : > { %2470 = vst.msk [vmem:[#allocation2] sm:$0xff] %vm2469_vm0, %v2437_v27  ;;  %2471 = vst.msk [vmem:[#allocation2 + $0x10] sm:$0xff] %vm2469_vm0, %v2439_v28  ;;  %v4542_v27 = vld [vmem:[%s5085_s16 + $0x28] sm:$0xff]  ;;  %v4543_v28 = vld [vmem:[%s5085_s16 + $0x30] sm:$0xff] }
 0x319   : > { %2943 = vrot.lane.b32.xlu0 %v4546_v18, %s4799_s17  ;;  %2945 = vrot.lane.b32.xlu1 %v4547_v23, %s4799_s17 }
 0x31b   : > { %v2441_v31 = vpop.permute.xlu0 %2440  ;;  %v2443_v14 = vpop.permute.xlu1 %2442 }
 0x31c   : > { %2472 = vst.msk [vmem:[#allocation2 + $0x20] sm:$0xff] %vm2469_vm0, %v2441_v31  ;;  %2473 = vst.msk [vmem:[#allocation2 + $0x30] sm:$0xff] %vm2469_vm0, %v2443_v14  ;;  %v4763_v31 = vld [vmem:[%s6758_s4] sm:$0xff]  }
 0x31d   : > { %3134 = vrot.lane.b32.xlu0 %v6068_v9, %s4802_s27  ;;  %3136 = vrot.lane.b32.xlu1 %v6076_v17, %s4802_s27  ;;  %v4585_v9 = vld [vmem:[%s4887_s28 + $0x29] sm:$0xff] }
 0x31f   : > { %v2445_v22 = vpop.permute.xlu0 %2444  ;;  %v2447_v25 = vpop.permute.xlu1 %2446 }
 0x320   : > { %2474 = vst.msk [vmem:[#allocation2 + $0x40] sm:$0xff] %vm2469_vm0, %v2445_v22  ;;  %2475 = vst.msk [vmem:[#allocation2 + $0x50] sm:$0xff] %vm2469_vm0, %v2447_v25  ;;  %v4601_v22 = vld [vmem:[%s4911_s8 + $0x52] sm:$0xff]  ;;  %v4602_v25 = vld [vmem:[%s4911_s8 + $0x5a] sm:$0xff] }
 0x321   : > { %3010 = vrot.lane.b32.xlu0 %v4557_v20, %s4800_s25  ;;  %3012 = vrot.lane.b32.xlu1 %v4558_v35, %s4800_s25  ;;  %v4764_v35 = vld [vmem:[%s6758_s4 + $0x60] ss:$0 sps:$4 sm:$0x33]  }
 0x323   : > { %v2449_v30 = vpop.permute.xlu0 %2448  ;;  %v2451_v17 = vpop.permute.xlu1 %2450 }
 0x324   : > { %2476 = vst.msk [vmem:[#allocation2 + $0x60] sm:$0xff] %vm2469_vm0, %v2449_v30  ;;  %2477 = vst.msk [vmem:[#allocation2 + $0x70] sm:$0xff] %vm2469_vm0, %v2451_v17  ;;  %v4628_v17 = vld [vmem:[%s4887_s28 + $0x23] sm:$0xff] }
 0x325   : > { %3201 = vrot.lane.b32.xlu0 %v4584_v29, %s4803_s30  ;;  %3203 = vrot.lane.b32.xlu1 %v4585_v9, %s4803_s30 }
 0x327   : > { %v2453_v37 = vpop.permute.xlu0 %2452  ;;  %v2455_v38 = vpop.permute.xlu1 %2454 }
 0x328   : > { %2478 = vst.msk [vmem:[#allocation2 + $0x80] sm:$0xff] %vm2469_vm0, %v2453_v37  ;;  %2479 = vst.msk [vmem:[#allocation2 + $0x90] sm:$0xff] %vm2469_vm0, %v2455_v38 }
 0x329   : > { %2734 = vrot.lane.b32.xlu0 %v4509_v33, %s4796_s11  ;;  %2736 = vrot.lane.b32.xlu1 %v4510_v34, %s4796_s11  ;;  %v4629_v33 = vld [vmem:[%s4887_s28 + $0x2b] sm:$0xff]  ;;  %v4765_v34 = vld [vmem:[%s6758_s4 + $0x58] sm:$0xff]  }
 0x32b   : > { %v2457_v39 = vpop.permute.xlu0 %2456  ;;  %v2529_v40 = vpop.permute.xlu1 %2528 }
 0x32c   : > { %2480 = vst.msk [vmem:[#allocation2 + $0xa0] sm:$0xff] %vm2469_vm0, %v2457_v39  ;;  %v4766_v39 = vld [vmem:[%s6758_s4 + $0x50] sm:$0xff]   ;;  %vm6773_vm0 = vmmov %vm6772_vm15 }
 0x32d   : > { %2561 = vst.msk [vmem:[#allocation2 + $0x8] sm:$0xff] %vm417_vm1, %v2529_v40  ;;  %3077 = vrot.lane.b32.xlu0 %v4568_v62, %s4801_s26  ;;  %3079 = vrot.lane.b32.xlu1 %v4569_v48, %s4801_s26  ;;  %v4526_v62 = vld [vmem:[%s5085_s16 + $0x57] sm:$0xff]  ;;  %v4527_v48 = vld [vmem:[%s5085_s16 + $0x5f] sm:$0xff] }
 0x32f   : > { %v2531_v56 = vpop.permute.xlu0 %2530  ;;  %v2533_v42 = vpop.permute.xlu1 %2532 }
 0x330   : > { %2562 = vst.msk [vmem:[#allocation2 + $0x18] sm:$0xff] %vm417_vm1, %v2531_v56  ;;  %2563 = vst.msk [vmem:[#allocation2 + $0x28] sm:$0xff] %vm417_vm1, %v2533_v42  ;;  %v4554_v56 = vld [vmem:[%s5123_s20 + $0x30] sm:$0xff]  ;;  %v4767_v42 = vld [vmem:[%s6758_s4 + $0x48] sm:$0xff]  }
 0x331   : > { %3269 = vrot.lane.b32.xlu0 %v4595_v51, %s4804_s7  ;;  %3271 = vrot.lane.b32.xlu1 %v4596_v41, %s4804_s7  ;;  %v4553_v41 = vld [vmem:[%s5123_s20 + $0x28] sm:$0xff] }
 0x333   : > { %v2535_v44 = vpop.permute.xlu0 %2534  ;;  %v2537_v46 = vpop.permute.xlu1 %2536 }
 0x334   : > { %2564 = vst.msk [vmem:[#allocation2 + $0x38] sm:$0xff] %vm417_vm1, %v2535_v44  ;;  %2565 = vst.msk [vmem:[#allocation2 + $0x48] sm:$0xff] %vm417_vm1, %v2537_v46  ;;  %v4612_v44 = vld [vmem:[%s4887_s28 + $0x52] sm:$0xff]  ;;  %v4613_v46 = vld [vmem:[%s4887_s28 + $0x5a] sm:$0xff] }
 0x335   : > { %2801 = vrot.lane.b32.xlu0 %v4520_v59, %s4797_s12  ;;  %2803 = vrot.lane.b32.xlu1 %v4521_v43, %s4797_s12 }
 0x337   : > { %v2539_v53 = vpop.permute.xlu0 %2538  ;;  %v2541_v2 = vpop.permute.xlu1 %2540 }
 0x338   : > { %2566 = vst.msk [vmem:[#allocation2 + $0x58] sm:$0xff] %vm417_vm1, %v2539_v53  ;;  %2567 = vst.msk [vmem:[#allocation2 + $0x68] sm:$0xff] %vm417_vm1, %v2541_v2 }
 0x339   : > { %3146 = vrot.lane.b32.xlu0 %v6098_v32, %s4802_s27  ;;  %3148 = vrot.lane.b32.xlu1 %v6106_v36, %s4802_s27  ;;  %v4758_v32 = vld [vmem:[%s6758_s4 + $0x28] sm:$0xff]  }
 0x33a   : > { %3752 = vmatpush1.bf16.msra.mxu0 %v4758_v32  ;;  %4687 = vmatpush1.bf16.msra.mxu1 %v4758_v32 }
 0x33b   : > { %v2543_v58 = vpop.permute.xlu0 %2542  ;;  %v2545_v45 = vpop.permute.xlu1 %2544  ;;  %3753 = vmatprep.subr.bf16.mxu0 %v4824_v49  ;;  %4675 = vmatprep.subr.bf16.mxu1 %v4824_v49 }
 0x33c   : > { %2568 = vst.msk [vmem:[#allocation2 + $0x78] sm:$0xff] %vm417_vm1, %v2543_v58  ;;  %2569 = vst.msk [vmem:[#allocation2 + $0x88] sm:$0xff] %vm417_vm1, %v2545_v45  ;;  %v4537_v58 = vld [vmem:[%s5123_s20 + $0x57] sm:$0xff]  ;;  %v4538_v45 = vld [vmem:[%s5123_s20 + $0x5f] sm:$0xff] }
 0x33d   : > { %3336 = vrot.lane.b32.xlu0 %v4606_v11, %s4805_s14  ;;  %3338 = vrot.lane.b32.xlu1 %v4607_v54, %s4805_s14  ;;  %v4639_v11 = vld [vmem:[%s4911_s8 + $0x24] sm:$0xff]  ;;  %v4640_v54 = vld [vmem:[%s4911_s8 + $0x2c] sm:$0xff] }
 0x33e   : > { %3754 = vmatpush1.bf16.msra.mxu0 %v4759_v52  ;;  %4688 = vmatpush1.bf16.msra.mxu1 %v4759_v52 }
 0x33f   : > { %v2547_v36 = vpop.permute.xlu0 %2546  ;;  %v2549_v61 = vpop.permute.xlu1 %2548  ;;  %3755 = vmatprep.subr.bf16.mxu0 %v4824_v49  ;;  %4676 = vmatprep.subr.bf16.mxu1 %v4824_v49 }
 0x340   : > { %2570 = vst.msk [vmem:[#allocation2 + $0x98] sm:$0xff] %vm417_vm1, %v2547_v36  ;;  %2571 = vst.msk [vmem:[#allocation2 + $0xa8] sm:$0xff] %vm417_vm1, %v2549_v61  ;;  %vm3743_vm1 = vcmask 1041408   ;;  %v4564_v61 = vld [vmem:[%s5085_s16 + $0x29] sm:$0xff] }
 0x341   : > { %2679 = vrot.lane.b32.xlu0 %v5865_v12, %s4795_s10  ;;  %2681 = vrot.lane.b32.xlu1 %v5874_v16, %s4795_s10  ;;  %v4590_v12 = vld [vmem:[%s4887_s28 + $0x51] sm:$0xff]  ;;  %v4591_v16 = vld [vmem:[%s4887_s28 + $0x59] sm:$0xff]  ;;  %v3745_v30 = vsel %vm3743_vm1, %v4764_v35, 0  ;;  %vm6774_vm1 = vcmask 556544  }
 0x342   : > { %3756 = vmatpush1.bf16.msra.mxu0 %v4760_v63  ;;  %4689 = vmatpush1.bf16.msra.mxu1 %v4760_v63  ;;  %v4548_v63 = vld [vmem:[%s5085_s16 + $0x58] sm:$0xff] }
 0x343   : > { %v2597_v55 = vpop.permute.xlu0 %2596  ;;  %v2599_v60 = vpop.permute.xlu1 %2598  ;;  %3757 = vmatprep.subr.bf16.mxu0 %v4824_v49  ;;  %4677 = vmatprep.subr.bf16.mxu1 %v4824_v49 }
 0x344   : > { %2629 = vst.msk [vmem:[#allocation2 + $0x8] sm:$0xff] %vm486_vm2, %v2597_v55  ;;  %2630 = vst.msk [vmem:[#allocation2 + $0x18] sm:$0xff] %vm486_vm2, %v2599_v60  ;;  %v4623_v55 = vld [vmem:[%s4911_s8 + $0x53] sm:$0xff]  ;;  %v4624_v60 = vld [vmem:[%s4911_s8 + $0x5b] sm:$0xff] }
 0x345   : > { %2868 = vrot.lane.b32.xlu0 %v4531_v47, %s4798_s13  ;;  %2870 = vrot.lane.b32.xlu1 %v4532_v1, %s4798_s13  ;;  %v4565_v47 = vld [vmem:[%s5085_s16 + $0x31] sm:$0xff] }
 0x346   : > { %3758 = vmatpush1.bf16.msra.mxu0 %v4761_v3  ;;  %4690 = vmatpush1.bf16.msra.mxu1 %v4761_v3 }
 0x347   : > { %v2601_v0 = vpop.permute.xlu0 %2600  ;;  %v2603_v7 = vpop.permute.xlu1 %2602  ;;  %3759 = vmatprep.subr.bf16.mxu0 %v4824_v49  ;;  %4678 = vmatprep.subr.bf16.mxu1 %v4824_v49 }
 0x348   : > { %2631 = vst.msk [vmem:[#allocation2 + $0x28] sm:$0xff] %vm486_vm2, %v2601_v0  ;;  %2632 = vst.msk [vmem:[#allocation2 + $0x38] sm:$0xff] %vm486_vm2, %v2603_v7  ;;  %v4549_v0 = vld [vmem:[%s5085_s16 + $0x60] sm:$0xff] }
 0x349   : > { %3213 = vrot.lane.b32.xlu0 %v4590_v12, %s4803_s30  ;;  %3215 = vrot.lane.b32.xlu1 %v4591_v16, %s4803_s30 }
 0x34a   : > { %3760 = vmatpush1.bf16.msra.mxu0 %v4762_v13  ;;  %4691 = vmatpush1.bf16.msra.mxu1 %v4762_v13  ;;  %v4501_v13 = vld [vmem:[%s5085_s16 + $0x3e] sm:$0xff] }
 0x34b   : > { %v2605_v4 = vpop.permute.xlu0 %2604  ;;  %v2607_v5 = vpop.permute.xlu1 %2606  ;;  %3761 = vmatprep.subr.bf16.mxu0 %v4824_v49  ;;  %4679 = vmatprep.subr.bf16.mxu1 %v4824_v49 }
 0x34c   : > { %2633 = vst.msk [vmem:[#allocation2 + $0x48] sm:$0xff] %vm486_vm2, %v2605_v4  ;;  %2634 = vst.msk [vmem:[#allocation2 + $0x58] sm:$0xff] %vm486_vm2, %v2607_v5  ;;  %v4634_v4 = vld [vmem:[%s4887_s28 + $0x53] sm:$0xff]  ;;  %v4635_v5 = vld [vmem:[%s4887_s28 + $0x5b] sm:$0xff] }
 0x34d   : > { %3404 = vrot.lane.b32.xlu0 %v4617_v8, %s4806_s15  ;;  %3406 = vrot.lane.b32.xlu1 %v4618_v15, %s4806_s15 }
 0x34e   : > { %3762 = vmatpush1.bf16.msra.mxu0 %v4763_v31  ;;  %4692 = vmatpush1.bf16.msra.mxu1 %v4763_v31 }
 0x34f   : > { %v2609_v18 = vpop.permute.xlu0 %2608  ;;  %v2611_v23 = vpop.permute.xlu1 %2610  ;;  %3769 = vmatprep.subr.bf16.mxu0 %v4824_v49  ;;  %4680 = vmatprep.subr.bf16.mxu1 %v4824_v49 }
 0x350   : > { %2635 = vst.msk [vmem:[#allocation2 + $0x68] sm:$0xff] %vm486_vm2, %v2609_v18  ;;  %2636 = vst.msk [vmem:[#allocation2 + $0x78] sm:$0xff] %vm486_vm2, %v2611_v23  ;;  %v4560_v23 = vld [vmem:[%s5123_s20 + $0x60] sm:$0xff] }
 0x351   : > { %2746 = vrot.lane.b32.xlu0 %v4515_v6, %s4796_s11  ;;  %2748 = vrot.lane.b32.xlu1 %v4516_v10, %s4796_s11 }
 0x352   : > { %3770 = vmatpush2.bf16.msra.mxu0 %v3745_v30  ;;  %4693 = vmatpush2.bf16.msra.mxu1 %v3745_v30 }
 0x353   : > { %v2613_v14 = vpop.permute.xlu0 %2612  ;;  %v2615_v20 = vpop.permute.xlu1 %2614  ;;  %3771 = vmatprep.subr.bf16.mxu0 %v4824_v49  ;;  %4681 = vmatprep.subr.bf16.mxu1 %v4824_v49 }
 0x354   : > { %2637 = vst.msk [vmem:[#allocation2 + $0x88] sm:$0xff] %vm486_vm2, %v2613_v14  ;;  %2638 = vst.msk [vmem:[#allocation2 + $0x98] sm:$0xff] %vm486_vm2, %v2615_v20  ;;  %v4587_v14 = vld [vmem:[%s4887_s28 + $0x39] sm:$0xff] }
 0x355   : > { %2935 = vrot.lane.b32.xlu0 %v4542_v27, %s4799_s17  ;;  %2937 = vrot.lane.b32.xlu1 %v4543_v28, %s4799_s17  ;;  %v4586_v27 = vld [vmem:[%s4887_s28 + $0x31] sm:$0xff] }
 0x356   : > { %3772 = vmatpush2.bf16.msra.mxu0 %v4765_v34  ;;  %4694 = vmatpush2.bf16.msra.mxu1 %v4765_v34  ;;  %v4645_v20 = vld [vmem:[%s4911_s8 + $0x54] sm:$0xff] }
 0x357   : > { %v2617_v29 = vpop.permute.xlu0 %2616  ;;  %v2664_v9 = vpop.permute.xlu1 %2663  ;;  %3773 = vmatprep.subr.bf16.mxu0 %v4824_v49  ;;  %4682 = vmatprep.subr.bf16.mxu1 %v4824_v49 }
 0x358   : > { %2639 = vst.msk [vmem:[#allocation2 + $0xa8] sm:$0xff] %vm486_vm2, %v2617_v29  ;;  %v4511_v29 = vld [vmem:[%s5123_s20 + $0x36] sm:$0xff]  ;;  %vm6770_vm2 = vcmask 490944  }
 0x359   : > { %2696 = vst.msk [vmem:[#allocation2 + $0x8] sm:$0xff] %vm554_vm3, %v2664_v9  ;;  %3281 = vrot.lane.b32.xlu0 %v4601_v22, %s4804_s7  ;;  %3283 = vrot.lane.b32.xlu1 %v4602_v25, %s4804_s7  ;;  %v4646_v25 = vld [vmem:[%s4911_s8 + $0x5c] sm:$0xff]  ;;  %vm6771_vm14 = vmmov %vm6770_vm2 }
 0x35a   : > { %3774 = vmatpush2.bf16.msra.mxu0 %v4766_v39  ;;  %4695 = vmatpush2.bf16.msra.mxu1 %v4766_v39 }
 0x35b   : > { %v2666_v37 = vpop.permute.xlu0 %2665  ;;  %v2668_v38 = vpop.permute.xlu1 %2667  ;;  %3775 = vmatprep.subr.bf16.mxu0 %v4824_v49  ;;  %4683 = vmatprep.subr.bf16.mxu1 %v4824_v49 }
 0x35c   : > { %2697 = vst.msk [vmem:[#allocation2 + $0x18] sm:$0xff] %vm554_vm3, %v2666_v37  ;;  %2698 = vst.msk [vmem:[#allocation2 + $0x28] sm:$0xff] %vm554_vm3, %v2668_v38  ;;  %v4571_v38 = vld [vmem:[%s5085_s16 + $0x61] sm:$0xff] }
 0x35d   : > { %3471 = vrot.lane.b32.xlu0 %v4628_v17, %s6768_s29  ;;  %3473 = vrot.lane.b32.xlu1 %v4629_v33, %s6768_s29  ;;  %v4512_v17 = vld [vmem:[%s5123_s20 + $0x3e] sm:$0xff] }
 0x35e   : > { %3776 = vmatpush2.bf16.msra.mxu0 %v4767_v42  ;;  %4696 = vmatpush2.bf16.msra.mxu1 %v4767_v42  ;;  %v4570_v33 = vld [vmem:[%s5085_s16 + $0x59] sm:$0xff] }
 0x35f   : > { %v2670_v40 = vpop.permute.xlu0 %2669  ;;  %v2672_v51 = vpop.permute.xlu1 %2671  ;;  %3777 = vmatprep.subr.bf16.mxu0 %v4824_v49  ;;  %4684 = vmatprep.subr.bf16.mxu1 %v4824_v49  ;;  %v4523_v42 = vld [vmem:[%s5085_s16 + $0x3f] sm:$0xff] }
 0x360   : > { %2699 = vst.msk [vmem:[#allocation2 + $0x38] sm:$0xff] %vm554_vm3, %v2670_v40  ;;  %2700 = vst.msk [vmem:[#allocation2 + $0x48] sm:$0xff] %vm554_vm3, %v2672_v51  ;;  %v4598_v40 = vld [vmem:[%s4911_s8 + $0x3a] sm:$0xff] }
 0x361   : > { %2813 = vrot.lane.b32.xlu0 %v4526_v62, %s4797_s12  ;;  %2815 = vrot.lane.b32.xlu1 %v4527_v48, %s4797_s12  ;;  %v4597_v62 = vld [vmem:[%s4911_s8 + $0x32] sm:$0xff] }
 0x362   : > { %3778 = vmatpush2.bf16.msra.mxu0 %v4768_v50  ;;  %4697 = vmatpush2.bf16.msra.mxu1 %v4768_v50  ;;  %v4522_v51 = vld [vmem:[%s5085_s16 + $0x37] sm:$0xff] }
 0x363   : > { %v2731_v59 = vpop.permute.xlu0 %2730  ;;  %v2733_v43 = vpop.permute.xlu1 %2732 }
 0x364   : > { %2763 = vst.msk [vmem:[#allocation2 + $0x8] sm:$0xff] %vm623_vm4, %v2731_v59  ;;  %2764 = vst.msk [vmem:[#allocation2 + $0x18] sm:$0xff] %vm623_vm4, %v2733_v43 }
 0x365   : > { %3002 = vrot.lane.b32.xlu0 %v4553_v41, %s4800_s25  ;;  %3004 = vrot.lane.b32.xlu1 %v4554_v56, %s4800_s25 }
 0x367   : > { %v2798_v53 = vpop.permute.xlu0 %2797  ;;  %v2800_v2 = vpop.permute.xlu1 %2799 }
 0x368   : > { %2830 = vst.msk [vmem:[#allocation2 + $0x8] sm:$0xff] %vm691_vm5, %v2798_v53  ;;  %2831 = vst.msk [vmem:[#allocation2 + $0x18] sm:$0xff] %vm691_vm5, %v2800_v2  ;;  %v4609_v53 = vld [vmem:[%s4887_s28 + $0x3a] sm:$0xff]  ;;  %v4506_v2 = vld [vmem:[%s5085_s16 + $0x66] sm:$0xff] }
 0x369   : > { %3348 = vrot.lane.b32.xlu0 %v4612_v44, %s4805_s14  ;;  %3350 = vrot.lane.b32.xlu1 %v4613_v46, %s4805_s14  ;;  %v4608_v44 = vld [vmem:[%s4887_s28 + $0x32] sm:$0xff] }
 0x36b   : > { %v2676_v57 = vpop.permute.xlu0 %2675  ;;  %v2678_v49 = vpop.permute.xlu1 %2677 }
 0x36c   : > { %2702 = vst.msk [vmem:[#allocation2 + $0x68] sm:$0xff] %vm554_vm3, %v2676_v57  ;;  %2703 = vst.msk [vmem:[#allocation2 + $0x78] sm:$0xff] %vm554_vm3, %v2678_v49  ;;  %v4534_v57 = vld [vmem:[%s5123_s20 + $0x3f] sm:$0xff] }
 0x36d   : > { %3539 = vrot.lane.b32.xlu0 %v4639_v11, %s6769_s9  ;;  %3541 = vrot.lane.b32.xlu1 %v4640_v54, %s6769_s9  ;;  %v4533_v54 = vld [vmem:[%s5123_s20 + $0x37] sm:$0xff] }
 0x36f   : > { %v2865_v32 = vpop.permute.xlu0 %2864  ;;  %v2867_v36 = vpop.permute.xlu1 %2866 }
 0x370   : > { %2897 = vst.msk [vmem:[#allocation2 + $0x8] sm:$0xff] %vm760_vm6, %v2865_v32  ;;  %2898 = vst.msk [vmem:[#allocation2 + $0x18] sm:$0xff] %vm760_vm6, %v2867_v36 }
 0x371   : > { %2880 = vrot.lane.b32.xlu0 %v4537_v58, %s4798_s13  ;;  %2882 = vrot.lane.b32.xlu1 %v4538_v45, %s4798_s13  ;;  %v4592_v58 = vld [vmem:[%s4887_s28 + $0x61] sm:$0xff]  ;;  %v4593_v45 = vld [vmem:[%s4887_s28 + $0x69] sm:$0xff] }
 0x373   : > { %v2743_v1 = vpop.permute.xlu0 %2742  ;;  %v2745_v52 = vpop.permute.xlu1 %2744 }
 0x374   : > { %2769 = vst.msk [vmem:[#allocation2 + $0x68] sm:$0xff] %vm623_vm4, %v2743_v1  ;;  %2770 = vst.msk [vmem:[#allocation2 + $0x78] sm:$0xff] %vm623_vm4, %v2745_v52 }
 0x375   : > { %3069 = vrot.lane.b32.xlu0 %v4564_v61, %s4801_s26  ;;  %3071 = vrot.lane.b32.xlu1 %v4565_v47, %s4801_s26  ;;  %v4619_v61 = vld [vmem:[%s4911_s8 + $0x33] sm:$0xff]  ;;  %v4620_v47 = vld [vmem:[%s4911_s8 + $0x3b] sm:$0xff] }
 0x377   : > { %v2932_v12 = vpop.permute.xlu0 %2931  ;;  %v2934_v16 = vpop.permute.xlu1 %2933 }
 0x378   : > { %2964 = vst.msk [vmem:[#allocation2 + $0x8] sm:$0xff] %vm828_vm7, %v2932_v12  ;;  %2965 = vst.msk [vmem:[#allocation2 + $0x18] sm:$0xff] %vm828_vm7, %v2934_v16 }
 0x379   : > { %3416 = vrot.lane.b32.xlu0 %v4623_v55, %s4806_s15  ;;  %3418 = vrot.lane.b32.xlu1 %v4624_v60, %s4806_s15  ;;  %v4517_v55 = vld [vmem:[%s5123_s20 + $0x66] sm:$0xff]  ;;  %v4544_v60 = vld [vmem:[%s5085_s16 + $0x38] sm:$0xff] }
 0x37b   : > { %v2810_v7 = vpop.permute.xlu0 %2809  ;;  %v2812_v8 = vpop.permute.xlu1 %2811 }
 0x37c   : > { %2836 = vst.msk [vmem:[#allocation2 + $0x68] sm:$0xff] %vm691_vm5, %v2810_v7  ;;  %2837 = vst.msk [vmem:[#allocation2 + $0x78] sm:$0xff] %vm691_vm5, %v2812_v8 }
 0x37d   : > { %2947 = vrot.lane.b32.xlu0 %v4548_v63, %s4799_s17  ;;  %2949 = vrot.lane.b32.xlu1 %v4549_v0, %s4799_s17  ;;  %v4545_v63 = vld [vmem:[%s5085_s16 + $0x40] sm:$0xff] }
 0x37e   : > { %v4603_v0 = vld [vmem:[%s4911_s8 + $0x62] sm:$0xff] }
 0x37f   : > { %v2999_v15 = vpop.permute.xlu0 %2998  ;;  %v3001_v3 = vpop.permute.xlu1 %3000 }
 0x380   : > { %3031 = vst.msk [vmem:[#allocation2 + $0x8] sm:$0xff] %vm896_vm8, %v2999_v15  ;;  %3032 = vst.msk [vmem:[#allocation2 + $0x18] sm:$0xff] %vm896_vm8, %v3001_v3  ;;  %v4604_v15 = vld [vmem:[%s4911_s8 + $0x6a] sm:$0xff]  ;;  %v4630_v3 = vld [vmem:[%s4887_s28 + $0x33] sm:$0xff] }
 0x381   : > { %3138 = vrot.lane.b32.xlu0 %v6079_v19, %s4802_s27  ;;  %3140 = vrot.lane.b32.xlu1 %v6088_v24, %s4802_s27  ;;  %v4559_v19 = vld [vmem:[%s5123_s20 + $0x58] sm:$0xff] }
 0x383   : > { %v2877_v6 = vpop.permute.xlu0 %2876  ;;  %v2879_v10 = vpop.permute.xlu1 %2878 }
 0x384   : > { %2903 = vst.msk [vmem:[#allocation2 + $0x68] sm:$0xff] %vm760_vm6, %v2877_v6  ;;  %2904 = vst.msk [vmem:[#allocation2 + $0x78] sm:$0xff] %vm760_vm6, %v2879_v10  ;;  %v4631_v6 = vld [vmem:[%s4887_s28 + $0x3b] sm:$0xff]  ;;  %v4528_v10 = vld [vmem:[%s5085_s16 + $0x67] sm:$0xff] }
 0x385   : > { %3483 = vrot.lane.b32.xlu0 %v4634_v4, %s6768_s29  ;;  %3485 = vrot.lane.b32.xlu1 %v4635_v5, %s6768_s29 }
 0x387   : > { %v3066_v18 = vpop.permute.xlu0 %3065  ;;  %v3068_v24 = vpop.permute.xlu1 %3067 }
 0x388   : > { %3098 = vst.msk [vmem:[#allocation2 + $0x8] sm:$0xff] %vm964_vm9, %v3066_v18  ;;  %3099 = vst.msk [vmem:[#allocation2 + $0x18] sm:$0xff] %vm964_vm9, %v3068_v24  ;;  %v4555_v18 = vld [vmem:[%s5123_s20 + $0x38] sm:$0xff]  ;;  %v4556_v24 = vld [vmem:[%s5123_s20 + $0x40] sm:$0xff] }
 0x389   : > { %2673 = vrot.lane.b32.xlu0 %v4501_v13, %s4795_s10  ;;  %3014 = vrot.lane.b32.xlu1 %v4559_v19, %s4800_s25 }
 0x38b   : > { %v2944_v28 = vpop.permute.xlu0 %2943  ;;  %v2946_v31 = vpop.permute.xlu1 %2945 }
 0x38c   : > { %2970 = vst.msk [vmem:[#allocation2 + $0x68] sm:$0xff] %vm828_vm7, %v2944_v28  ;;  %2971 = vst.msk [vmem:[#allocation2 + $0x78] sm:$0xff] %vm828_vm7, %v2946_v31  ;;  %v4614_v28 = vld [vmem:[%s4887_s28 + $0x62] sm:$0xff]  ;;  %v4615_v31 = vld [vmem:[%s4887_s28 + $0x6a] sm:$0xff] }
 0x38d   : > { %3016 = vrot.lane.b32.xlu0 %v4560_v23, %s4800_s25  ;;  %3205 = vrot.lane.b32.xlu1 %v4586_v27, %s4803_s30 }
 0x38f   : > { %v3135_v35 = vpop.permute.xlu0 %3134  ;;  %v3137_v22 = vpop.permute.xlu1 %3136 }
 0x390   : > { %3167 = vst.msk [vmem:[#allocation2 + $0x8] sm:$0xff] %vm1032_vm10, %v3135_v35  ;;  %3168 = vst.msk [vmem:[#allocation2 + $0x18] sm:$0xff] %vm1032_vm10, %v3137_v22  ;;  %v4641_v35 = vld [vmem:[%s4911_s8 + $0x34] sm:$0xff]  ;;  %v4642_v22 = vld [vmem:[%s4911_s8 + $0x3c] sm:$0xff] }
 0x391   : > { %3207 = vrot.lane.b32.xlu0 %v4587_v14, %s4803_s30  ;;  %3551 = vrot.lane.b32.xlu1 %v4645_v20, %s6769_s9 }
 0x393   : > { %v3011_v9 = vpop.permute.xlu0 %3010  ;;  %v3013_v30 = vpop.permute.xlu1 %3012 }
 0x394   : > { %3037 = vst.msk [vmem:[#allocation2 + $0x68] sm:$0xff] %vm896_vm8, %v3011_v9  ;;  %3038 = vst.msk [vmem:[#allocation2 + $0x78] sm:$0xff] %vm896_vm8, %v3013_v30  ;;  %v4539_v9 = vld [vmem:[%s5123_s20 + $0x67] sm:$0xff]  ;;  %v4566_v30 = vld [vmem:[%s5085_s16 + $0x39] sm:$0xff] }
 0x395   : > { %3553 = vrot.lane.b32.xlu0 %v4646_v25, %s6769_s9  ;;  %2738 = vrot.lane.b32.xlu1 %v4511_v29, %s4796_s11 }
 0x397   : > { %v3202_v34 = vpop.permute.xlu0 %3201  ;;  %v3204_v37 = vpop.permute.xlu1 %3203 }
 0x398   : > { %3234 = vst.msk [vmem:[#allocation2 + $0x8] sm:$0xff] %vm1100_vm11, %v3202_v34  ;;  %3235 = vst.msk [vmem:[#allocation2 + $0x18] sm:$0xff] %vm1100_vm11, %v3204_v37  ;;  %v4567_v34 = vld [vmem:[%s5085_s16 + $0x41] sm:$0xff] }
 0x399   : > { %2740 = vrot.lane.b32.xlu0 %v4512_v17, %s4796_s11  ;;  %3081 = vrot.lane.b32.xlu1 %v4570_v33, %s4801_s26  ;;  %v4625_v37 = vld [vmem:[%s4911_s8 + $0x63] sm:$0xff] }
 0x39b   : > { %v2735_v48 = vpop.permute.xlu0 %2734  ;;  %v2737_v39 = vpop.permute.xlu1 %2736 }
 0x39c   : > { %2765 = vst.msk [vmem:[#allocation2 + $0x28] sm:$0xff] %vm623_vm4, %v2735_v48  ;;  %2766 = vst.msk [vmem:[#allocation2 + $0x38] sm:$0xff] %vm623_vm4, %v2737_v39  ;;  %v4626_v48 = vld [vmem:[%s4911_s8 + $0x6b] sm:$0xff] }
 0x39d   : > { %3083 = vrot.lane.b32.xlu0 %v4571_v38, %s4801_s26  ;;  %3273 = vrot.lane.b32.xlu1 %v4597_v62, %s4804_s7  ;;  %v4550_v39 = vld [vmem:[%s5085_s16 + $0x68] sm:$0xff] }
 0x39f   : > { %v3078_v41 = vpop.permute.xlu0 %3077  ;;  %v3080_v56 = vpop.permute.xlu1 %3079 }
 0x3a0   : > { %3104 = vst.msk [vmem:[#allocation2 + $0x68] sm:$0xff] %vm964_vm9, %v3078_v41  ;;  %3105 = vst.msk [vmem:[#allocation2 + $0x78] sm:$0xff] %vm964_vm9, %v3080_v56  ;;  %v4577_v41 = vld [vmem:[%s4911_s8 + $0x41] sm:$0xff]  ;;  %v4578_v56 = vld [vmem:[%s4911_s8 + $0x49] sm:$0xff] }
 0x3a1   : > { %3275 = vrot.lane.b32.xlu0 %v4598_v40, %s4804_s7  ;;  %2805 = vrot.lane.b32.xlu1 %v4522_v51, %s4797_s12 }
 0x3a3   : > { %v3270_v59 = vpop.permute.xlu0 %3269  ;;  %v3272_v43 = vpop.permute.xlu1 %3271 }
 0x3a4   : > { %3302 = vst.msk [vmem:[#allocation2 + $0x8] sm:$0xff] %vm1168_vm12, %v3270_v59  ;;  %3303 = vst.msk [vmem:[#allocation2 + $0x18] sm:$0xff] %vm1168_vm12, %v3272_v43  ;;  %v3583_v43 = vld [vmem:[#allocation2] sm:$0xff] }
 0x3a5   : > { %2807 = vrot.lane.b32.xlu0 %v4523_v42, %s4797_s12  ;;  %3150 = vrot.lane.b32.xlu1 %v6109_v21, %s4802_s27 }
 0x3a7   : > { %v2802_v46 = vpop.permute.xlu0 %2801  ;;  %v2804_v50 = vpop.permute.xlu1 %2803 }
 0x3a8   : > { %2832 = vst.msk [vmem:[#allocation2 + $0x28] sm:$0xff] %vm691_vm5, %v2802_v46  ;;  %2833 = vst.msk [vmem:[#allocation2 + $0x38] sm:$0xff] %vm691_vm5, %v2804_v50  ;;  %v4637_v46 = vld [vmem:[%s4887_s28 + $0x6b] sm:$0xff] }
 0x3a9   : > { %3152 = vrot.lane.b32.xlu0 %v6118_v26, %s4802_s27  ;;  %3340 = vrot.lane.b32.xlu1 %v4608_v44, %s4805_s14  ;;  %v4636_v44 = vld [vmem:[%s4887_s28 + $0x63] sm:$0xff]  ;;  %v3585_v50 = vld [vmem:[#allocation2 + $0x10] sm:$0xff] }
 0x3ab   : > { %v3147_v11 = vpop.permute.xlu0 %3146  ;;  %v3149_v21 = vpop.permute.xlu1 %3148 }
 0x3ac   : > { %3173 = vst.msk [vmem:[#allocation2 + $0x68] sm:$0xff] %vm1032_vm10, %v3147_v11  ;;  %3174 = vst.msk [vmem:[#allocation2 + $0x78] sm:$0xff] %vm1032_vm10, %v3149_v21 }
 0x3ad   : > { %3342 = vrot.lane.b32.xlu0 %v4609_v53, %s4805_s14  ;;  %2683 = vrot.lane.b32.xlu1 %v4506_v2, %s4795_s10 }
 0x3af   : > { %v3337_v26 = vpop.permute.xlu0 %3336  ;;  %v3339_v49 = vpop.permute.xlu1 %3338 }
 0x3b0   : > { %3369 = vst.msk [vmem:[#allocation2 + $0x8] sm:$0xff] %vm1236_vm13, %v3337_v26  ;;  %3370 = vst.msk [vmem:[#allocation2 + $0x18] sm:$0xff] %vm1236_vm13, %v3339_v49  ;;  %v4561_v26 = vld [vmem:[%s5123_s20 + $0x68] sm:$0xff] }
 0x3b1   : > { %2872 = vrot.lane.b32.xlu0 %v4533_v54, %s4798_s13  ;;  %2874 = vrot.lane.b32.xlu1 %v4534_v57, %s4798_s13  ;;  %v3605_v57 = vpack.c.bf16 %v3585_v50, %v3583_v43  ;;  %v4588_v49 = vld [vmem:[%s4887_s28 + $0x41] sm:$0xff] }
 0x3b3   : > { %v2680_v32 = vpop.permute.xlu0 %2679  ;;  %v2682_v36 = vpop.permute.xlu1 %2681 }
 0x3b4   : > { %2704 = vst.msk [vmem:[#allocation2 + $0x88] sm:$0xff] %vm554_vm3, %v2680_v32  ;;  %2705 = vst.msk [vmem:[#allocation2 + $0x98] sm:$0xff] %vm554_vm3, %v2682_v36  ;;  %v4589_v32 = vld [vmem:[%s4887_s28 + $0x49] sm:$0xff] }
 0x3b5   : > { %3217 = vrot.lane.b32.xlu0 %v4592_v58, %s4803_s30  ;;  %3219 = vrot.lane.b32.xlu1 %v4593_v45, %s4803_s30  ;;  %v4647_v36 = vld [vmem:[%s4911_s8 + $0x64] sm:$0xff] }
 0x3b7   : > { %v2869_v1 = vpop.permute.xlu0 %2868  ;;  %v2871_v52 = vpop.permute.xlu1 %2870 }
 0x3b8   : > { %2899 = vst.msk [vmem:[#allocation2 + $0x28] sm:$0xff] %vm760_vm6, %v2869_v1  ;;  %2900 = vst.msk [vmem:[#allocation2 + $0x38] sm:$0xff] %vm760_vm6, %v2871_v52  ;;  %v4648_v1 = vld [vmem:[%s4911_s8 + $0x6c] sm:$0xff] }
 0x3b9   : > { %3408 = vrot.lane.b32.xlu0 %v4619_v61, %s4806_s15  ;;  %3410 = vrot.lane.b32.xlu1 %v4620_v47, %s4806_s15  ;;  %v4572_v52 = vld [vmem:[%s5085_s16 + $0x69] sm:$0xff] }
 0x3bb   : > { %v3214_v12 = vpop.permute.xlu0 %3213  ;;  %v3216_v16 = vpop.permute.xlu1 %3215 }
 0x3bc   : > { %3240 = vst.msk [vmem:[#allocation2 + $0x68] sm:$0xff] %vm1100_vm11, %v3214_v12  ;;  %3241 = vst.msk [vmem:[#allocation2 + $0x78] sm:$0xff] %vm1100_vm11, %v3216_v16  ;;  %v4599_v12 = vld [vmem:[%s4911_s8 + $0x42] sm:$0xff]  ;;  %v4600_v16 = vld [vmem:[%s4911_s8 + $0x4a] sm:$0xff] }
 0x3bd   : > { %2750 = vrot.lane.b32.xlu0 %v4517_v55, %s4796_s11  ;;  %2939 = vrot.lane.b32.xlu1 %v4544_v60, %s4799_s17 }
 0x3bf   : > { %v3405_v7 = vpop.permute.xlu0 %3404  ;;  %v3407_v8 = vpop.permute.xlu1 %3406 }
 0x3c0   : > { %3437 = vst.msk [vmem:[#allocation2 + $0x8] sm:$0xff] %vm6770_vm2, %v3405_v7  ;;  %vm6775_vm2 = vmmov %vm6774_vm1  ;;  %v4583_v7 = vld [vmem:[%s4911_s8 + $0x71] sm:$0xff] }
 0x3c1   : > { %3438 = vst.msk [vmem:[#allocation2 + $0x18] sm:$0xff] %vm6771_vm14, %v3407_v8  ;;  %2941 = vrot.lane.b32.xlu0 %v4545_v63, %s4799_s17  ;;  %3285 = vrot.lane.b32.xlu1 %v4603_v0, %s4804_s7  ;;  %vm3724_vm14 = vcmask 556032   ;;  %v4610_v8 = vld [vmem:[%s4887_s28 + $0x42] sm:$0xff] }
 0x3c3   : > { %v2747_v4 = vpop.permute.xlu0 %2746  ;;  %v2749_v5 = vpop.permute.xlu1 %2748 }
 0x3c4   : > { %2771 = vst.msk [vmem:[#allocation2 + $0x88] sm:$0xff] %vm623_vm4, %v2747_v4  ;;  %2772 = vst.msk [vmem:[#allocation2 + $0x98] sm:$0xff] %vm623_vm4, %v2749_v5  ;;  %v4611_v4 = vld [vmem:[%s4887_s28 + $0x4a] sm:$0xff] }
 0x3c5   : > { %3287 = vrot.lane.b32.xlu0 %v4604_v15, %s4804_s7  ;;  %3475 = vrot.lane.b32.xlu1 %v4630_v3, %s6768_s29  ;;  %v4594_v5 = vld [vmem:[%s4887_s28 + $0x71] sm:$0xff] }
 0x3c7   : > { %v2936_v13 = vpop.permute.xlu0 %2935  ;;  %v2938_v19 = vpop.permute.xlu1 %2937 }
 0x3c8   : > { %2966 = vst.msk [vmem:[#allocation2 + $0x28] sm:$0xff] %vm828_vm7, %v2936_v13  ;;  %2967 = vst.msk [vmem:[#allocation2 + $0x38] sm:$0xff] %vm828_vm7, %v2938_v19  ;;  %v4621_v13 = vld [vmem:[%s4911_s8 + $0x43] sm:$0xff]  ;;  %v4622_v19 = vld [vmem:[%s4911_s8 + $0x4b] sm:$0xff] }
 0x3c9   : > { %3477 = vrot.lane.b32.xlu0 %v4631_v6, %s6768_s29  ;;  %2817 = vrot.lane.b32.xlu1 %v4528_v10, %s4797_s12 }
 0x3cb   : > { %v3282_v23 = vpop.permute.xlu0 %3281  ;;  %v3284_v27 = vpop.permute.xlu1 %3283 }
 0x3cc   : > { %3308 = vst.msk [vmem:[#allocation2 + $0x68] sm:$0xff] %vm1168_vm12, %v3282_v23  ;;  %3309 = vst.msk [vmem:[#allocation2 + $0x78] sm:$0xff] %vm1168_vm12, %v3284_v27  ;;  %v4605_v23 = vld [vmem:[%s4911_s8 + $0x72] sm:$0xff]  ;;  %v4632_v27 = vld [vmem:[%s4887_s28 + $0x43] sm:$0xff] }
 0x3cd   : > { %3006 = vrot.lane.b32.xlu0 %v4555_v18, %s4800_s25  ;;  %3008 = vrot.lane.b32.xlu1 %v4556_v24, %s4800_s25 }
 0x3cf   : > { %v3472_v14 = vpop.permute.xlu0 %3471  ;;  %v3474_v20 = vpop.permute.xlu1 %3473 }
 0x3d0   : > { %3504 = vst.msk [vmem:[#allocation2 + $0x8] sm:$0xff] %vm6772_vm15, %v3472_v14  ;;  %vm6776_vm15 = vcmask 490944   ;;  %v4633_v14 = vld [vmem:[%s4887_s28 + $0x4b] sm:$0xff] }
 0x3d1   : > { %3505 = vst.msk [vmem:[#allocation2 + $0x18] sm:$0xff] %vm6773_vm0, %v3474_v20  ;;  %3352 = vrot.lane.b32.xlu0 %v4614_v28, %s4805_s14  ;;  %3354 = vrot.lane.b32.xlu1 %v4615_v31, %s4805_s14  ;;  %vm6777_vm0 = vmmov %vm6776_vm15  ;;  %v4616_v20 = vld [vmem:[%s4887_s28 + $0x72] sm:$0xff] }
 0x3d3   : > { %v2814_v25 = vpop.permute.xlu0 %2813  ;;  %v2816_v29 = vpop.permute.xlu1 %2815 }
 0x3d4   : > { %2838 = vst.msk [vmem:[#allocation2 + $0x88] sm:$0xff] %vm691_vm5, %v2814_v25  ;;  %2839 = vst.msk [vmem:[#allocation2 + $0x98] sm:$0xff] %vm691_vm5, %v2816_v29  ;;  %v3595_v29 = vld [vmem:[#allocation2 + $0x60] sm:$0xff] }
 0x3d5   : > { %3543 = vrot.lane.b32.xlu0 %v4641_v35, %s6769_s9  ;;  %3545 = vrot.lane.b32.xlu1 %v4642_v22, %s6769_s9 }
 0x3d7   : > { %v3003_v17 = vpop.permute.xlu0 %3002  ;;  %v3005_v33 = vpop.permute.xlu1 %3004 }
 0x3d8   : > { %3033 = vst.msk [vmem:[#allocation2 + $0x28] sm:$0xff] %vm896_vm8, %v3003_v17  ;;  %3034 = vst.msk [vmem:[#allocation2 + $0x38] sm:$0xff] %vm896_vm8, %v3005_v33  ;;  %v3597_v17 = vld [vmem:[#allocation2 + $0x70] sm:$0xff] }
 0x3d9   : > { %2884 = vrot.lane.b32.xlu0 %v4539_v9, %s4798_s13  ;;  %3073 = vrot.lane.b32.xlu1 %v4566_v30, %s4801_s26  ;;  %v4643_v9 = vld [vmem:[%s4911_s8 + $0x44] sm:$0xff]  ;;  %v4644_v30 = vld [vmem:[%s4911_s8 + $0x4c] sm:$0xff] }
 0x3db   : > { %v3349_v38 = vpop.permute.xlu0 %3348  ;;  %v3351_v62 = vpop.permute.xlu1 %3350 }
 0x3dc   : > { %3375 = vst.msk [vmem:[#allocation2 + $0x68] sm:$0xff] %vm1236_vm13, %v3349_v38  ;;  %3376 = vst.msk [vmem:[#allocation2 + $0x78] sm:$0xff] %vm1236_vm13, %v3351_v62  ;;  %v3611_v62 = vpack.c.bf16 %v3597_v17, %v3595_v29 }
 0x3dd   : > { %3075 = vrot.lane.b32.xlu0 %v4567_v34, %s4801_s26  ;;  %3420 = vrot.lane.b32.xlu1 %v4625_v37, %s4806_s15 }
 0x3df   : > { %v3540_v40 = vpop.permute.xlu0 %3539  ;;  %v3542_v51 = vpop.permute.xlu1 %3541 }
 0x3e0   : > { %3572 = vst.msk [vmem:[#allocation2 + $0x8] sm:$0xff] %vm6774_vm1, %v3540_v40  ;;  %vm6778_vm1 = vcmask 523744  }
 0x3e1   : > { %3573 = vst.msk [vmem:[#allocation2 + $0x18] sm:$0xff] %vm6775_vm2, %v3542_v51  ;;  %3422 = vrot.lane.b32.xlu0 %v4626_v48, %s4806_s15  ;;  %2951 = vrot.lane.b32.xlu1 %v4550_v39, %s4799_s17  ;;  %vm6779_vm2 = vmmov %vm6778_vm1  ;;  %v4627_v48 = vld [vmem:[%s4911_s8 + $0x73] sm:$0xff] }
 0x3e2   : > { %v4638_v39 = vld [vmem:[%s4887_s28 + $0x73] sm:$0xff]  ;;  %s4699_s28 = smul.u32 88, %s6807_s21 }
 0x3e3   : > { %v2881_v42 = vpop.permute.xlu0 %2880  ;;  %v2883_v59 = vpop.permute.xlu1 %2882 }
 0x3e4   : > { %2905 = vst.msk [vmem:[#allocation2 + $0x88] sm:$0xff] %vm760_vm6, %v2881_v42  ;;  %2906 = vst.msk [vmem:[#allocation2 + $0x98] sm:$0xff] %vm760_vm6, %v2883_v59  ;;  %s6721_s13 = scalar_lea.vmem %s6760_s6, %s4699_s28 }
 0x3e5   : > { %3142 = vrot.lane.b32.xlu0 %v4577_v41, %s4802_s27  ;;  %3144 = vrot.lane.b32.xlu1 %v4578_v56, %s4802_s27  ;;  %v4649_v41 = vld [vmem:[%s4911_s8 + $0x74] sm:$0xff] }
 0x3e7   : > { %v3070_v53 = vpop.permute.xlu0 %3069  ;;  %v3072_v2 = vpop.permute.xlu1 %3071  ;;  %v3584_v11 = vld [vmem:[#allocation2 + $0x8] sm:$0xff] }
 0x3e8   : > { %v3586_v21 = vld [vmem:[#allocation2 + $0x18] sm:$0xff]  ;;  %3100 = vst.msk [vmem:[#allocation2 + $0x28] sm:$0xff] %vm964_vm9, %v3070_v53  ;;  %3101 = vst.msk [vmem:[#allocation2 + $0x38] sm:$0xff] %vm964_vm9, %v3072_v2 }
 0x3e9   : > { %v3606_v54 = vpack.c.bf16 %v3586_v21, %v3584_v11  ;;  %3487 = vrot.lane.b32.xlu0 %v4636_v44, %s6768_s29  ;;  %3489 = vrot.lane.b32.xlu1 %v4637_v46, %s6768_s29 }
 0x3eb   : > { %4664 = vmatprep.mubr.msk.bf16.mxu0 %vm3724_vm14, %v3606_v54  ;;  %v3417_v58 = vpop.permute.xlu0 %3416  ;;  %v3419_v45 = vpop.permute.xlu1 %3418 }
 0x3ec   : > { %3780 = vmatmul.mubr.bf16.vlgmr.msra.gmra.mxu0 %v3605_v57  ;;  %3443 = vst.msk [vmem:[#allocation2 + $0x68] sm:$0xff] %vm6776_vm15, %v3417_v58  ;;  %vm6780_vm15 = vcmask 556544  }
 0x3ed   : > { %3444 = vst.msk [vmem:[#allocation2 + $0x78] sm:$0xff] %vm6777_vm0, %v3419_v45  ;;  %3018 = vrot.lane.b32.xlu0 %v4561_v26, %s4800_s25  ;;  %3209 = vrot.lane.b32.xlu1 %v4588_v49, %s4803_s30  ;;  %vm6781_vm0 = vmmov %vm6780_vm15 }
 0x3ef   : > { %v2948_v61 = vpop.permute.xlu0 %2947  ;;  %v2950_v47 = vpop.permute.xlu1 %2949 }
 0x3f0   : > { %2972 = vst.msk [vmem:[#allocation2 + $0x88] sm:$0xff] %vm828_vm7, %v2948_v61  ;;  %2973 = vst.msk [vmem:[#allocation2 + $0x98] sm:$0xff] %vm828_vm7, %v2950_v47 }
 0x3f1   : > { %3211 = vrot.lane.b32.xlu0 %v4589_v32, %s4803_s30  ;;  %3555 = vrot.lane.b32.xlu1 %v4647_v36, %s6769_s9 }
 0x3f3   : > { %v3139_v55 = vpop.permute.xlu0 %3138  ;;  %v3141_v60 = vpop.permute.xlu1 %3140 }
 0x3f4   : > { %3169 = vst.msk [vmem:[#allocation2 + $0x28] sm:$0xff] %vm1032_vm10, %v3139_v55  ;;  %3170 = vst.msk [vmem:[#allocation2 + $0x38] sm:$0xff] %vm1032_vm10, %v3141_v60 }
 0x3f5   : > { %3557 = vrot.lane.b32.xlu0 %v4648_v1, %s6769_s9  ;;  %3085 = vrot.lane.b32.xlu1 %v4572_v52, %s4801_s26 }
 0x3f7   : > { %v3484_v63 = vpop.permute.xlu0 %3483  ;;  %v3486_v0 = vpop.permute.xlu1 %3485 }
 0x3f8   : > { %3510 = vst.msk [vmem:[#allocation2 + $0x68] sm:$0xff] %vm6778_vm1, %v3484_v63  ;;  %vm6782_vm1 = vcmask 490944  }
 0x3f9   : > { %3511 = vst.msk [vmem:[#allocation2 + $0x78] sm:$0xff] %vm6779_vm2, %v3486_v0  ;;  %3277 = vrot.lane.b32.xlu0 %v4599_v12, %s4804_s7  ;;  %3279 = vrot.lane.b32.xlu1 %v4600_v16, %s4804_s7  ;;  %vm6783_vm2 = vmmov %vm6782_vm1  ;;  %v3587_v0 = vld [vmem:[#allocation2 + $0x20] sm:$0xff] }
 0x3fb   : > { %v2674_v15 = vpop.permute.xlu0 %2673  ;;  %v3015_v3 = vpop.permute.xlu1 %3014 }
 0x3fc   : > { %2701 = vst.msk [vmem:[#allocation2 + $0x58] sm:$0xff] %vm554_vm3, %v2674_v15 }
 0x3fd   : > { %3039 = vst.msk [vmem:[#allocation2 + $0x88] sm:$0xff] %vm896_vm8, %v3015_v3  ;;  %3154 = vrot.lane.b32.xlu0 %v4583_v7, %s4802_s27  ;;  %3344 = vrot.lane.b32.xlu1 %v4610_v8, %s4805_s14  ;;  %v3589_v7 = vld [vmem:[#allocation2 + $0x30] sm:$0xff] }
 0x3ff   : > { %v3017_v6 = vpop.permute.xlu0 %3016  ;;  %v3206_v10 = vpop.permute.xlu1 %3205 }
 0x400   : > { %3040 = vst.msk [vmem:[#allocation2 + $0x98] sm:$0xff] %vm896_vm8, %v3017_v6  ;;  %v3607_v6 = vpack.c.bf16 %v3589_v7, %v3587_v0 }
 0x401   : > { %3236 = vst.msk [vmem:[#allocation2 + $0x28] sm:$0xff] %vm1100_vm11, %v3206_v10  ;;  %3346 = vrot.lane.b32.xlu0 %v4611_v4, %s4805_s14  ;;  %3221 = vrot.lane.b32.xlu1 %v4594_v5, %s4803_s30 }
 0x403   : > { %v3208_v18 = vpop.permute.xlu0 %3207  ;;  %v3552_v24 = vpop.permute.xlu1 %3551 }
 0x404   : > { %3237 = vst.msk [vmem:[#allocation2 + $0x38] sm:$0xff] %vm1100_vm11, %v3208_v18 }
 0x405   : > { %3578 = vst.msk [vmem:[#allocation2 + $0x68] sm:$0xff] %vm6780_vm15, %v3552_v24  ;;  %3412 = vrot.lane.b32.xlu0 %v4621_v13, %s4806_s15  ;;  %3414 = vrot.lane.b32.xlu1 %v4622_v19, %s4806_s15 }
 0x407   : > { %v3554_v28 = vpop.permute.xlu0 %3553  ;;  %v2739_v31 = vpop.permute.xlu1 %2738 }
 0x408   : > { %3579 = vst.msk [vmem:[#allocation2 + $0x78] sm:$0xff] %vm6781_vm0, %v3554_v28 }
 0x409   : > { %2767 = vst.msk [vmem:[#allocation2 + $0x48] sm:$0xff] %vm623_vm4, %v2739_v31  ;;  %3289 = vrot.lane.b32.xlu0 %v4605_v23, %s4804_s7  ;;  %3479 = vrot.lane.b32.xlu1 %v4632_v27, %s6768_s29 }
 0x40b   : > { %v2741_v35 = vpop.permute.xlu0 %2740  ;;  %v3082_v22 = vpop.permute.xlu1 %3081 }
 0x40c   : > { %2768 = vst.msk [vmem:[#allocation2 + $0x58] sm:$0xff] %vm623_vm4, %v2741_v35  ;;  %v3596_v25 = vld [vmem:[#allocation2 + $0x68] sm:$0xff] }
 0x40d   : > { %3106 = vst.msk [vmem:[#allocation2 + $0x88] sm:$0xff] %vm964_vm9, %v3082_v22  ;;  %3481 = vrot.lane.b32.xlu0 %v4633_v14, %s6768_s29  ;;  %3356 = vrot.lane.b32.xlu1 %v4616_v20, %s4805_s14 }
 0x40f   : > { %v3084_v33 = vpop.permute.xlu0 %3083  ;;  %v3274_v34 = vpop.permute.xlu1 %3273  ;;  %v3598_v37 = vld [vmem:[#allocation2 + $0x78] sm:$0xff] }
 0x410   : > { %3107 = vst.msk [vmem:[#allocation2 + $0x98] sm:$0xff] %vm964_vm9, %v3084_v33  ;;  %v3612_v38 = vpack.c.bf16 %v3598_v37, %v3596_v25 }
 0x411   : > { %3304 = vst.msk [vmem:[#allocation2 + $0x28] sm:$0xff] %vm1168_vm12, %v3274_v34  ;;  %3547 = vrot.lane.b32.xlu0 %v4643_v9, %s6769_s9  ;;  %3549 = vrot.lane.b32.xlu1 %v4644_v30, %s6769_s9  ;;  %v3599_v9 = vld [vmem:[#allocation2 + $0x80] sm:$0xff]  ;;  %v3601_v30 = vld [vmem:[#allocation2 + $0x90] sm:$0xff] }
 0x412   : > { %4667 = vmatprep.mubr.msk.bf16.mxu1 %vm3724_vm14, %v3612_v38  ;;  %v3613_v38 = vpack.c.bf16 %v3601_v30, %v3599_v9 }
 0x413   : > { %v3276_v40 = vpop.permute.xlu0 %3275  ;;  %v2806_v51 = vpop.permute.xlu1 %2805  ;;  %3804 = vmatmul.mubr.bf16.vlgmr.msra.gmra.mxu1 %v3611_v62 }
 0x414   : > { %3305 = vst.msk [vmem:[#allocation2 + $0x38] sm:$0xff] %vm1168_vm12, %v3276_v40 }
 0x415   : > { %2834 = vst.msk [vmem:[#allocation2 + $0x48] sm:$0xff] %vm691_vm5, %v2806_v51  ;;  %3424 = vrot.lane.b32.xlu0 %v4627_v48, %s4806_s15  ;;  %3491 = vrot.lane.b32.xlu1 %v4638_v39, %s6768_s29 }
 0x417   : > { %v2808_v56 = vpop.permute.xlu0 %2807  ;;  %v3151_v42 = vpop.permute.xlu1 %3150 }
 0x418   : > { %2835 = vst.msk [vmem:[#allocation2 + $0x58] sm:$0xff] %vm691_vm5, %v2808_v56 }
 0x419   : > { %3175 = vst.msk [vmem:[#allocation2 + $0x88] sm:$0xff] %vm1032_vm10, %v3151_v42  ;;  %3559 = vrot.lane.b32.xlu0 %v4649_v41, %s6769_s9 }
 0x41b   : > { %v3153_v59 = vpop.permute.xlu0 %3152  ;;  %v3341_v43 = vpop.permute.xlu1 %3340 }
 0x41c   : > { %3176 = vst.msk [vmem:[#allocation2 + $0x98] sm:$0xff] %vm1032_vm10, %v3153_v59 }
 0x41d   : > { %3371 = vst.msk [vmem:[#allocation2 + $0x28] sm:$0xff] %vm1236_vm13, %v3341_v43 }
 0x41f   : > { %v3343_v44 = vpop.permute.xlu0 %3342  ;;  %v2684_v46 = vpop.permute.xlu1 %2683 }
 0x420   : > { %3372 = vst.msk [vmem:[#allocation2 + $0x38] sm:$0xff] %vm1236_vm13, %v3343_v44 }
 0x421   : > { %2706 = vst.msk [vmem:[#allocation2 + $0xa8] sm:$0xff] %vm554_vm3, %v2684_v46  ;;  %vm6784_vm3 = vcmask 523744  }
 0x422   : > { %vm6785_vm15 = vmmov %vm6784_vm3 }
 0x423   : > { %v2873_v50 = vpop.permute.xlu0 %2872  ;;  %v2875_v53 = vpop.permute.xlu1 %2874 }
 0x424   : > { %2901 = vst.msk [vmem:[#allocation2 + $0x48] sm:$0xff] %vm760_vm6, %v2873_v50  ;;  %2902 = vst.msk [vmem:[#allocation2 + $0x58] sm:$0xff] %vm760_vm6, %v2875_v53  ;;  %v3591_v50 = vld [vmem:[#allocation2 + $0x40] sm:$0xff]  ;;  %v3593_v53 = vld [vmem:[#allocation2 + $0x50] sm:$0xff] }
 0x427   : > { %v3218_v2 = vpop.permute.xlu0 %3217  ;;  %v3220_v11 = vpop.permute.xlu1 %3219 }
 0x428   : > { %3242 = vst.msk [vmem:[#allocation2 + $0x88] sm:$0xff] %vm1100_vm11, %v3218_v2  ;;  %3243 = vst.msk [vmem:[#allocation2 + $0x98] sm:$0xff] %vm1100_vm11, %v3220_v11 }
 0x42b   : > { %v3409_v21 = vpop.permute.xlu0 %3408  ;;  %v3411_v54 = vpop.permute.xlu1 %3410 }
 0x42c   : > { %3439 = vst.msk [vmem:[#allocation2 + $0x28] sm:$0xff] %vm6782_vm1, %v3409_v21 }
 0x42d   : > { %3440 = vst.msk [vmem:[#allocation2 + $0x38] sm:$0xff] %vm6783_vm2, %v3411_v54 }
 0x42f   : > { %v2751_v57 = vpop.permute.xlu0 %2750  ;;  %v2940_v26 = vpop.permute.xlu1 %2939 }
 0x430   : > { %2773 = vst.msk [vmem:[#allocation2 + $0xa8] sm:$0xff] %vm623_vm4, %v2751_v57  ;;  %vm6786_vm4 = vmmov %vm6781_vm0  ;;  %v3609_v57 = vpack.c.bf16 %v3593_v53, %v3591_v50 }
 0x431   : > { %2968 = vst.msk [vmem:[#allocation2 + $0x48] sm:$0xff] %vm828_vm7, %v2940_v26  ;;  %v3603_v26 = vld [vmem:[#allocation2 + $0xa0] sm:$0xff] }
 0x433   : > { %v2942_v49 = vpop.permute.xlu0 %2941  ;;  %v3286_v58 = vpop.permute.xlu1 %3285 }
 0x434   : > { %2969 = vst.msk [vmem:[#allocation2 + $0x58] sm:$0xff] %vm828_vm7, %v2942_v49 }
 0x435   : > { %3310 = vst.msk [vmem:[#allocation2 + $0x88] sm:$0xff] %vm1168_vm12, %v3286_v58 }
 0x437   : > { %v3288_v45 = vpop.permute.xlu0 %3287  ;;  %v3476_v32 = vpop.permute.xlu1 %3475 }
 0x438   : > { %3311 = vst.msk [vmem:[#allocation2 + $0x98] sm:$0xff] %vm1168_vm12, %v3288_v45  ;;  %v3615_v45 = vpack.c.bf16 %v3603_v26, %v3603_v26 }
 0x439   : > { %3506 = vst.msk [vmem:[#allocation2 + $0x28] sm:$0xff] %vm6784_vm3, %v3476_v32  ;;  %v4650_v32 = vld [vmem:[%s6759_s5] ss:$0 sm:$0xff] }
 0x43b   : > { %v3478_v36 = vpop.permute.xlu0 %3477  ;;  %v2818_v61 = vpop.permute.xlu1 %2817 }
 0x43c   : > { %3507 = vst.msk [vmem:[#allocation2 + $0x38] sm:$0xff] %vm6785_vm15, %v3478_v36 }
 0x43d   : > { %2840 = vst.msk [vmem:[#allocation2 + $0xa8] sm:$0xff] %vm691_vm5, %v2818_v61  ;;  %vm6787_vm5 = vmmov %vm6782_vm1 }
 0x43f   : > { %v3007_v47 = vpop.permute.xlu0 %3006  ;;  %v3009_v1 = vpop.permute.xlu1 %3008 }
 0x440   : > { %3035 = vst.msk [vmem:[#allocation2 + $0x48] sm:$0xff] %vm896_vm8, %v3007_v47  ;;  %3036 = vst.msk [vmem:[#allocation2 + $0x58] sm:$0xff] %vm896_vm8, %v3009_v1 }
 0x443   : > { %v3353_v52 = vpop.permute.xlu0 %3352  ;;  %v3355_v55 = vpop.permute.xlu1 %3354 }
 0x444   : > { %3377 = vst.msk [vmem:[#allocation2 + $0x88] sm:$0xff] %vm1236_vm13, %v3353_v52  ;;  %3378 = vst.msk [vmem:[#allocation2 + $0x98] sm:$0xff] %vm1236_vm13, %v3355_v55 }
 0x447   : > { %v3544_v60 = vpop.permute.xlu0 %3543  ;;  %v3546_v12 = vpop.permute.xlu1 %3545 }
 0x448   : > { %3574 = vst.msk [vmem:[#allocation2 + $0x28] sm:$0xff] %vm6786_vm4, %v3544_v60  ;;  %vm6798_vm4 = vmmov %vm6781_vm0 }
 0x449   : > { %3575 = vst.msk [vmem:[#allocation2 + $0x38] sm:$0xff] %vm6781_vm0, %v3546_v12 }
 0x44b   : > { %v2885_v16 = vpop.permute.xlu0 %2884  ;;  %v3074_v63 = vpop.permute.xlu1 %3073 }
 0x44c   : > { %2907 = vst.msk [vmem:[#allocation2 + $0xa8] sm:$0xff] %vm760_vm6, %v2885_v16  ;;  %vm6788_vm6 = vmmov %vm6782_vm1 }
 0x44d   : > { %3102 = vst.msk [vmem:[#allocation2 + $0x48] sm:$0xff] %vm964_vm9, %v3074_v63  ;;  %vm6789_vm1 = vmmov %vm6784_vm3 }
 0x44e   : > { %vm6790_vm2 = vmmov %vm6789_vm1 }
 0x44f   : > { %v3076_v8 = vpop.permute.xlu0 %3075  ;;  %v3421_v15 = vpop.permute.xlu1 %3420  ;;  %v3588_v3 = vld [vmem:[#allocation2 + $0x28] sm:$0xff]  ;;  %vm6792_vm3 = vmmov %vm6781_vm0 }
 0x450   : > { %v3590_v4 = vld [vmem:[#allocation2 + $0x38] sm:$0xff]  ;;  %3103 = vst.msk [vmem:[#allocation2 + $0x58] sm:$0xff] %vm964_vm9, %v3076_v8  ;;  %vm6796_vm15 = vmmov %vm6789_vm1 }
 0x451   : > { %3445 = vst.msk [vmem:[#allocation2 + $0x88] sm:$0xff] %vm6787_vm5, %v3421_v15  ;;  %v3608_v5 = vpack.c.bf16 %v3590_v4, %v3588_v3 }
 0x453   : > { %4665 = vmatprep.mubr.msk.bf16.mxu0 %vm3724_vm14, %v3608_v5  ;;  %v3423_v10 = vpop.permute.xlu0 %3422  ;;  %v2952_v13 = vpop.permute.xlu1 %2951 }
 0x454   : > { %3788 = vmatmul.mubr.bf16.gmra.mxu0 %v3607_v6  ;;  %3446 = vst.msk [vmem:[#allocation2 + $0x98] sm:$0xff] %vm6788_vm6, %v3423_v10 }
 0x455   : > { %2974 = vst.msk [vmem:[#allocation2 + $0xa8] sm:$0xff] %vm828_vm7, %v2952_v13  ;;  %vm6791_vm7 = vmmov %vm6781_vm0 }
 0x457   : > { %v3143_v19 = vpop.permute.xlu0 %3142  ;;  %v3145_v18 = vpop.permute.xlu1 %3144 }
 0x458   : > { %3171 = vst.msk [vmem:[#allocation2 + $0x48] sm:$0xff] %vm1032_vm10, %v3143_v19  ;;  %3172 = vst.msk [vmem:[#allocation2 + $0x58] sm:$0xff] %vm1032_vm10, %v3145_v18 }
 0x45b   : > { %v3488_v24 = vpop.permute.xlu0 %3487  ;;  %v3490_v23 = vpop.permute.xlu1 %3489 }
 0x45c   : > { %3512 = vst.msk [vmem:[#allocation2 + $0x88] sm:$0xff] %vm6789_vm1, %v3488_v24 }
 0x45d   : > { %3513 = vst.msk [vmem:[#allocation2 + $0x98] sm:$0xff] %vm6790_vm2, %v3490_v23 }
 0x45f   : > { %v3019_v27 = vpop.permute.xlu0 %3018  ;;  %v3210_v28 = vpop.permute.xlu1 %3209 }
 0x460   : > { %3041 = vst.msk [vmem:[#allocation2 + $0xa8] sm:$0xff] %vm896_vm8, %v3019_v27  ;;  %vm6793_vm8 = vmmov %vm6787_vm5 }
 0x461   : > { %3238 = vst.msk [vmem:[#allocation2 + $0x48] sm:$0xff] %vm1100_vm11, %v3210_v28 }
 0x463   : > { %v3212_v31 = vpop.permute.xlu0 %3211  ;;  %v3556_v14 = vpop.permute.xlu1 %3555 }
 0x464   : > { %3239 = vst.msk [vmem:[#allocation2 + $0x58] sm:$0xff] %vm1100_vm11, %v3212_v31 }
 0x465   : > { %3580 = vst.msk [vmem:[#allocation2 + $0x88] sm:$0xff] %vm6791_vm7, %v3556_v14 }
 0x467   : > { %v3558_v20 = vpop.permute.xlu0 %3557  ;;  %v3086_v35 = vpop.permute.xlu1 %3085 }
 0x468   : > { %3581 = vst.msk [vmem:[#allocation2 + $0x98] sm:$0xff] %vm6792_vm3, %v3558_v20 }
 0x469   : > { %3108 = vst.msk [vmem:[#allocation2 + $0xa8] sm:$0xff] %vm964_vm9, %v3086_v35  ;;  %vm6794_vm9 = vmmov %vm6787_vm5 }
 0x46b   : > { %v3278_v22 = vpop.permute.xlu0 %3277  ;;  %v3280_v25 = vpop.permute.xlu1 %3279 }
 0x46c   : > { %3306 = vst.msk [vmem:[#allocation2 + $0x48] sm:$0xff] %vm1168_vm12, %v3278_v22  ;;  %3307 = vst.msk [vmem:[#allocation2 + $0x58] sm:$0xff] %vm1168_vm12, %v3280_v25  ;;  %v3600_v29 = vld [vmem:[#allocation2 + $0x88] sm:$0xff] }
 0x46f   : > { %v3155_v17 = vpop.permute.xlu0 %3154  ;;  %v3345_v33 = vpop.permute.xlu1 %3344  ;;  %v3602_v34 = vld [vmem:[#allocation2 + $0x98] sm:$0xff] }
 0x470   : > { %3177 = vst.msk [vmem:[#allocation2 + $0xa8] sm:$0xff] %vm1032_vm10, %v3155_v17  ;;  %v3614_v37 = vpack.c.bf16 %v3602_v34, %v3600_v29  ;;  %vm6795_vm10 = vmmov %vm6789_vm1 }
 0x471   : > { %3373 = vst.msk [vmem:[#allocation2 + $0x48] sm:$0xff] %vm1236_vm13, %v3345_v33 }
 0x472   : > { %4668 = vmatprep.mubr.msk.bf16.mxu1 %vm3724_vm14, %v3614_v37 }
 0x473   : > { %v3347_v62 = vpop.permute.xlu0 %3346  ;;  %v3222_v48 = vpop.permute.xlu1 %3221  ;;  %3812 = vmatmul.mubr.bf16.gmra.mxu1 %v3613_v38 }
 0x474   : > { %3374 = vst.msk [vmem:[#allocation2 + $0x58] sm:$0xff] %vm1236_vm13, %v3347_v62 }
 0x475   : > { %3244 = vst.msk [vmem:[#allocation2 + $0xa8] sm:$0xff] %vm1100_vm11, %v3222_v48  ;;  %vm6797_vm11 = vmmov %vm6781_vm0 }
 0x476   : > { %vm6799_vm0 = vmmov %vm6787_vm5 }
 0x477   : > { %v3413_v39 = vpop.permute.xlu0 %3412  ;;  %v3415_v40 = vpop.permute.xlu1 %3414  ;;  %vm6800_vm5 = vmmov %vm6789_vm1 }
 0x478   : > { %3441 = vst.msk [vmem:[#allocation2 + $0x48] sm:$0xff] %vm6793_vm8, %v3413_v39 }
 0x479   : > { %3442 = vst.msk [vmem:[#allocation2 + $0x58] sm:$0xff] %vm6794_vm9, %v3415_v40 }
 0x47b   : > { %v3290_v51 = vpop.permute.xlu0 %3289  ;;  %v3480_v41 = vpop.permute.xlu1 %3479 }
 0x47c   : > { %3312 = vst.msk [vmem:[#allocation2 + $0xa8] sm:$0xff] %vm1168_vm12, %v3290_v51  ;;  %vm6801_vm12 = vmmov %vm6792_vm3 }
 0x47d   : > { %3508 = vst.msk [vmem:[#allocation2 + $0x48] sm:$0xff] %vm6795_vm10, %v3480_v41 }
 0x47f   : > { %v3482_v56 = vpop.permute.xlu0 %3481  ;;  %v3357_v42 = vpop.permute.xlu1 %3356 }
 0x480   : > { %3509 = vst.msk [vmem:[#allocation2 + $0x58] sm:$0xff] %vm6796_vm15, %v3482_v56 }
 0x481   : > { %3379 = vst.msk [vmem:[#allocation2 + $0xa8] sm:$0xff] %vm1236_vm13, %v3357_v42  ;;  %vm3838_vm13 = vcmask 523264  }
 0x483   : > { %v3548_v59 = vpop.permute.xlu0 %3547  ;;  %v3550_v43 = vpop.permute.xlu1 %3549 }
 0x484   : > { %3576 = vst.msk [vmem:[#allocation2 + $0x48] sm:$0xff] %vm6797_vm11, %v3548_v59 }
 0x485   : > { %3577 = vst.msk [vmem:[#allocation2 + $0x58] sm:$0xff] %vm6798_vm4, %v3550_v43 }
 0x487   : > { %v3425_v44 = vpop.permute.xlu0 %3424  ;;  %v3492_v46 = vpop.permute.xlu1 %3491 }
 0x488   : > { %3447 = vst.msk [vmem:[#allocation2 + $0xa8] sm:$0xff] %vm6799_vm0, %v3425_v44 }
 0x489   : > { %3514 = vst.msk [vmem:[#allocation2 + $0xa8] sm:$0xff] %vm6800_vm5, %v3492_v46 }
 0x48b   : > { %v3560_v2 = vpop.permute.xlu0 %3559  ;;  %v3592_v11 = vld [vmem:[#allocation2 + $0x48] sm:$0xff] }
 0x48c   : > { %v3594_v21 = vld [vmem:[#allocation2 + $0x58] sm:$0xff]  ;;  %3582 = vst.msk [vmem:[#allocation2 + $0xa8] sm:$0xff] %vm6801_vm12, %v3560_v2 }
 0x48d   : > { %v3610_v54 = vpack.c.bf16 %v3594_v21, %v3592_v11 }
 0x48f   : > { %4666 = vmatprep.mubr.msk.bf16.mxu0 %vm3724_vm14, %v3610_v54 }
 0x490   : > { %3796 = vmatmul.mubr.bf16.gmra.mxu0 %v3609_v57 }
 0x493   : > { %v3604_v49 = vld [vmem:[#allocation2 + $0xa8] sm:$0xff] }
 0x494   : > { %v3616_v58 = vpack.c.bf16 %v3604_v49, %v3604_v49 }
 0x496   : > { %4669 = vmatprep.mubr.msk.bf16.mxu1 %vm3724_vm14, %v3616_v58 }
 0x497   : > { %3820 = vmatmul.mubr.bf16.gmra.mxu1 %v3615_v45 }
 0x4ac   : > { %v3781_v36 = vpop.f32.mrf.mxu0 }
 0x4ad   : > { %v3782_v61 = vadd.f32 %v4650_v32, %v3781_v36 }
 0x4ae   : > { %v3783_v47 = vpop.f32.mrf.mxu0 }
 0x4af   : > { %v3827_v1 = vmax.f32 %v3782_v61, 0.0 }
 0x4b0   : > { %v3784_v52 = vpop.f32.mrf.mxu0 }
 0x4b1   : > { %3839 = vst.msk [vmem:[%s6721_s13] sm:$0xff] %vm3838_vm13, %v3827_v1  ;;  %v3785_v55 = vadd.f32 %v4650_v32, %v3784_v52 }
 0x4b2   : > { %v3786_v60 = vpop.f32.mrf.mxu0 }
 0x4b3   : > { %v3828_v12 = vmax.f32 %v3785_v55, 0.0 }
 0x4b5   : > { %3840 = vst.msk [vmem:[%s6721_s13 + $0x8] sm:$0xff] %vm3838_vm13, %v3828_v12 }
 0x4d3   : > { %v3805_v16 = vpop.f32.mrf.mxu1 }
 0x4d4   : > { %v3806_v63 = vadd.f32 %v4650_v32, %v3805_v16 }
 0x4d5   : > { %v3807_v0 = vpop.f32.mrf.mxu1 }
 0x4d6   : > { %v3833_v7 = vmax.f32 %v3806_v63, 0.0 }
 0x4d7   : > { %v3808_v8 = vpop.f32.mrf.mxu1 }
 0x4d8   : > { %3845 = vst.msk [vmem:[%s6721_s13 + $0x30] sm:$0xff] %vm3838_vm13, %v3833_v7  ;;  %v3809_v15 = vadd.f32 %v4650_v32, %v3808_v8 }
 0x4d9   : > { %v3810_v3 = vpop.f32.mrf.mxu1 }
 0x4da   : > { %v3834_v4 = vmax.f32 %v3809_v15, 0.0 }
 0x4dc   : > { %3846 = vst.msk [vmem:[%s6721_s13 + $0x38] sm:$0xff] %vm3838_vm13, %v3834_v4 }
 0x514   : > { %v3789_v5 = vpop.f32.mrf.mxu0 }
 0x515   : > { %v3790_v6 = vadd.f32 %v4650_v32, %v3789_v5 }
 0x516   : > { %v3791_v10 = vpop.f32.mrf.mxu0 }
 0x517   : > { %v3829_v13 = vmax.f32 %v3790_v6, 0.0 }
 0x518   : > { %v3792_v19 = vpop.f32.mrf.mxu0 }
 0x519   : > { %3841 = vst.msk [vmem:[%s6721_s13 + $0x10] sm:$0xff] %vm3838_vm13, %v3829_v13  ;;  %v3793_v18 = vadd.f32 %v4650_v32, %v3792_v19 }
 0x51a   : > { %v3794_v24 = vpop.f32.mrf.mxu0 }
 0x51b   : > { %v3830_v23 = vmax.f32 %v3793_v18, 0.0 }
 0x51d   : > { %3842 = vst.msk [vmem:[%s6721_s13 + $0x18] sm:$0xff] %vm3838_vm13, %v3830_v23 }
 0x533   : > { %v3813_v27 = vpop.f32.mrf.mxu1 }
 0x534   : > { %v3814_v28 = vadd.f32 %v4650_v32, %v3813_v27 }
 0x535   : > { %v3815_v31 = vpop.f32.mrf.mxu1 }
 0x536   : > { %v3835_v14 = vmax.f32 %v3814_v28, 0.0 }
 0x537   : > { %v3816_v20 = vpop.f32.mrf.mxu1 }
 0x538   : > { %3847 = vst.msk [vmem:[%s6721_s13 + $0x40] sm:$0xff] %vm3838_vm13, %v3835_v14  ;;  %v3817_v35 = vadd.f32 %v4650_v32, %v3816_v20 }
 0x539   : > { %v3818_v22 = vpop.f32.mrf.mxu1 }
 0x53a   : > { %v3836_v25 = vmax.f32 %v3817_v35, 0.0 }
 0x53c   : > { %3848 = vst.msk [vmem:[%s6721_s13 + $0x48] sm:$0xff] %vm3838_vm13, %v3836_v25 }
 0x550   : > { %v3797_v29 = vpop.f32.mrf.mxu0 }
 0x551   : > { %v3798_v9 = vadd.f32 %v4650_v32, %v3797_v29 }
 0x552   : > { %v3799_v30 = vpop.f32.mrf.mxu0 }
 0x553   : > { %v3831_v17 = vmax.f32 %v3798_v9, 0.0 }
 0x554   : > { %v3800_v33 = vpop.f32.mrf.mxu0 }
 0x555   : > { %3843 = vst.msk [vmem:[%s6721_s13 + $0x20] sm:$0xff] %vm3838_vm13, %v3831_v17  ;;  %v3801_v34 = vadd.f32 %v4650_v32, %v3800_v33 }
 0x556   : > { %v3802_v37 = vpop.f32.mrf.mxu0 }
 0x557   : > { %v3832_v38 = vmax.f32 %v3801_v34, 0.0  ;;  %v3821_v62 = vpop.f32.mrf.mxu1 }
 0x558   : > { %v3822_v48 = vadd.f32 %v4650_v32, %v3821_v62 }
 0x559   : > { %3844 = vst.msk [vmem:[%s6721_s13 + $0x28] sm:$0xff] %vm3838_vm13, %v3832_v38  ;;  %v3823_v39 = vpop.f32.mrf.mxu1 }
 0x55a   : > { %v3837_v40 = vmax.f32 %v3822_v48, 0.0 }
 0x55b   : > { %v3824_v51 = vpop.f32.mrf.mxu1 }
 0x55c   : > { %3849 = vst.msk [vmem:[%s6721_s13 + $0x50] sm:$0xff] %vm3838_vm13, %v3837_v40 }
 0x55d   : > { %v3825_v41 = vpop.f32.mrf.mxu1 }
 0x55e PF: > { %s16_s23 = sadd.s32 1, %s4791_s23   ;;  %s6802_s21 = smov %s4787_s22 }
 0x55f   : > { %p13_p5 = scmp.ge.s32.totalorder %s16_s23, 4   ;;  %s6803_s22 = smov %s6805_s24 }
 0x561   :  { %15 = sbr.rel (!%p13_p5) target bundleno = 2 (0x2), region = 132 }

</bundles_post_ra>
